<compile_context>
chip_gen: v5e
topology: v5e:2x2
jax: 0.10.0
libtpu: 0.0.40
codegen_flags: <defaults>
</compile_context>

<pallas_src>
import jax
import jax.numpy as jnp
from jax.experimental import pallas as pl
from jax.experimental.pallas import tpu as pltpu


def make_lstm_kernel(num_layers, hidden_pad, seq_len, classification, compute_dtype):
    Hp = hidden_pad            # lane-aligned (multiple of 128) padded hidden size
    T = seq_len

    def kernel(*refs):
        # refs = x, [w_ih, w_hh, bias]*L, fc1_w, fc1_b, fc2_w, fc2_b, out,
        #        seq_buf, zproj_buf
        idx = 0
        x_ref = refs[idx]; idx += 1
        layer_refs = []
        for _ in range(num_layers):
            layer_refs.append((refs[idx], refs[idx + 1], refs[idx + 2]))
            idx += 3
        fc1_w, fc1_b, fc2_w, fc2_b = refs[idx:idx + 4]; idx += 4
        out_ref = refs[idx]; idx += 1
        seq_buf, zproj_buf = refs[idx:idx + 2]

        B = x_ref.shape[1] // T          # batch rows owned by this grid step

        h_last = None
        for layer in range(num_layers):
            w_ih, w_hh, bias = layer_refs[layer]

            # --- Hoisted: batched input projection (+bias) for the whole sequence ---
            if layer == 0:
                inp = x_ref[0]           # (T*B, D_in)
            else:
                inp = seq_buf[...]       # (T*B, Hp) = previous layer's output sequence
            zproj_buf[...] = (
                jnp.dot(inp.astype(compute_dtype), w_ih[...].astype(compute_dtype),
                        preferred_element_type=jnp.float32)
                + bias[...])             # (T*B, 4Hp); bias broadcast once per layer

            w_hh_c = w_hh[...].astype(compute_dtype)   # hoisted out of the t loop
            write_seq = layer < num_layers - 1         # top layer skips per-step store

            def step(t, carry):
                h_prev, c_prev = carry
                row = pl.multiple_of(t * B, B)
                # One MXU push per serial step; precomputed projection already has bias.
                z = zproj_buf[pl.ds(row, B), :] + jnp.dot(
                    h_prev.astype(compute_dtype), w_hh_c,
                    preferred_element_type=jnp.float32)        # (B, 4Hp)
                # Gate slices are whole lane-aligned 128-wide blocks (Hp % 128 == 0):
                # zero masking, zero cross-lane shuffles.  Padding lanes carry z == 0,
                # so c_pad stays 0 and h_pad stays 0 for all t (exact math).
                i_g = jax.nn.sigmoid(z[:, 0:Hp])
                f_g = jax.nn.sigmoid(z[:, Hp:2 * Hp])
                g_g = jnp.tanh(z[:, 2 * Hp:3 * Hp])
                o_g = jax.nn.sigmoid(z[:, 3 * Hp:4 * Hp])
                c_new = f_g * c_prev + i_g * g_g               # gate math stays f32
                h_new = o_g * jnp.tanh(c_new)
                if write_seq:
                    seq_buf[pl.ds(row, B), :] = h_new          # unmasked 128-lane vst
                return h_new, c_new

            h0 = jnp.zeros((B, Hp), jnp.float32)               # matches torch.zeros h0/c0
            c0 = jnp.zeros((B, Hp), jnp.float32)
            h_last, _ = jax.lax.fori_loop(0, T, step, (h0, c0),
                                          unroll=True if T <= 8 else False)

        # out[:, -1, :] of the top layer == its final hidden state.
        y = jnp.maximum(h_last, 0.0)                                            # relu
        y = jnp.dot(y.astype(compute_dtype), fc1_w[...].astype(compute_dtype),
                    preferred_element_type=jnp.float32) + fc1_b[...]
        y = jnp.maximum(y, 0.0)                                                 # relu
        y = jnp.dot(y.astype(compute_dtype), fc2_w[...].astype(compute_dtype),
                    preferred_element_type=jnp.float32) + fc2_b[...]
        if classification:
            y = jax.nn.sigmoid(y)
        out_ref[...] = y.astype(out_ref.dtype)

    return kernel


def _round_up(v, m):
    return ((v + m - 1) // m) * m


def _pad_gates_cols(w, H, Hp):
    """(in_dim, 4H) -> (in_dim, 4Hp): each gate block zero-padded to Hp lanes."""
    if Hp == H:
        return w
    in_dim = w.shape[0]
    w4 = w.reshape(in_dim, 4, H)
    w4 = jnp.pad(w4, ((0, 0), (0, 0), (0, Hp - H)))
    return w4.reshape(in_dim, 4 * Hp)


def _pad_rows(w, H, Hp):
    """(H, n) -> (Hp, n): zero-pad the contraction rows (h padding lanes are 0 anyway)."""
    if Hp == H:
        return w
    return jnp.pad(w, ((0, Hp - H), (0, 0)))


def lstm_forward(x, params, *, hidden_dim, num_layers, classification=False,
                 compute_dtype=jnp.float32, batch_tile=None):
    """x: (B, T, D_in) batch_first, float32. Returns (B, output_dim).

    compute_dtype=jnp.bfloat16 casts matmul operands only (f32 accumulation, f32
    gate math) — recommended on v6e/v7x; keep f32 here for exact verification.
    batch_tile < B adds a "parallel" grid axis over batch tiles (v7x two-TC).
    """
    B, T, D_in = x.shape
    H = hidden_dim
    Hp = _round_up(H, 128)      # lane-aligned hidden size (exact zero-padding)

    if batch_tile is None:
        batch_tile = B
    assert B % batch_tile == 0
    assert batch_tile == B or batch_tile % 8 == 0, "batch tile must be sublane aligned"
    n_tiles = B // batch_tile

    # Re-tile x: (B, T, D) -> (n_tiles, T*batch_tile, D), time-major within each tile.
    x_tiled = (x.transpose(1, 0, 2)                      # (T, B, D)
                .reshape(T, n_tiles, batch_tile, D_in)
                .transpose(1, 0, 2, 3)                   # (n_tiles, T, bt, D)
                .reshape(n_tiles, T * batch_tile, D_in))

    # Lane-dense output slab (pad fc2 columns to a multiple of 128, slice after).
    out_dim = params["fc2_w"].shape[1]
    out_pad = _round_up(out_dim, 128)
    fc2_w, fc2_b = params["fc2_w"], params["fc2_b"]
    if out_pad != out_dim:
        fc2_w = jnp.pad(fc2_w, ((0, 0), (0, out_pad - out_dim)))
        fc2_b = jnp.pad(fc2_b, (0, out_pad - out_dim))

    inputs = [x_tiled]
    in_specs = [pl.BlockSpec((1, T * batch_tile, D_in), lambda b: (b, 0, 0))]
    for layer in range(num_layers):
        w_ih, w_hh, bias = params["lstm"][layer]
        # Lane-aligned gate layout (gate g lives in columns [g*Hp, g*Hp+H), rest zero).
        w_ih_p = _pad_gates_cols(w_ih, H, Hp)
        if layer > 0:
            w_ih_p = _pad_rows(w_ih_p, H, Hp)            # input of layer>=1 is padded h
        w_hh_p = _pad_rows(_pad_gates_cols(w_hh, H, Hp), H, Hp)
        bias_p = _pad_gates_cols(bias.reshape(1, 4 * H), H, Hp)
        d = w_ih_p.shape[0]
        inputs += [w_ih_p, w_hh_p, bias_p]
        in_specs += [pl.BlockSpec((d, 4 * Hp), lambda b: (0, 0)),
                     pl.BlockSpec((Hp, 4 * Hp), lambda b: (0, 0)),
                     pl.BlockSpec((1, 4 * Hp), lambda b: (0, 0))]
    n_fc1 = params["fc1_w"].shape[1]
    fc1_w_p = _pad_rows(params["fc1_w"], H, Hp)
    inputs += [fc1_w_p, params["fc1_b"].reshape(1, n_fc1),
               fc2_w, fc2_b.reshape(1, out_pad)]
    in_specs += [pl.BlockSpec((Hp, n_fc1), lambda b: (0, 0)),
                 pl.BlockSpec((1, n_fc1), lambda b: (0, 0)),
                 pl.BlockSpec((n_fc1, out_pad), lambda b: (0, 0)),
                 pl.BlockSpec((1, out_pad), lambda b: (0, 0))]

    kernel = make_lstm_kernel(num_layers, Hp, T, classification, compute_dtype)

    out = pl.pallas_call(
        kernel,
        out_shape=jax.ShapeDtypeStruct((B, out_pad), jnp.float32),
        grid=(n_tiles,),
        in_specs=in_specs,
        out_specs=pl.BlockSpec((batch_tile, out_pad), lambda b: (b, 0)),
        scratch_shapes=[
            pltpu.VMEM((T * batch_tile, Hp), jnp.float32),       # layer output sequence
            pltpu.VMEM((T * batch_tile, 4 * Hp), jnp.float32),   # precomputed x@W_ih + b
        ],
        compiler_params=pltpu.CompilerParams(
            dimension_semantics=("parallel",)),
    )(*inputs)
    return out[:, :out_dim]


def init_params(key, input_dim, hidden_dim, num_layers, output_dim):
    """Deterministic synthetic parameters (PyTorch-shaped, stored transposed)."""
    H = hidden_dim
    params = {"lstm": []}
    for layer in range(num_layers):
        in_dim = input_dim if layer == 0 else H
        key, k1, k2, k3, k4 = jax.random.split(key, 5)
        s = 1.0 / jnp.sqrt(H)
        w_ih = jax.random.uniform(k1, (in_dim, 4 * H), jnp.float32, -s, s)
        w_hh = jax.random.uniform(k2, (H, 4 * H), jnp.float32, -s, s)
        b_ih = jax.random.uniform(k3, (4 * H,), jnp.float32, -s, s)
        b_hh = jax.random.uniform(k4, (4 * H,), jnp.float32, -s, s)
        params["lstm"].append((w_ih, w_hh, b_ih + b_hh))
    key, k1, k2, k3, k4 = jax.random.split(key, 5)
    params["fc1_w"] = jax.random.uniform(k1, (H, 128), jnp.float32, -0.1, 0.1)
    params["fc1_b"] = jax.random.uniform(k2, (128,), jnp.float32, -0.1, 0.1)
    params["fc2_w"] = jax.random.uniform(k3, (128, output_dim), jnp.float32, -0.1, 0.1)
    params["fc2_b"] = jax.random.uniform(k4, (output_dim,), jnp.float32, -0.1, 0.1)
    return params


def lstm_forward_ref(x, params, *, hidden_dim, num_layers, classification=False):
    """Pure-JAX reference with identical semantics (for verification)."""
    B, T, _ = x.shape
    H = hidden_dim
    seq = x
    for layer in range(num_layers):
        w_ih, w_hh, b = params["lstm"][layer]
        h = jnp.zeros((B, H), jnp.float32)
        c = jnp.zeros((B, H), jnp.float32)
        outs = []
        for t in range(T):
            z = seq[:, t, :] @ w_ih + h @ w_hh + b[None, :]
            i_g = jax.nn.sigmoid(z[:, 0:H])
            f_g = jax.nn.sigmoid(z[:, H:2 * H])
            g_g = jnp.tanh(z[:, 2 * H:3 * H])
            o_g = jax.nn.sigmoid(z[:, 3 * H:4 * H])
            c = f_g * c + i_g * g_g
            h = o_g * jnp.tanh(c)
            outs.append(h)
        seq = jnp.stack(outs, axis=1)
    y = jnp.maximum(seq[:, -1, :], 0.0)
    y = jnp.maximum(y @ params["fc1_w"] + params["fc1_b"], 0.0)
    y = y @ params["fc2_w"] + params["fc2_b"]
    if classification:
        y = jax.nn.sigmoid(y)
    return y


if __name__ == "__main__":
    # config equivalent to the PyTorch module
    config = dict(input_dimension=16, hidden_dimension=32, layers=2,
                  output_dimension=4, dropout=0.0)
    B, T = 8, 8

    key = jax.random.PRNGKey(0)
    key, kx = jax.random.split(key)
    x = jax.random.normal(kx, (B, T, config["input_dimension"]), jnp.float32)
    params = init_params(key, config["input_dimension"], config["hidden_dimension"],
                         config["layers"], config["output_dimension"])

    out = jax.block_until_ready(
        lstm_forward(x, params,
                     hidden_dim=config["hidden_dimension"],
                     num_layers=config["layers"],
                     classification=False))
    ref = jax.block_until_ready(
        lstm_forward_ref(x, params,
                         hidden_dim=config["hidden_dimension"],
                         num_layers=config["layers"],
                         classification=False))

    assert out.shape == (B, config["output_dimension"])
    assert jnp.allclose(out, ref, atol=1e-4, rtol=1e-4), (out, ref)
    print("KERNEL_OK")
</pallas_src>

<mosaic_0001>
module attributes {stable_mosaic.version = 11 : i64} {
  func.func @kernel(%arg0: i32, %arg1: memref<1x64x16xf32, #tpu.memory_space<vmem>>, %arg2: memref<16x512xf32, #tpu.memory_space<vmem>>, %arg3: memref<128x512xf32, #tpu.memory_space<vmem>>, %arg4: memref<1x512xf32, #tpu.memory_space<vmem>>, %arg5: memref<128x512xf32, #tpu.memory_space<vmem>>, %arg6: memref<128x512xf32, #tpu.memory_space<vmem>>, %arg7: memref<1x512xf32, #tpu.memory_space<vmem>>, %arg8: memref<128x128xf32, #tpu.memory_space<vmem>>, %arg9: memref<1x128xf32, #tpu.memory_space<vmem>>, %arg10: memref<128x128xf32, #tpu.memory_space<vmem>>, %arg11: memref<1x128xf32, #tpu.memory_space<vmem>>, %arg12: memref<8x128xf32, #tpu.memory_space<vmem>>, %arg13: memref<64x128xf32, #tpu.memory_space<vmem>>, %arg14: memref<64x512xf32, #tpu.memory_space<vmem>>) attributes {dimension_semantics = [#tpu.dimension_semantics<parallel>], iteration_bounds = array<i64: 1>, scalar_prefetch = 0 : i64, scratch_operands = 2 : i64, tpu.core_type = #tpu.core_type<tc>, window_params = [{transform_indices = @transform_0, window_bounds = array<i64: 1, 64, 16>}, {pipeline_mode = #tpu.pipeline_mode<synchronous>, transform_indices = @transform_1, window_bounds = array<i64: 16, 512>}, {pipeline_mode = #tpu.pipeline_mode<synchronous>, transform_indices = @transform_2, window_bounds = array<i64: 128, 512>}, {pipeline_mode = #tpu.pipeline_mode<synchronous>, transform_indices = @transform_3, window_bounds = array<i64: 1, 512>}, {pipeline_mode = #tpu.pipeline_mode<synchronous>, transform_indices = @transform_4, window_bounds = array<i64: 128, 512>}, {pipeline_mode = #tpu.pipeline_mode<synchronous>, transform_indices = @transform_5, window_bounds = array<i64: 128, 512>}, {pipeline_mode = #tpu.pipeline_mode<synchronous>, transform_indices = @transform_6, window_bounds = array<i64: 1, 512>}, {pipeline_mode = #tpu.pipeline_mode<synchronous>, transform_indices = @transform_7, window_bounds = array<i64: 128, 128>}, {pipeline_mode = #tpu.pipeline_mode<synchronous>, transform_indices = @transform_8, window_bounds = array<i64: 1, 128>}, {pipeline_mode = #tpu.pipeline_mode<synchronous>, transform_indices = @transform_9, window_bounds = array<i64: 128, 128>}, {pipeline_mode = #tpu.pipeline_mode<synchronous>, transform_indices = @transform_10, window_bounds = array<i64: 1, 128>}, {transform_indices = @transform_11, window_bounds = array<i64: 8, 128>}]} {
    %c0 = arith.constant 0 : index
    %c0_0 = arith.constant 0 : index
    %c0_1 = arith.constant 0 : index
    %0 = vector.load %arg1[%c0, %c0_0, %c0_1] : memref<1x64x16xf32, #tpu.memory_space<vmem>>, vector<1x64x16xf32>
    %1 = vector.shape_cast %0 : vector<1x64x16xf32> to vector<64x16xf32>
    %c0_2 = arith.constant 0 : index
    %c0_3 = arith.constant 0 : index
    %2 = vector.load %arg2[%c0_2, %c0_3] : memref<16x512xf32, #tpu.memory_space<vmem>>, vector<16x512xf32>
    %cst = arith.constant dense<0.000000e+00> : vector<64x512xf32>
    %3 = tpu.matmul %1, %2, %cst {dimension_numbers = #tpu.dot_dimension_numbers<[1], [0], [0], [1], [0, 0, 1, 1], [], []>} : vector<64x16xf32>, vector<16x512xf32>, vector<64x512xf32> -> vector<64x512xf32>
    %c0_4 = arith.constant 0 : index
    %c0_5 = arith.constant 0 : index
    %4 = vector.load %arg4[%c0_4, %c0_5] : memref<1x512xf32, #tpu.memory_space<vmem>>, vector<1x512xf32>
    %5 = vector.broadcast %4 : vector<1x512xf32> to vector<64x512xf32>
    %6 = arith.addf %3, %5 : vector<64x512xf32>
    %c0_6 = arith.constant 0 : index
    %c0_7 = arith.constant 0 : index
    %7 = vector.load %arg14[%c0_6, %c0_7] : memref<64x512xf32, #tpu.memory_space<vmem>>, vector<64x512xf32>
    tpu.vector_store %arg14[%c0_6, %c0_7], %6 {strides = array<i32>} : memref<64x512xf32, #tpu.memory_space<vmem>>, vector<64x512xf32>,
    %c0_8 = arith.constant 0 : index
    %c0_9 = arith.constant 0 : index
    %8 = vector.load %arg3[%c0_8, %c0_9] : memref<128x512xf32, #tpu.memory_space<vmem>>, vector<128x512xf32>
    %cst_10 = arith.constant 0.000000e+00 : f32
    %9 = vector.broadcast %cst_10 : f32 to vector<8x128xf32>
    %cst_11 = arith.constant 0.000000e+00 : f32
    %10 = vector.broadcast %cst_11 : f32 to vector<8x128xf32>
    %c0_i32 = arith.constant 0 : i32
    %c8_i32 = arith.constant 8 : i32
    %11 = arith.muli %c0_i32, %c8_i32 : i32
    %12 = tpu.assume_multiple %11, 8 : i32
    %13 = arith.index_cast %12 : i32 to index
    %c0_12 = arith.constant 0 : index
    %14 = vector.load %arg14[%13, %c0_12] : memref<64x512xf32, #tpu.memory_space<vmem>>, vector<8x512xf32>
    %cst_13 = arith.constant dense<0.000000e+00> : vector<8x512xf32>
    %15 = tpu.matmul %9, %8, %cst_13 {dimension_numbers = #tpu.dot_dimension_numbers<[1], [0], [0], [1], [0, 0, 1, 1], [], []>} : vector<8x128xf32>, vector<128x512xf32>, vector<8x512xf32> -> vector<8x512xf32>
    %16 = arith.addf %14, %15 : vector<8x512xf32>
    %17 = vector.extract_strided_slice %16 {offsets = [0, 0], sizes = [8, 128], strides = [1, 1]} : vector<8x512xf32> to vector<8x128xf32>
    %18 = arith.negf %17 : vector<8x128xf32>
    %19 = math.exp %18 : vector<8x128xf32>
    %cst_14 = arith.constant 1.000000e+00 : f32
    %20 = vector.broadcast %cst_14 : f32 to vector<8x128xf32>
    %21 = arith.addf %20, %19 : vector<8x128xf32>
    %22 = arith.divf %20, %21 : vector<8x128xf32>
    %23 = vector.extract_strided_slice %16 {offsets = [0, 128], sizes = [8, 128], strides = [1, 1]} : vector<8x512xf32> to vector<8x128xf32>
    %24 = arith.negf %23 : vector<8x128xf32>
    %25 = math.exp %24 : vector<8x128xf32>
    %cst_15 = arith.constant 1.000000e+00 : f32
    %26 = vector.broadcast %cst_15 : f32 to vector<8x128xf32>
    %27 = arith.addf %26, %25 : vector<8x128xf32>
    %28 = arith.divf %26, %27 : vector<8x128xf32>
    %29 = vector.extract_strided_slice %16 {offsets = [0, 256], sizes = [8, 128], strides = [1, 1]} : vector<8x512xf32> to vector<8x128xf32>
    %30 = math.tanh %29 : vector<8x128xf32>
    %31 = vector.extract_strided_slice %16 {offsets = [0, 384], sizes = [8, 128], strides = [1, 1]} : vector<8x512xf32> to vector<8x128xf32>
    %32 = arith.negf %31 : vector<8x128xf32>
    %33 = math.exp %32 : vector<8x128xf32>
    %cst_16 = arith.constant 1.000000e+00 : f32
    %34 = vector.broadcast %cst_16 : f32 to vector<8x128xf32>
    %35 = arith.addf %34, %33 : vector<8x128xf32>
    %36 = arith.divf %34, %35 : vector<8x128xf32>
    %37 = arith.mulf %28, %10 : vector<8x128xf32>
    %38 = arith.mulf %22, %30 : vector<8x128xf32>
    %39 = arith.addf %37, %38 : vector<8x128xf32>
    %40 = math.tanh %39 : vector<8x128xf32>
    %41 = arith.mulf %36, %40 : vector<8x128xf32>
    %42 = arith.index_cast %12 : i32 to index
    %c0_17 = arith.constant 0 : index
    %43 = vector.load %arg13[%42, %c0_17] : memref<64x128xf32, #tpu.memory_space<vmem>>, vector<8x128xf32>
    tpu.vector_store %arg13[%42, %c0_17], %41 {strides = array<i32>} : memref<64x128xf32, #tpu.memory_space<vmem>>, vector<8x128xf32>,
    %c1_i32 = arith.constant 1 : i32
    %c8_i32_18 = arith.constant 8 : i32
    %44 = arith.muli %c1_i32, %c8_i32_18 : i32
    %45 = tpu.assume_multiple %44, 8 : i32
    %46 = arith.index_cast %45 : i32 to index
    %c0_19 = arith.constant 0 : index
    %47 = vector.load %arg14[%46, %c0_19] : memref<64x512xf32, #tpu.memory_space<vmem>>, vector<8x512xf32>
    %cst_20 = arith.constant dense<0.000000e+00> : vector<8x512xf32>
    %48 = tpu.matmul %41, %8, %cst_20 {dimension_numbers = #tpu.dot_dimension_numbers<[1], [0], [0], [1], [0, 0, 1, 1], [], []>} : vector<8x128xf32>, vector<128x512xf32>, vector<8x512xf32> -> vector<8x512xf32>
    %49 = arith.addf %47, %48 : vector<8x512xf32>
    %50 = vector.extract_strided_slice %49 {offsets = [0, 0], sizes = [8, 128], strides = [1, 1]} : vector<8x512xf32> to vector<8x128xf32>
    %51 = arith.negf %50 : vector<8x128xf32>
    %52 = math.exp %51 : vector<8x128xf32>
    %cst_21 = arith.constant 1.000000e+00 : f32
    %53 = vector.broadcast %cst_21 : f32 to vector<8x128xf32>
    %54 = arith.addf %53, %52 : vector<8x128xf32>
    %55 = arith.divf %53, %54 : vector<8x128xf32>
    %56 = vector.extract_strided_slice %49 {offsets = [0, 128], sizes = [8, 128], strides = [1, 1]} : vector<8x512xf32> to vector<8x128xf32>
    %57 = arith.negf %56 : vector<8x128xf32>
    %58 = math.exp %57 : vector<8x128xf32>
    %cst_22 = arith.constant 1.000000e+00 : f32
    %59 = vector.broadcast %cst_22 : f32 to vector<8x128xf32>
    %60 = arith.addf %59, %58 : vector<8x128xf32>
    %61 = arith.divf %59, %60 : vector<8x128xf32>
    %62 = vector.extract_strided_slice %49 {offsets = [0, 256], sizes = [8, 128], strides = [1, 1]} : vector<8x512xf32> to vector<8x128xf32>
    %63 = math.tanh %62 : vector<8x128xf32>
    %64 = vector.extract_strided_slice %49 {offsets = [0, 384], sizes = [8, 128], strides = [1, 1]} : vector<8x512xf32> to vector<8x128xf32>
    %65 = arith.negf %64 : vector<8x128xf32>
    %66 = math.exp %65 : vector<8x128xf32>
    %cst_23 = arith.constant 1.000000e+00 : f32
    %67 = vector.broadcast %cst_23 : f32 to vector<8x128xf32>
    %68 = arith.addf %67, %66 : vector<8x128xf32>
    %69 = arith.divf %67, %68 : vector<8x128xf32>
    %70 = arith.mulf %61, %39 : vector<8x128xf32>
    %71 = arith.mulf %55, %63 : vector<8x128xf32>
    %72 = arith.addf %70, %71 : vector<8x128xf32>
    %73 = math.tanh %72 : vector<8x128xf32>
    %74 = arith.mulf %69, %73 : vector<8x128xf32>
    %75 = arith.index_cast %45 : i32 to index
    %c0_24 = arith.constant 0 : index
    %76 = vector.load %arg13[%75, %c0_24] : memref<64x128xf32, #tpu.memory_space<vmem>>, vector<8x128xf32>
    tpu.vector_store %arg13[%75, %c0_24], %74 {strides = array<i32>} : memref<64x128xf32, #tpu.memory_space<vmem>>, vector<8x128xf32>,
    %c2_i32 = arith.constant 2 : i32
    %c8_i32_25 = arith.constant 8 : i32
    %77 = arith.muli %c2_i32, %c8_i32_25 : i32
    %78 = tpu.assume_multiple %77, 8 : i32
    %79 = arith.index_cast %78 : i32 to index
    %c0_26 = arith.constant 0 : index
    %80 = vector.load %arg14[%79, %c0_26] : memref<64x512xf32, #tpu.memory_space<vmem>>, vector<8x512xf32>
    %cst_27 = arith.constant dense<0.000000e+00> : vector<8x512xf32>
    %81 = tpu.matmul %74, %8, %cst_27 {dimension_numbers = #tpu.dot_dimension_numbers<[1], [0], [0], [1], [0, 0, 1, 1], [], []>} : vector<8x128xf32>, vector<128x512xf32>, vector<8x512xf32> -> vector<8x512xf32>
    %82 = arith.addf %80, %81 : vector<8x512xf32>
    %83 = vector.extract_strided_slice %82 {offsets = [0, 0], sizes = [8, 128], strides = [1, 1]} : vector<8x512xf32> to vector<8x128xf32>
    %84 = arith.negf %83 : vector<8x128xf32>
    %85 = math.exp %84 : vector<8x128xf32>
    %cst_28 = arith.constant 1.000000e+00 : f32
    %86 = vector.broadcast %cst_28 : f32 to vector<8x128xf32>
    %87 = arith.addf %86, %85 : vector<8x128xf32>
    %88 = arith.divf %86, %87 : vector<8x128xf32>
    %89 = vector.extract_strided_slice %82 {offsets = [0, 128], sizes = [8, 128], strides = [1, 1]} : vector<8x512xf32> to vector<8x128xf32>
    %90 = arith.negf %89 : vector<8x128xf32>
    %91 = math.exp %90 : vector<8x128xf32>
    %cst_29 = arith.constant 1.000000e+00 : f32
    %92 = vector.broadcast %cst_29 : f32 to vector<8x128xf32>
    %93 = arith.addf %92, %91 : vector<8x128xf32>
    %94 = arith.divf %92, %93 : vector<8x128xf32>
    %95 = vector.extract_strided_slice %82 {offsets = [0, 256], sizes = [8, 128], strides = [1, 1]} : vector<8x512xf32> to vector<8x128xf32>
    %96 = math.tanh %95 : vector<8x128xf32>
    %97 = vector.extract_strided_slice %82 {offsets = [0, 384], sizes = [8, 128], strides = [1, 1]} : vector<8x512xf32> to vector<8x128xf32>
    %98 = arith.negf %97 : vector<8x128xf32>
    %99 = math.exp %98 : vector<8x128xf32>
    %cst_30 = arith.constant 1.000000e+00 : f32
    %100 = vector.broadcast %cst_30 : f32 to vector<8x128xf32>
    %101 = arith.addf %100, %99 : vector<8x128xf32>
    %102 = arith.divf %100, %101 : vector<8x128xf32>
    %103 = arith.mulf %94, %72 : vector<8x128xf32>
    %104 = arith.mulf %88, %96 : vector<8x128xf32>
    %105 = arith.addf %103, %104 : vector<8x128xf32>
    %106 = math.tanh %105 : vector<8x128xf32>
    %107 = arith.mulf %102, %106 : vector<8x128xf32>
    %108 = arith.index_cast %78 : i32 to index
    %c0_31 = arith.constant 0 : index
    %109 = vector.load %arg13[%108, %c0_31] : memref<64x128xf32, #tpu.memory_space<vmem>>, vector<8x128xf32>
    tpu.vector_store %arg13[%108, %c0_31], %107 {strides = array<i32>} : memref<64x128xf32, #tpu.memory_space<vmem>>, vector<8x128xf32>,
    %c3_i32 = arith.constant 3 : i32
    %c8_i32_32 = arith.constant 8 : i32
    %110 = arith.muli %c3_i32, %c8_i32_32 : i32
    %111 = tpu.assume_multiple %110, 8 : i32
    %112 = arith.index_cast %111 : i32 to index
    %c0_33 = arith.constant 0 : index
    %113 = vector.load %arg14[%112, %c0_33] : memref<64x512xf32, #tpu.memory_space<vmem>>, vector<8x512xf32>
    %cst_34 = arith.constant dense<0.000000e+00> : vector<8x512xf32>
    %114 = tpu.matmul %107, %8, %cst_34 {dimension_numbers = #tpu.dot_dimension_numbers<[1], [0], [0], [1], [0, 0, 1, 1], [], []>} : vector<8x128xf32>, vector<128x512xf32>, vector<8x512xf32> -> vector<8x512xf32>
    %115 = arith.addf %113, %114 : vector<8x512xf32>
    %116 = vector.extract_strided_slice %115 {offsets = [0, 0], sizes = [8, 128], strides = [1, 1]} : vector<8x512xf32> to vector<8x128xf32>
    %117 = arith.negf %116 : vector<8x128xf32>
    %118 = math.exp %117 : vector<8x128xf32>
    %cst_35 = arith.constant 1.000000e+00 : f32
    %119 = vector.broadcast %cst_35 : f32 to vector<8x128xf32>
    %120 = arith.addf %119, %118 : vector<8x128xf32>
    %121 = arith.divf %119, %120 : vector<8x128xf32>
    %122 = vector.extract_strided_slice %115 {offsets = [0, 128], sizes = [8, 128], strides = [1, 1]} : vector<8x512xf32> to vector<8x128xf32>
    %123 = arith.negf %122 : vector<8x128xf32>
    %124 = math.exp %123 : vector<8x128xf32>
    %cst_36 = arith.constant 1.000000e+00 : f32
    %125 = vector.broadcast %cst_36 : f32 to vector<8x128xf32>
    %126 = arith.addf %125, %124 : vector<8x128xf32>
    %127 = arith.divf %125, %126 : vector<8x128xf32>
    %128 = vector.extract_strided_slice %115 {offsets = [0, 256], sizes = [8, 128], strides = [1, 1]} : vector<8x512xf32> to vector<8x128xf32>
    %129 = math.tanh %128 : vector<8x128xf32>
    %130 = vector.extract_strided_slice %115 {offsets = [0, 384], sizes = [8, 128], strides = [1, 1]} : vector<8x512xf32> to vector<8x128xf32>
    %131 = arith.negf %130 : vector<8x128xf32>
    %132 = math.exp %131 : vector<8x128xf32>
    %cst_37 = arith.constant 1.000000e+00 : f32
    %133 = vector.broadcast %cst_37 : f32 to vector<8x128xf32>
    %134 = arith.addf %133, %132 : vector<8x128xf32>
    %135 = arith.divf %133, %134 : vector<8x128xf32>
    %136 = arith.mulf %127, %105 : vector<8x128xf32>
    %137 = arith.mulf %121, %129 : vector<8x128xf32>
    %138 = arith.addf %136, %137 : vector<8x128xf32>
    %139 = math.tanh %138 : vector<8x128xf32>
    %140 = arith.mulf %135, %139 : vector<8x128xf32>
    %141 = arith.index_cast %111 : i32 to index
    %c0_38 = arith.constant 0 : index
    %142 = vector.load %arg13[%141, %c0_38] : memref<64x128xf32, #tpu.memory_space<vmem>>, vector<8x128xf32>
    tpu.vector_store %arg13[%141, %c0_38], %140 {strides = array<i32>} : memref<64x128xf32, #tpu.memory_space<vmem>>, vector<8x128xf32>,
    %c4_i32 = arith.constant 4 : i32
    %c8_i32_39 = arith.constant 8 : i32
    %143 = arith.muli %c4_i32, %c8_i32_39 : i32
    %144 = tpu.assume_multiple %143, 8 : i32
    %145 = arith.index_cast %144 : i32 to index
    %c0_40 = arith.constant 0 : index
    %146 = vector.load %arg14[%145, %c0_40] : memref<64x512xf32, #tpu.memory_space<vmem>>, vector<8x512xf32>
    %cst_41 = arith.constant dense<0.000000e+00> : vector<8x512xf32>
    %147 = tpu.matmul %140, %8, %cst_41 {dimension_numbers = #tpu.dot_dimension_numbers<[1], [0], [0], [1], [0, 0, 1, 1], [], []>} : vector<8x128xf32>, vector<128x512xf32>, vector<8x512xf32> -> vector<8x512xf32>
    %148 = arith.addf %146, %147 : vector<8x512xf32>
    %149 = vector.extract_strided_slice %148 {offsets = [0, 0], sizes = [8, 128], strides = [1, 1]} : vector<8x512xf32> to vector<8x128xf32>
    %150 = arith.negf %149 : vector<8x128xf32>
    %151 = math.exp %150 : vector<8x128xf32>
    %cst_42 = arith.constant 1.000000e+00 : f32
    %152 = vector.broadcast %cst_42 : f32 to vector<8x128xf32>
    %153 = arith.addf %152, %151 : vector<8x128xf32>
    %154 = arith.divf %152, %153 : vector<8x128xf32>
    %155 = vector.extract_strided_slice %148 {offsets = [0, 128], sizes = [8, 128], strides = [1, 1]} : vector<8x512xf32> to vector<8x128xf32>
    %156 = arith.negf %155 : vector<8x128xf32>
    %157 = math.exp %156 : vector<8x128xf32>
    %cst_43 = arith.constant 1.000000e+00 : f32
    %158 = vector.broadcast %cst_43 : f32 to vector<8x128xf32>
    %159 = arith.addf %158, %157 : vector<8x128xf32>
    %160 = arith.divf %158, %159 : vector<8x128xf32>
    %161 = vector.extract_strided_slice %148 {offsets = [0, 256], sizes = [8, 128], strides = [1, 1]} : vector<8x512xf32> to vector<8x128xf32>
    %162 = math.tanh %161 : vector<8x128xf32>
    %163 = vector.extract_strided_slice %148 {offsets = [0, 384], sizes = [8, 128], strides = [1, 1]} : vector<8x512xf32> to vector<8x128xf32>
    %164 = arith.negf %163 : vector<8x128xf32>
    %165 = math.exp %164 : vector<8x128xf32>
    %cst_44 = arith.constant 1.000000e+00 : f32
    %166 = vector.broadcast %cst_44 : f32 to vector<8x128xf32>
    %167 = arith.addf %166, %165 : vector<8x128xf32>
    %168 = arith.divf %166, %167 : vector<8x128xf32>
    %169 = arith.mulf %160, %138 : vector<8x128xf32>
    %170 = arith.mulf %154, %162 : vector<8x128xf32>
    %171 = arith.addf %169, %170 : vector<8x128xf32>
    %172 = math.tanh %171 : vector<8x128xf32>
    %173 = arith.mulf %168, %172 : vector<8x128xf32>
    %174 = arith.index_cast %144 : i32 to index
    %c0_45 = arith.constant 0 : index
    %175 = vector.load %arg13[%174, %c0_45] : memref<64x128xf32, #tpu.memory_space<vmem>>, vector<8x128xf32>
    tpu.vector_store %arg13[%174, %c0_45], %173 {strides = array<i32>} : memref<64x128xf32, #tpu.memory_space<vmem>>, vector<8x128xf32>,
    %c5_i32 = arith.constant 5 : i32
    %c8_i32_46 = arith.constant 8 : i32
    %176 = arith.muli %c5_i32, %c8_i32_46 : i32
    %177 = tpu.assume_multiple %176, 8 : i32
    %178 = arith.index_cast %177 : i32 to index
    %c0_47 = arith.constant 0 : index
    %179 = vector.load %arg14[%178, %c0_47] : memref<64x512xf32, #tpu.memory_space<vmem>>, vector<8x512xf32>
    %cst_48 = arith.constant dense<0.000000e+00> : vector<8x512xf32>
    %180 = tpu.matmul %173, %8, %cst_48 {dimension_numbers = #tpu.dot_dimension_numbers<[1], [0], [0], [1], [0, 0, 1, 1], [], []>} : vector<8x128xf32>, vector<128x512xf32>, vector<8x512xf32> -> vector<8x512xf32>
    %181 = arith.addf %179, %180 : vector<8x512xf32>
    %182 = vector.extract_strided_slice %181 {offsets = [0, 0], sizes = [8, 128], strides = [1, 1]} : vector<8x512xf32> to vector<8x128xf32>
    %183 = arith.negf %182 : vector<8x128xf32>
    %184 = math.exp %183 : vector<8x128xf32>
    %cst_49 = arith.constant 1.000000e+00 : f32
    %185 = vector.broadcast %cst_49 : f32 to vector<8x128xf32>
    %186 = arith.addf %185, %184 : vector<8x128xf32>
    %187 = arith.divf %185, %186 : vector<8x128xf32>
    %188 = vector.extract_strided_slice %181 {offsets = [0, 128], sizes = [8, 128], strides = [1, 1]} : vector<8x512xf32> to vector<8x128xf32>
    %189 = arith.negf %188 : vector<8x128xf32>
    %190 = math.exp %189 : vector<8x128xf32>
    %cst_50 = arith.constant 1.000000e+00 : f32
    %191 = vector.broadcast %cst_50 : f32 to vector<8x128xf32>
    %192 = arith.addf %191, %190 : vector<8x128xf32>
    %193 = arith.divf %191, %192 : vector<8x128xf32>
    %194 = vector.extract_strided_slice %181 {offsets = [0, 256], sizes = [8, 128], strides = [1, 1]} : vector<8x512xf32> to vector<8x128xf32>
    %195 = math.tanh %194 : vector<8x128xf32>
    %196 = vector.extract_strided_slice %181 {offsets = [0, 384], sizes = [8, 128], strides = [1, 1]} : vector<8x512xf32> to vector<8x128xf32>
    %197 = arith.negf %196 : vector<8x128xf32>
    %198 = math.exp %197 : vector<8x128xf32>
    %cst_51 = arith.constant 1.000000e+00 : f32
    %199 = vector.broadcast %cst_51 : f32 to vector<8x128xf32>
    %200 = arith.addf %199, %198 : vector<8x128xf32>
    %201 = arith.divf %199, %200 : vector<8x128xf32>
    %202 = arith.mulf %193, %171 : vector<8x128xf32>
    %203 = arith.mulf %187, %195 : vector<8x128xf32>
    %204 = arith.addf %202, %203 : vector<8x128xf32>
    %205 = math.tanh %204 : vector<8x128xf32>
    %206 = arith.mulf %201, %205 : vector<8x128xf32>
    %207 = arith.index_cast %177 : i32 to index
    %c0_52 = arith.constant 0 : index
    %208 = vector.load %arg13[%207, %c0_52] : memref<64x128xf32, #tpu.memory_space<vmem>>, vector<8x128xf32>
    tpu.vector_store %arg13[%207, %c0_52], %206 {strides = array<i32>} : memref<64x128xf32, #tpu.memory_space<vmem>>, vector<8x128xf32>,
    %c6_i32 = arith.constant 6 : i32
    %c8_i32_53 = arith.constant 8 : i32
    %209 = arith.muli %c6_i32, %c8_i32_53 : i32
    %210 = tpu.assume_multiple %209, 8 : i32
    %211 = arith.index_cast %210 : i32 to index
    %c0_54 = arith.constant 0 : index
    %212 = vector.load %arg14[%211, %c0_54] : memref<64x512xf32, #tpu.memory_space<vmem>>, vector<8x512xf32>
    %cst_55 = arith.constant dense<0.000000e+00> : vector<8x512xf32>
    %213 = tpu.matmul %206, %8, %cst_55 {dimension_numbers = #tpu.dot_dimension_numbers<[1], [0], [0], [1], [0, 0, 1, 1], [], []>} : vector<8x128xf32>, vector<128x512xf32>, vector<8x512xf32> -> vector<8x512xf32>
    %214 = arith.addf %212, %213 : vector<8x512xf32>
    %215 = vector.extract_strided_slice %214 {offsets = [0, 0], sizes = [8, 128], strides = [1, 1]} : vector<8x512xf32> to vector<8x128xf32>
    %216 = arith.negf %215 : vector<8x128xf32>
    %217 = math.exp %216 : vector<8x128xf32>
    %cst_56 = arith.constant 1.000000e+00 : f32
    %218 = vector.broadcast %cst_56 : f32 to vector<8x128xf32>
    %219 = arith.addf %218, %217 : vector<8x128xf32>
    %220 = arith.divf %218, %219 : vector<8x128xf32>
    %221 = vector.extract_strided_slice %214 {offsets = [0, 128], sizes = [8, 128], strides = [1, 1]} : vector<8x512xf32> to vector<8x128xf32>
    %222 = arith.negf %221 : vector<8x128xf32>
    %223 = math.exp %222 : vector<8x128xf32>
    %cst_57 = arith.constant 1.000000e+00 : f32
    %224 = vector.broadcast %cst_57 : f32 to vector<8x128xf32>
    %225 = arith.addf %224, %223 : vector<8x128xf32>
    %226 = arith.divf %224, %225 : vector<8x128xf32>
    %227 = vector.extract_strided_slice %214 {offsets = [0, 256], sizes = [8, 128], strides = [1, 1]} : vector<8x512xf32> to vector<8x128xf32>
    %228 = math.tanh %227 : vector<8x128xf32>
    %229 = vector.extract_strided_slice %214 {offsets = [0, 384], sizes = [8, 128], strides = [1, 1]} : vector<8x512xf32> to vector<8x128xf32>
    %230 = arith.negf %229 : vector<8x128xf32>
    %231 = math.exp %230 : vector<8x128xf32>
    %cst_58 = arith.constant 1.000000e+00 : f32
    %232 = vector.broadcast %cst_58 : f32 to vector<8x128xf32>
    %233 = arith.addf %232, %231 : vector<8x128xf32>
    %234 = arith.divf %232, %233 : vector<8x128xf32>
    %235 = arith.mulf %226, %204 : vector<8x128xf32>
    %236 = arith.mulf %220, %228 : vector<8x128xf32>
    %237 = arith.addf %235, %236 : vector<8x128xf32>
    %238 = math.tanh %237 : vector<8x128xf32>
    %239 = arith.mulf %234, %238 : vector<8x128xf32>
    %240 = arith.index_cast %210 : i32 to index
    %c0_59 = arith.constant 0 : index
    %241 = vector.load %arg13[%240, %c0_59] : memref<64x128xf32, #tpu.memory_space<vmem>>, vector<8x128xf32>
    tpu.vector_store %arg13[%240, %c0_59], %239 {strides = array<i32>} : memref<64x128xf32, #tpu.memory_space<vmem>>, vector<8x128xf32>,
    %c7_i32 = arith.constant 7 : i32
    %c8_i32_60 = arith.constant 8 : i32
    %242 = arith.muli %c7_i32, %c8_i32_60 : i32
    %243 = tpu.assume_multiple %242, 8 : i32
    %244 = arith.index_cast %243 : i32 to index
    %c0_61 = arith.constant 0 : index
    %245 = vector.load %arg14[%244, %c0_61] : memref<64x512xf32, #tpu.memory_space<vmem>>, vector<8x512xf32>
    %cst_62 = arith.constant dense<0.000000e+00> : vector<8x512xf32>
    %246 = tpu.matmul %239, %8, %cst_62 {dimension_numbers = #tpu.dot_dimension_numbers<[1], [0], [0], [1], [0, 0, 1, 1], [], []>} : vector<8x128xf32>, vector<128x512xf32>, vector<8x512xf32> -> vector<8x512xf32>
    %247 = arith.addf %245, %246 : vector<8x512xf32>
    %248 = vector.extract_strided_slice %247 {offsets = [0, 0], sizes = [8, 128], strides = [1, 1]} : vector<8x512xf32> to vector<8x128xf32>
    %249 = arith.negf %248 : vector<8x128xf32>
    %250 = math.exp %249 : vector<8x128xf32>
    %cst_63 = arith.constant 1.000000e+00 : f32
    %251 = vector.broadcast %cst_63 : f32 to vector<8x128xf32>
    %252 = arith.addf %251, %250 : vector<8x128xf32>
    %253 = arith.divf %251, %252 : vector<8x128xf32>
    %254 = vector.extract_strided_slice %247 {offsets = [0, 128], sizes = [8, 128], strides = [1, 1]} : vector<8x512xf32> to vector<8x128xf32>
    %255 = arith.negf %254 : vector<8x128xf32>
    %256 = math.exp %255 : vector<8x128xf32>
    %cst_64 = arith.constant 1.000000e+00 : f32
    %257 = vector.broadcast %cst_64 : f32 to vector<8x128xf32>
    %258 = arith.addf %257, %256 : vector<8x128xf32>
    %259 = arith.divf %257, %258 : vector<8x128xf32>
    %260 = vector.extract_strided_slice %247 {offsets = [0, 256], sizes = [8, 128], strides = [1, 1]} : vector<8x512xf32> to vector<8x128xf32>
    %261 = math.tanh %260 : vector<8x128xf32>
    %262 = vector.extract_strided_slice %247 {offsets = [0, 384], sizes = [8, 128], strides = [1, 1]} : vector<8x512xf32> to vector<8x128xf32>
    %263 = arith.negf %262 : vector<8x128xf32>
    %264 = math.exp %263 : vector<8x128xf32>
    %cst_65 = arith.constant 1.000000e+00 : f32
    %265 = vector.broadcast %cst_65 : f32 to vector<8x128xf32>
    %266 = arith.addf %265, %264 : vector<8x128xf32>
    %267 = arith.divf %265, %266 : vector<8x128xf32>
    %268 = arith.mulf %259, %237 : vector<8x128xf32>
    %269 = arith.mulf %253, %261 : vector<8x128xf32>
    %270 = arith.addf %268, %269 : vector<8x128xf32>
    %271 = math.tanh %270 : vector<8x128xf32>
    %272 = arith.mulf %267, %271 : vector<8x128xf32>
    %273 = arith.index_cast %243 : i32 to index
    %c0_66 = arith.constant 0 : index
    %274 = vector.load %arg13[%273, %c0_66] : memref<64x128xf32, #tpu.memory_space<vmem>>, vector<8x128xf32>
    tpu.vector_store %arg13[%273, %c0_66], %272 {strides = array<i32>} : memref<64x128xf32, #tpu.memory_space<vmem>>, vector<8x128xf32>,
    %c8_i32_67 = arith.constant 8 : i32
    %c0_68 = arith.constant 0 : index
    %c0_69 = arith.constant 0 : index
    %275 = vector.load %arg13[%c0_68, %c0_69] : memref<64x128xf32, #tpu.memory_space<vmem>>, vector<64x128xf32>
    %c0_70 = arith.constant 0 : index
    %c0_71 = arith.constant 0 : index
    %276 = vector.load %arg5[%c0_70, %c0_71] : memref<128x512xf32, #tpu.memory_space<vmem>>, vector<128x512xf32>
    %cst_72 = arith.constant dense<0.000000e+00> : vector<64x512xf32>
    %277 = tpu.matmul %275, %276, %cst_72 {dimension_numbers = #tpu.dot_dimension_numbers<[1], [0], [0], [1], [0, 0, 1, 1], [], []>} : vector<64x128xf32>, vector<128x512xf32>, vector<64x512xf32> -> vector<64x512xf32>
    %c0_73 = arith.constant 0 : index
    %c0_74 = arith.constant 0 : index
    %278 = vector.load %arg7[%c0_73, %c0_74] : memref<1x512xf32, #tpu.memory_space<vmem>>, vector<1x512xf32>
    %279 = vector.broadcast %278 : vector<1x512xf32> to vector<64x512xf32>
    %280 = arith.addf %277, %279 : vector<64x512xf32>
    %c0_75 = arith.constant 0 : index
    %c0_76 = arith.constant 0 : index
    %281 = vector.load %arg14[%c0_75, %c0_76] : memref<64x512xf32, #tpu.memory_space<vmem>>, vector<64x512xf32>
    tpu.vector_store %arg14[%c0_75, %c0_76], %280 {strides = array<i32>} : memref<64x512xf32, #tpu.memory_space<vmem>>, vector<64x512xf32>,
    %c0_77 = arith.constant 0 : index
    %c0_78 = arith.constant 0 : index
    %282 = vector.load %arg6[%c0_77, %c0_78] : memref<128x512xf32, #tpu.memory_space<vmem>>, vector<128x512xf32>
    %cst_79 = arith.constant 0.000000e+00 : f32
    %283 = vector.broadcast %cst_79 : f32 to vector<8x128xf32>
    %cst_80 = arith.constant 0.000000e+00 : f32
    %284 = vector.broadcast %cst_80 : f32 to vector<8x128xf32>
    %c0_i32_81 = arith.constant 0 : i32
    %c8_i32_82 = arith.constant 8 : i32
    %285 = arith.muli %c0_i32_81, %c8_i32_82 : i32
    %286 = tpu.assume_multiple %285, 8 : i32
    %287 = arith.index_cast %286 : i32 to index
    %c0_83 = arith.constant 0 : index
    %288 = vector.load %arg14[%287, %c0_83] : memref<64x512xf32, #tpu.memory_space<vmem>>, vector<8x512xf32>
    %cst_84 = arith.constant dense<0.000000e+00> : vector<8x512xf32>
    %289 = tpu.matmul %283, %282, %cst_84 {dimension_numbers = #tpu.dot_dimension_numbers<[1], [0], [0], [1], [0, 0, 1, 1], [], []>} : vector<8x128xf32>, vector<128x512xf32>, vector<8x512xf32> -> vector<8x512xf32>
    %290 = arith.addf %288, %289 : vector<8x512xf32>
    %291 = vector.extract_strided_slice %290 {offsets = [0, 0], sizes = [8, 128], strides = [1, 1]} : vector<8x512xf32> to vector<8x128xf32>
    %292 = arith.negf %291 : vector<8x128xf32>
    %293 = math.exp %292 : vector<8x128xf32>
    %cst_85 = arith.constant 1.000000e+00 : f32
    %294 = vector.broadcast %cst_85 : f32 to vector<8x128xf32>
    %295 = arith.addf %294, %293 : vector<8x128xf32>
    %296 = arith.divf %294, %295 : vector<8x128xf32>
    %297 = vector.extract_strided_slice %290 {offsets = [0, 128], sizes = [8, 128], strides = [1, 1]} : vector<8x512xf32> to vector<8x128xf32>
    %298 = arith.negf %297 : vector<8x128xf32>
    %299 = math.exp %298 : vector<8x128xf32>
    %cst_86 = arith.constant 1.000000e+00 : f32
    %300 = vector.broadcast %cst_86 : f32 to vector<8x128xf32>
    %301 = arith.addf %300, %299 : vector<8x128xf32>
    %302 = arith.divf %300, %301 : vector<8x128xf32>
    %303 = vector.extract_strided_slice %290 {offsets = [0, 256], sizes = [8, 128], strides = [1, 1]} : vector<8x512xf32> to vector<8x128xf32>
    %304 = math.tanh %303 : vector<8x128xf32>
    %305 = vector.extract_strided_slice %290 {offsets = [0, 384], sizes = [8, 128], strides = [1, 1]} : vector<8x512xf32> to vector<8x128xf32>
    %306 = arith.negf %305 : vector<8x128xf32>
    %307 = math.exp %306 : vector<8x128xf32>
    %cst_87 = arith.constant 1.000000e+00 : f32
    %308 = vector.broadcast %cst_87 : f32 to vector<8x128xf32>
    %309 = arith.addf %308, %307 : vector<8x128xf32>
    %310 = arith.divf %308, %309 : vector<8x128xf32>
    %311 = arith.mulf %302, %284 : vector<8x128xf32>
    %312 = arith.mulf %296, %304 : vector<8x128xf32>
    %313 = arith.addf %311, %312 : vector<8x128xf32>
    %314 = math.tanh %313 : vector<8x128xf32>
    %315 = arith.mulf %310, %314 : vector<8x128xf32>
    %c1_i32_88 = arith.constant 1 : i32
    %c8_i32_89 = arith.constant 8 : i32
    %316 = arith.muli %c1_i32_88, %c8_i32_89 : i32
    %317 = tpu.assume_multiple %316, 8 : i32
    %318 = arith.index_cast %317 : i32 to index
    %c0_90 = arith.constant 0 : index
    %319 = vector.load %arg14[%318, %c0_90] : memref<64x512xf32, #tpu.memory_space<vmem>>, vector<8x512xf32>
    %cst_91 = arith.constant dense<0.000000e+00> : vector<8x512xf32>
    %320 = tpu.matmul %315, %282, %cst_91 {dimension_numbers = #tpu.dot_dimension_numbers<[1], [0], [0], [1], [0, 0, 1, 1], [], []>} : vector<8x128xf32>, vector<128x512xf32>, vector<8x512xf32> -> vector<8x512xf32>
    %321 = arith.addf %319, %320 : vector<8x512xf32>
    %322 = vector.extract_strided_slice %321 {offsets = [0, 0], sizes = [8, 128], strides = [1, 1]} : vector<8x512xf32> to vector<8x128xf32>
    %323 = arith.negf %322 : vector<8x128xf32>
    %324 = math.exp %323 : vector<8x128xf32>
    %cst_92 = arith.constant 1.000000e+00 : f32
    %325 = vector.broadcast %cst_92 : f32 to vector<8x128xf32>
    %326 = arith.addf %325, %324 : vector<8x128xf32>
    %327 = arith.divf %325, %326 : vector<8x128xf32>
    %328 = vector.extract_strided_slice %321 {offsets = [0, 128], sizes = [8, 128], strides = [1, 1]} : vector<8x512xf32> to vector<8x128xf32>
    %329 = arith.negf %328 : vector<8x128xf32>
    %330 = math.exp %329 : vector<8x128xf32>
    %cst_93 = arith.constant 1.000000e+00 : f32
    %331 = vector.broadcast %cst_93 : f32 to vector<8x128xf32>
    %332 = arith.addf %331, %330 : vector<8x128xf32>
    %333 = arith.divf %331, %332 : vector<8x128xf32>
    %334 = vector.extract_strided_slice %321 {offsets = [0, 256], sizes = [8, 128], strides = [1, 1]} : vector<8x512xf32> to vector<8x128xf32>
    %335 = math.tanh %334 : vector<8x128xf32>
    %336 = vector.extract_strided_slice %321 {offsets = [0, 384], sizes = [8, 128], strides = [1, 1]} : vector<8x512xf32> to vector<8x128xf32>
    %337 = arith.negf %336 : vector<8x128xf32>
    %338 = math.exp %337 : vector<8x128xf32>
    %cst_94 = arith.constant 1.000000e+00 : f32
    %339 = vector.broadcast %cst_94 : f32 to vector<8x128xf32>
    %340 = arith.addf %339, %338 : vector<8x128xf32>
    %341 = arith.divf %339, %340 : vector<8x128xf32>
    %342 = arith.mulf %333, %313 : vector<8x128xf32>
    %343 = arith.mulf %327, %335 : vector<8x128xf32>
    %344 = arith.addf %342, %343 : vector<8x128xf32>
    %345 = math.tanh %344 : vector<8x128xf32>
    %346 = arith.mulf %341, %345 : vector<8x128xf32>
    %c2_i32_95 = arith.constant 2 : i32
    %c8_i32_96 = arith.constant 8 : i32
    %347 = arith.muli %c2_i32_95, %c8_i32_96 : i32
    %348 = tpu.assume_multiple %347, 8 : i32
    %349 = arith.index_cast %348 : i32 to index
    %c0_97 = arith.constant 0 : index
    %350 = vector.load %arg14[%349, %c0_97] : memref<64x512xf32, #tpu.memory_space<vmem>>, vector<8x512xf32>
    %cst_98 = arith.constant dense<0.000000e+00> : vector<8x512xf32>
    %351 = tpu.matmul %346, %282, %cst_98 {dimension_numbers = #tpu.dot_dimension_numbers<[1], [0], [0], [1], [0, 0, 1, 1], [], []>} : vector<8x128xf32>, vector<128x512xf32>, vector<8x512xf32> -> vector<8x512xf32>
    %352 = arith.addf %350, %351 : vector<8x512xf32>
    %353 = vector.extract_strided_slice %352 {offsets = [0, 0], sizes = [8, 128], strides = [1, 1]} : vector<8x512xf32> to vector<8x128xf32>
    %354 = arith.negf %353 : vector<8x128xf32>
    %355 = math.exp %354 : vector<8x128xf32>
    %cst_99 = arith.constant 1.000000e+00 : f32
    %356 = vector.broadcast %cst_99 : f32 to vector<8x128xf32>
    %357 = arith.addf %356, %355 : vector<8x128xf32>
    %358 = arith.divf %356, %357 : vector<8x128xf32>
    %359 = vector.extract_strided_slice %352 {offsets = [0, 128], sizes = [8, 128], strides = [1, 1]} : vector<8x512xf32> to vector<8x128xf32>
    %360 = arith.negf %359 : vector<8x128xf32>
    %361 = math.exp %360 : vector<8x128xf32>
    %cst_100 = arith.constant 1.000000e+00 : f32
    %362 = vector.broadcast %cst_100 : f32 to vector<8x128xf32>
    %363 = arith.addf %362, %361 : vector<8x128xf32>
    %364 = arith.divf %362, %363 : vector<8x128xf32>
    %365 = vector.extract_strided_slice %352 {offsets = [0, 256], sizes = [8, 128], strides = [1, 1]} : vector<8x512xf32> to vector<8x128xf32>
    %366 = math.tanh %365 : vector<8x128xf32>
    %367 = vector.extract_strided_slice %352 {offsets = [0, 384], sizes = [8, 128], strides = [1, 1]} : vector<8x512xf32> to vector<8x128xf32>
    %368 = arith.negf %367 : vector<8x128xf32>
    %369 = math.exp %368 : vector<8x128xf32>
    %cst_101 = arith.constant 1.000000e+00 : f32
    %370 = vector.broadcast %cst_101 : f32 to vector<8x128xf32>
    %371 = arith.addf %370, %369 : vector<8x128xf32>
    %372 = arith.divf %370, %371 : vector<8x128xf32>
    %373 = arith.mulf %364, %344 : vector<8x128xf32>
    %374 = arith.mulf %358, %366 : vector<8x128xf32>
    %375 = arith.addf %373, %374 : vector<8x128xf32>
    %376 = math.tanh %375 : vector<8x128xf32>
    %377 = arith.mulf %372, %376 : vector<8x128xf32>
    %c3_i32_102 = arith.constant 3 : i32
    %c8_i32_103 = arith.constant 8 : i32
    %378 = arith.muli %c3_i32_102, %c8_i32_103 : i32
    %379 = tpu.assume_multiple %378, 8 : i32
    %380 = arith.index_cast %379 : i32 to index
    %c0_104 = arith.constant 0 : index
    %381 = vector.load %arg14[%380, %c0_104] : memref<64x512xf32, #tpu.memory_space<vmem>>, vector<8x512xf32>
    %cst_105 = arith.constant dense<0.000000e+00> : vector<8x512xf32>
    %382 = tpu.matmul %377, %282, %cst_105 {dimension_numbers = #tpu.dot_dimension_numbers<[1], [0], [0], [1], [0, 0, 1, 1], [], []>} : vector<8x128xf32>, vector<128x512xf32>, vector<8x512xf32> -> vector<8x512xf32>
    %383 = arith.addf %381, %382 : vector<8x512xf32>
    %384 = vector.extract_strided_slice %383 {offsets = [0, 0], sizes = [8, 128], strides = [1, 1]} : vector<8x512xf32> to vector<8x128xf32>
    %385 = arith.negf %384 : vector<8x128xf32>
    %386 = math.exp %385 : vector<8x128xf32>
    %cst_106 = arith.constant 1.000000e+00 : f32
    %387 = vector.broadcast %cst_106 : f32 to vector<8x128xf32>
    %388 = arith.addf %387, %386 : vector<8x128xf32>
    %389 = arith.divf %387, %388 : vector<8x128xf32>
    %390 = vector.extract_strided_slice %383 {offsets = [0, 128], sizes = [8, 128], strides = [1, 1]} : vector<8x512xf32> to vector<8x128xf32>
    %391 = arith.negf %390 : vector<8x128xf32>
    %392 = math.exp %391 : vector<8x128xf32>
    %cst_107 = arith.constant 1.000000e+00 : f32
    %393 = vector.broadcast %cst_107 : f32 to vector<8x128xf32>
    %394 = arith.addf %393, %392 : vector<8x128xf32>
    %395 = arith.divf %393, %394 : vector<8x128xf32>
    %396 = vector.extract_strided_slice %383 {offsets = [0, 256], sizes = [8, 128], strides = [1, 1]} : vector<8x512xf32> to vector<8x128xf32>
    %397 = math.tanh %396 : vector<8x128xf32>
    %398 = vector.extract_strided_slice %383 {offsets = [0, 384], sizes = [8, 128], strides = [1, 1]} : vector<8x512xf32> to vector<8x128xf32>
    %399 = arith.negf %398 : vector<8x128xf32>
    %400 = math.exp %399 : vector<8x128xf32>
    %cst_108 = arith.constant 1.000000e+00 : f32
    %401 = vector.broadcast %cst_108 : f32 to vector<8x128xf32>
    %402 = arith.addf %401, %400 : vector<8x128xf32>
    %403 = arith.divf %401, %402 : vector<8x128xf32>
    %404 = arith.mulf %395, %375 : vector<8x128xf32>
    %405 = arith.mulf %389, %397 : vector<8x128xf32>
    %406 = arith.addf %404, %405 : vector<8x128xf32>
    %407 = math.tanh %406 : vector<8x128xf32>
    %408 = arith.mulf %403, %407 : vector<8x128xf32>
    %c4_i32_109 = arith.constant 4 : i32
    %c8_i32_110 = arith.constant 8 : i32
    %409 = arith.muli %c4_i32_109, %c8_i32_110 : i32
    %410 = tpu.assume_multiple %409, 8 : i32
    %411 = arith.index_cast %410 : i32 to index
    %c0_111 = arith.constant 0 : index
    %412 = vector.load %arg14[%411, %c0_111] : memref<64x512xf32, #tpu.memory_space<vmem>>, vector<8x512xf32>
    %cst_112 = arith.constant dense<0.000000e+00> : vector<8x512xf32>
    %413 = tpu.matmul %408, %282, %cst_112 {dimension_numbers = #tpu.dot_dimension_numbers<[1], [0], [0], [1], [0, 0, 1, 1], [], []>} : vector<8x128xf32>, vector<128x512xf32>, vector<8x512xf32> -> vector<8x512xf32>
    %414 = arith.addf %412, %413 : vector<8x512xf32>
    %415 = vector.extract_strided_slice %414 {offsets = [0, 0], sizes = [8, 128], strides = [1, 1]} : vector<8x512xf32> to vector<8x128xf32>
    %416 = arith.negf %415 : vector<8x128xf32>
    %417 = math.exp %416 : vector<8x128xf32>
    %cst_113 = arith.constant 1.000000e+00 : f32
    %418 = vector.broadcast %cst_113 : f32 to vector<8x128xf32>
    %419 = arith.addf %418, %417 : vector<8x128xf32>
    %420 = arith.divf %418, %419 : vector<8x128xf32>
    %421 = vector.extract_strided_slice %414 {offsets = [0, 128], sizes = [8, 128], strides = [1, 1]} : vector<8x512xf32> to vector<8x128xf32>
    %422 = arith.negf %421 : vector<8x128xf32>
    %423 = math.exp %422 : vector<8x128xf32>
    %cst_114 = arith.constant 1.000000e+00 : f32
    %424 = vector.broadcast %cst_114 : f32 to vector<8x128xf32>
    %425 = arith.addf %424, %423 : vector<8x128xf32>
    %426 = arith.divf %424, %425 : vector<8x128xf32>
    %427 = vector.extract_strided_slice %414 {offsets = [0, 256], sizes = [8, 128], strides = [1, 1]} : vector<8x512xf32> to vector<8x128xf32>
    %428 = math.tanh %427 : vector<8x128xf32>
    %429 = vector.extract_strided_slice %414 {offsets = [0, 384], sizes = [8, 128], strides = [1, 1]} : vector<8x512xf32> to vector<8x128xf32>
    %430 = arith.negf %429 : vector<8x128xf32>
    %431 = math.exp %430 : vector<8x128xf32>
    %cst_115 = arith.constant 1.000000e+00 : f32
    %432 = vector.broadcast %cst_115 : f32 to vector<8x128xf32>
    %433 = arith.addf %432, %431 : vector<8x128xf32>
    %434 = arith.divf %432, %433 : vector<8x128xf32>
    %435 = arith.mulf %426, %406 : vector<8x128xf32>
    %436 = arith.mulf %420, %428 : vector<8x128xf32>
    %437 = arith.addf %435, %436 : vector<8x128xf32>
    %438 = math.tanh %437 : vector<8x128xf32>
    %439 = arith.mulf %434, %438 : vector<8x128xf32>
    %c5_i32_116 = arith.constant 5 : i32
    %c8_i32_117 = arith.constant 8 : i32
    %440 = arith.muli %c5_i32_116, %c8_i32_117 : i32
    %441 = tpu.assume_multiple %440, 8 : i32
    %442 = arith.index_cast %441 : i32 to index
    %c0_118 = arith.constant 0 : index
    %443 = vector.load %arg14[%442, %c0_118] : memref<64x512xf32, #tpu.memory_space<vmem>>, vector<8x512xf32>
    %cst_119 = arith.constant dense<0.000000e+00> : vector<8x512xf32>
    %444 = tpu.matmul %439, %282, %cst_119 {dimension_numbers = #tpu.dot_dimension_numbers<[1], [0], [0], [1], [0, 0, 1, 1], [], []>} : vector<8x128xf32>, vector<128x512xf32>, vector<8x512xf32> -> vector<8x512xf32>
    %445 = arith.addf %443, %444 : vector<8x512xf32>
    %446 = vector.extract_strided_slice %445 {offsets = [0, 0], sizes = [8, 128], strides = [1, 1]} : vector<8x512xf32> to vector<8x128xf32>
    %447 = arith.negf %446 : vector<8x128xf32>
    %448 = math.exp %447 : vector<8x128xf32>
    %cst_120 = arith.constant 1.000000e+00 : f32
    %449 = vector.broadcast %cst_120 : f32 to vector<8x128xf32>
    %450 = arith.addf %449, %448 : vector<8x128xf32>
    %451 = arith.divf %449, %450 : vector<8x128xf32>
    %452 = vector.extract_strided_slice %445 {offsets = [0, 128], sizes = [8, 128], strides = [1, 1]} : vector<8x512xf32> to vector<8x128xf32>
    %453 = arith.negf %452 : vector<8x128xf32>
    %454 = math.exp %453 : vector<8x128xf32>
    %cst_121 = arith.constant 1.000000e+00 : f32
    %455 = vector.broadcast %cst_121 : f32 to vector<8x128xf32>
    %456 = arith.addf %455, %454 : vector<8x128xf32>
    %457 = arith.divf %455, %456 : vector<8x128xf32>
    %458 = vector.extract_strided_slice %445 {offsets = [0, 256], sizes = [8, 128], strides = [1, 1]} : vector<8x512xf32> to vector<8x128xf32>
    %459 = math.tanh %458 : vector<8x128xf32>
    %460 = vector.extract_strided_slice %445 {offsets = [0, 384], sizes = [8, 128], strides = [1, 1]} : vector<8x512xf32> to vector<8x128xf32>
    %461 = arith.negf %460 : vector<8x128xf32>
    %462 = math.exp %461 : vector<8x128xf32>
    %cst_122 = arith.constant 1.000000e+00 : f32
    %463 = vector.broadcast %cst_122 : f32 to vector<8x128xf32>
    %464 = arith.addf %463, %462 : vector<8x128xf32>
    %465 = arith.divf %463, %464 : vector<8x128xf32>
    %466 = arith.mulf %457, %437 : vector<8x128xf32>
    %467 = arith.mulf %451, %459 : vector<8x128xf32>
    %468 = arith.addf %466, %467 : vector<8x128xf32>
    %469 = math.tanh %468 : vector<8x128xf32>
    %470 = arith.mulf %465, %469 : vector<8x128xf32>
    %c6_i32_123 = arith.constant 6 : i32
    %c8_i32_124 = arith.constant 8 : i32
    %471 = arith.muli %c6_i32_123, %c8_i32_124 : i32
    %472 = tpu.assume_multiple %471, 8 : i32
    %473 = arith.index_cast %472 : i32 to index
    %c0_125 = arith.constant 0 : index
    %474 = vector.load %arg14[%473, %c0_125] : memref<64x512xf32, #tpu.memory_space<vmem>>, vector<8x512xf32>
    %cst_126 = arith.constant dense<0.000000e+00> : vector<8x512xf32>
    %475 = tpu.matmul %470, %282, %cst_126 {dimension_numbers = #tpu.dot_dimension_numbers<[1], [0], [0], [1], [0, 0, 1, 1], [], []>} : vector<8x128xf32>, vector<128x512xf32>, vector<8x512xf32> -> vector<8x512xf32>
    %476 = arith.addf %474, %475 : vector<8x512xf32>
    %477 = vector.extract_strided_slice %476 {offsets = [0, 0], sizes = [8, 128], strides = [1, 1]} : vector<8x512xf32> to vector<8x128xf32>
    %478 = arith.negf %477 : vector<8x128xf32>
    %479 = math.exp %478 : vector<8x128xf32>
    %cst_127 = arith.constant 1.000000e+00 : f32
    %480 = vector.broadcast %cst_127 : f32 to vector<8x128xf32>
    %481 = arith.addf %480, %479 : vector<8x128xf32>
    %482 = arith.divf %480, %481 : vector<8x128xf32>
    %483 = vector.extract_strided_slice %476 {offsets = [0, 128], sizes = [8, 128], strides = [1, 1]} : vector<8x512xf32> to vector<8x128xf32>
    %484 = arith.negf %483 : vector<8x128xf32>
    %485 = math.exp %484 : vector<8x128xf32>
    %cst_128 = arith.constant 1.000000e+00 : f32
    %486 = vector.broadcast %cst_128 : f32 to vector<8x128xf32>
    %487 = arith.addf %486, %485 : vector<8x128xf32>
    %488 = arith.divf %486, %487 : vector<8x128xf32>
    %489 = vector.extract_strided_slice %476 {offsets = [0, 256], sizes = [8, 128], strides = [1, 1]} : vector<8x512xf32> to vector<8x128xf32>
    %490 = math.tanh %489 : vector<8x128xf32>
    %491 = vector.extract_strided_slice %476 {offsets = [0, 384], sizes = [8, 128], strides = [1, 1]} : vector<8x512xf32> to vector<8x128xf32>
    %492 = arith.negf %491 : vector<8x128xf32>
    %493 = math.exp %492 : vector<8x128xf32>
    %cst_129 = arith.constant 1.000000e+00 : f32
    %494 = vector.broadcast %cst_129 : f32 to vector<8x128xf32>
    %495 = arith.addf %494, %493 : vector<8x128xf32>
    %496 = arith.divf %494, %495 : vector<8x128xf32>
    %497 = arith.mulf %488, %468 : vector<8x128xf32>
    %498 = arith.mulf %482, %490 : vector<8x128xf32>
    %499 = arith.addf %497, %498 : vector<8x128xf32>
    %500 = math.tanh %499 : vector<8x128xf32>
    %501 = arith.mulf %496, %500 : vector<8x128xf32>
    %c7_i32_130 = arith.constant 7 : i32
    %c8_i32_131 = arith.constant 8 : i32
    %502 = arith.muli %c7_i32_130, %c8_i32_131 : i32
    %503 = tpu.assume_multiple %502, 8 : i32
    %504 = arith.index_cast %503 : i32 to index
    %c0_132 = arith.constant 0 : index
    %505 = vector.load %arg14[%504, %c0_132] : memref<64x512xf32, #tpu.memory_space<vmem>>, vector<8x512xf32>
    %cst_133 = arith.constant dense<0.000000e+00> : vector<8x512xf32>
    %506 = tpu.matmul %501, %282, %cst_133 {dimension_numbers = #tpu.dot_dimension_numbers<[1], [0], [0], [1], [0, 0, 1, 1], [], []>} : vector<8x128xf32>, vector<128x512xf32>, vector<8x512xf32> -> vector<8x512xf32>
    %507 = arith.addf %505, %506 : vector<8x512xf32>
    %508 = vector.extract_strided_slice %507 {offsets = [0, 0], sizes = [8, 128], strides = [1, 1]} : vector<8x512xf32> to vector<8x128xf32>
    %509 = arith.negf %508 : vector<8x128xf32>
    %510 = math.exp %509 : vector<8x128xf32>
    %cst_134 = arith.constant 1.000000e+00 : f32
    %511 = vector.broadcast %cst_134 : f32 to vector<8x128xf32>
    %512 = arith.addf %511, %510 : vector<8x128xf32>
    %513 = arith.divf %511, %512 : vector<8x128xf32>
    %514 = vector.extract_strided_slice %507 {offsets = [0, 128], sizes = [8, 128], strides = [1, 1]} : vector<8x512xf32> to vector<8x128xf32>
    %515 = arith.negf %514 : vector<8x128xf32>
    %516 = math.exp %515 : vector<8x128xf32>
    %cst_135 = arith.constant 1.000000e+00 : f32
    %517 = vector.broadcast %cst_135 : f32 to vector<8x128xf32>
    %518 = arith.addf %517, %516 : vector<8x128xf32>
    %519 = arith.divf %517, %518 : vector<8x128xf32>
    %520 = vector.extract_strided_slice %507 {offsets = [0, 256], sizes = [8, 128], strides = [1, 1]} : vector<8x512xf32> to vector<8x128xf32>
    %521 = math.tanh %520 : vector<8x128xf32>
    %522 = vector.extract_strided_slice %507 {offsets = [0, 384], sizes = [8, 128], strides = [1, 1]} : vector<8x512xf32> to vector<8x128xf32>
    %523 = arith.negf %522 : vector<8x128xf32>
    %524 = math.exp %523 : vector<8x128xf32>
    %cst_136 = arith.constant 1.000000e+00 : f32
    %525 = vector.broadcast %cst_136 : f32 to vector<8x128xf32>
    %526 = arith.addf %525, %524 : vector<8x128xf32>
    %527 = arith.divf %525, %526 : vector<8x128xf32>
    %528 = arith.mulf %519, %499 : vector<8x128xf32>
    %529 = arith.mulf %513, %521 : vector<8x128xf32>
    %530 = arith.addf %528, %529 : vector<8x128xf32>
    %531 = math.tanh %530 : vector<8x128xf32>
    %532 = arith.mulf %527, %531 : vector<8x128xf32>
    %c8_i32_137 = arith.constant 8 : i32
    %cst_138 = arith.constant 0.000000e+00 : f32
    %533 = vector.broadcast %cst_138 : f32 to vector<8x128xf32>
    %534 = arith.maximumf %532, %533 : vector<8x128xf32>
    %c0_139 = arith.constant 0 : index
    %c0_140 = arith.constant 0 : index
    %535 = vector.load %arg8[%c0_139, %c0_140] : memref<128x128xf32, #tpu.memory_space<vmem>>, vector<128x128xf32>
    %cst_141 = arith.constant dense<0.000000e+00> : vector<8x128xf32>
    %536 = tpu.matmul %534, %535, %cst_141 {dimension_numbers = #tpu.dot_dimension_numbers<[1], [0], [0], [1], [0, 0, 1, 1], [], []>} : vector<8x128xf32>, vector<128x128xf32>, vector<8x128xf32> -> vector<8x128xf32>
    %c0_142 = arith.constant 0 : index
    %c0_143 = arith.constant 0 : index
    %537 = vector.load %arg9[%c0_142, %c0_143] : memref<1x128xf32, #tpu.memory_space<vmem>>, vector<1x128xf32>
    %538 = vector.broadcast %537 : vector<1x128xf32> to vector<8x128xf32>
    %539 = arith.addf %536, %538 : vector<8x128xf32>
    %cst_144 = arith.constant 0.000000e+00 : f32
    %540 = vector.broadcast %cst_144 : f32 to vector<8x128xf32>
    %541 = arith.maximumf %539, %540 : vector<8x128xf32>
    %c0_145 = arith.constant 0 : index
    %c0_146 = arith.constant 0 : index
    %542 = vector.load %arg10[%c0_145, %c0_146] : memref<128x128xf32, #tpu.memory_space<vmem>>, vector<128x128xf32>
    %cst_147 = arith.constant dense<0.000000e+00> : vector<8x128xf32>
    %543 = tpu.matmul %541, %542, %cst_147 {dimension_numbers = #tpu.dot_dimension_numbers<[1], [0], [0], [1], [0, 0, 1, 1], [], []>} : vector<8x128xf32>, vector<128x128xf32>, vector<8x128xf32> -> vector<8x128xf32>
    %c0_148 = arith.constant 0 : index
    %c0_149 = arith.constant 0 : index
    %544 = vector.load %arg11[%c0_148, %c0_149] : memref<1x128xf32, #tpu.memory_space<vmem>>, vector<1x128xf32>
    %545 = vector.broadcast %544 : vector<1x128xf32> to vector<8x128xf32>
    %546 = arith.addf %543, %545 : vector<8x128xf32>
    %c0_150 = arith.constant 0 : index
    %c0_151 = arith.constant 0 : index
    %547 = vector.load %arg12[%c0_150, %c0_151] : memref<8x128xf32, #tpu.memory_space<vmem>>, vector<8x128xf32>
    tpu.vector_store %arg12[%c0_150, %c0_151], %546 {strides = array<i32>} : memref<8x128xf32, #tpu.memory_space<vmem>>, vector<8x128xf32>,
    return
  }
  func.func @transform_0(%arg0: i32) -> (i32, i32, i32) {
    %c0_i32 = arith.constant 0 : i32
    %c0_i32_0 = arith.constant 0 : i32
    %c0_i32_1 = arith.constant 0 : i32
    return %arg0, %c0_i32, %c0_i32_0 : i32, i32, i32
  }
  func.func @transform_1(%arg0: i32) -> (i32, i32) {
    %c0_i32 = arith.constant 0 : i32
    %c0_i32_0 = arith.constant 0 : i32
    %c0_i32_1 = arith.constant 0 : i32
    return %c0_i32, %c0_i32_0 : i32, i32
  }
  func.func @transform_2(%arg0: i32) -> (i32, i32) {
    %c0_i32 = arith.constant 0 : i32
    %c0_i32_0 = arith.constant 0 : i32
    %c0_i32_1 = arith.constant 0 : i32
    return %c0_i32, %c0_i32_0 : i32, i32
  }
  func.func @transform_3(%arg0: i32) -> (i32, i32) {
    %c0_i32 = arith.constant 0 : i32
    %c0_i32_0 = arith.constant 0 : i32
    %c0_i32_1 = arith.constant 0 : i32
    return %c0_i32, %c0_i32_0 : i32, i32
  }
  func.func @transform_4(%arg0: i32) -> (i32, i32) {
    %c0_i32 = arith.constant 0 : i32
    %c0_i32_0 = arith.constant 0 : i32
    %c0_i32_1 = arith.constant 0 : i32
    return %c0_i32, %c0_i32_0 : i32, i32
  }
  func.func @transform_5(%arg0: i32) -> (i32, i32) {
    %c0_i32 = arith.constant 0 : i32
    %c0_i32_0 = arith.constant 0 : i32
    %c0_i32_1 = arith.constant 0 : i32
    return %c0_i32, %c0_i32_0 : i32, i32
  }
  func.func @transform_6(%arg0: i32) -> (i32, i32) {
    %c0_i32 = arith.constant 0 : i32
    %c0_i32_0 = arith.constant 0 : i32
    %c0_i32_1 = arith.constant 0 : i32
    return %c0_i32, %c0_i32_0 : i32, i32
  }
  func.func @transform_7(%arg0: i32) -> (i32, i32) {
    %c0_i32 = arith.constant 0 : i32
    %c0_i32_0 = arith.constant 0 : i32
    %c0_i32_1 = arith.constant 0 : i32
    return %c0_i32, %c0_i32_0 : i32, i32
  }
  func.func @transform_8(%arg0: i32) -> (i32, i32) {
    %c0_i32 = arith.constant 0 : i32
    %c0_i32_0 = arith.constant 0 : i32
    %c0_i32_1 = arith.constant 0 : i32
    return %c0_i32, %c0_i32_0 : i32, i32
  }
  func.func @transform_9(%arg0: i32) -> (i32, i32) {
    %c0_i32 = arith.constant 0 : i32
    %c0_i32_0 = arith.constant 0 : i32
    %c0_i32_1 = arith.constant 0 : i32
    return %c0_i32, %c0_i32_0 : i32, i32
  }
  func.func @transform_10(%arg0: i32) -> (i32, i32) {
    %c0_i32 = arith.constant 0 : i32
    %c0_i32_0 = arith.constant 0 : i32
    %c0_i32_1 = arith.constant 0 : i32
    return %c0_i32, %c0_i32_0 : i32, i32
  }
  func.func @transform_11(%arg0: i32) -> (i32, i32) {
    %c0_i32 = arith.constant 0 : i32
    %c0_i32_0 = arith.constant 0 : i32
    return %arg0, %c0_i32 : i32, i32
  }
}

</mosaic_0001>

<bundles_post_ra>
// kernel: tpu_custom_call.1
= control target key start
LH: loop header
LB: loop body
LE: loop exit
PB: predicated region body
PF: predicated region fallthrough
CT: control target
= control target key end

     0   :  { %16 = vsyncpa [#allocation5], 0  ;;  %s6143_s0 = inlined_call_operand.vmem [shape: f32[1,64,16], index: 0, kind: input, shape index: {}]   ;;  %s6144_s1 = inlined_call_operand.vmem [shape: f32[16,512], index: 1, kind: input, shape index: {}]   ;;  %s6145_s2 = inlined_call_operand.hbm [shape: f32[128,512], index: 2, kind: input, shape index: {}]   ;;  %s6146_s3 = inlined_call_operand.vmem [shape: f32[1,512], index: 3, kind: input, shape index: {}]   ;;  %s6147_s4 = inlined_call_operand.hbm [shape: f32[128,512], index: 4, kind: input, shape index: {}]   ;;  %s6148_s5 = inlined_call_operand.hbm [shape: f32[128,512], index: 5, kind: input, shape index: {}]   ;;  %s6149_s6 = inlined_call_operand.vmem [shape: f32[1,512], index: 6, kind: input, shape index: {}]   ;;  %s6150_s7 = inlined_call_operand.hbm [shape: f32[128,128], index: 7, kind: input, shape index: {}]   ;;  %s6151_s8 = inlined_call_operand.vmem [shape: f32[1,128], index: 8, kind: input, shape index: {}]   ;;  %s6152_s9 = inlined_call_operand.hbm [shape: f32[128,128], index: 9, kind: input, shape index: {}]   ;;  %s6153_s10 = inlined_call_operand.vmem [shape: f32[1,128], index: 10, kind: input, shape index: {}]   ;;  %s6154_s11 = inlined_call_operand.hbm [shape: f32[8,128], index: 11, kind: output, shape index: {}]  }
   0x1   :  { %17 = vsyncpa [#allocation8], 0 }
   0x2   :  { %18 = vsyncpa [#allocation11], 0 }
   0x3   :  { %19 = vsyncpa [#allocation6], 0  ;;  %s43_s19 = sshll.u32 %s6147_s4, 4  ;;  %s3967_s20 = smov [#allocation7]   ;;  %s44_s19 = int_to_ptr.hbm [resolvable:$true] %s43_s19 }
   0x4   :  { %s45_s21 = sshll.u32 %s3967_s20, 4  ;;  %s71_s24 = sshll.u32 %s6150_s7, 4  ;;  %s46_s21 = int_to_ptr.vmem [resolvable:$true] %s45_s21  ;;  %s72_s24 = int_to_ptr.hbm [resolvable:$true] %s71_s24 }
   0x5   :  { %s3968_s25 = smov 512   ;;  %s3969_s26 = smov 32  }
   0x6   :  { %51 = dma.hbm_to_vmem [thread:$0]  %s44_s19, 8192, %s46_s21, [#allocation8], %s3968_s25, %s3968_s25, %s3969_s26  }
   0x7   :  { %s3970_s27 = smov [#allocation10]   ;;  %s3971_s29 = smov 128  }
   0x8   :  { %s73_s28 = sshll.u32 %s3970_s27, 4  ;;  %s3972_s30 = smov 8   ;;  %s74_s28 = int_to_ptr.vmem [resolvable:$true] %s73_s28 }
   0x9   :  { %79 = dma.hbm_to_vmem [thread:$0]  %s72_s24, 2048, %s74_s28, [#allocation11], %s3971_s29, %s3971_s29, %s3972_s30  }
   0xa   :  { %s28_s13 = sshll.u32 %s6145_s2, 4  ;;  %s3973_s14 = smov [#allocation4]   ;;  %s29_s13 = int_to_ptr.hbm [resolvable:$true] %s28_s13 }
   0xb   :  { %s30_s15 = sshll.u32 %s3973_s14, 4  ;;  %s56_s17 = sshll.u32 %s6148_s5, 4  ;;  %s31_s15 = int_to_ptr.vmem [resolvable:$true] %s30_s15  ;;  %s57_s17 = int_to_ptr.hbm [resolvable:$true] %s56_s17 }
   0xc   :  { %36 = dma.hbm_to_vmem [thread:$0]  %s29_s13, 8192, %s31_s15, [#allocation5], %s3968_s25, %s3968_s25, %s3969_s26  }
   0xd   :  { %s3974_s18 = smov [#allocation9]   ;;  %s86_s22 = sshll.u32 %s6152_s9, 4  ;;  %s87_s22 = int_to_ptr.hbm [resolvable:$true] %s86_s22 }
   0xe   :  { %s58_s19 = sshll.u32 %s3974_s18, 4  ;;  %s3975_s2 = smov [#allocation12]   ;;  %s59_s19 = int_to_ptr.vmem [resolvable:$true] %s58_s19 }
   0xf   :  { %64 = dma.hbm_to_vmem [thread:$0]  %s57_s17, 8192, %s59_s19, [#allocation8], %s3968_s25, %s3968_s25, %s3969_s26  }
  0x10   :  { %s88_s23 = sshll.u32 %s3975_s2, 4  ;;  %s89_s23 = int_to_ptr.vmem [resolvable:$true] %s88_s23 }
  0x11   :  { %94 = dma.hbm_to_vmem [thread:$0]  %s87_s22, 2048, %s89_s23, [#allocation11], %s3971_s29, %s3971_s29, %s3972_s30  }
  0x12   :  { %3959 = dma.done.wait [#allocation5], 8192  }
  0x13   :  { %3960 = vsyncadd [#allocation5], 4294959104 }
  0x14   :  { %3961 = dma.done.wait [#allocation8], 16384  }
  0x15   :  { %3962 = vsyncadd [#allocation8], 4294950912 }
  0x16   :  { %3963 = dma.done.wait [#allocation11], 4096  }
  0x17   :  { %3964 = vsyncadd [#allocation11], 4294963200  ;;  %v129_v0 = vld [vmem:[%s6144_s1 + $0x20] sm:$0xff]  ;;  %v130_v1 = vld [vmem:[%s6144_s1 + $0x28] sm:$0xff]  ;;  %vm143_vm0 = vcmask 130048   ;;  %s3977_s14 = smov [#allocation13]  }
  0x18   :  { %v125_v2 = vld [vmem:[%s6144_s1] sm:$0xff]  ;;  %182 = vmatpush.msra.mxu0 %v129_v0  ;;  %3414 = vmatpush.msra.mxu2 %v129_v0  ;;  %v126_v3 = vld [vmem:[%s6144_s1 + $0x8] sm:$0xff]  ;;  %v4073_v5 = vld [vmem:[%s6143_s0 + $0x30] sm:$0xff]  ;;  %s3313_s15 = sshll.u32 %s3977_s14, 4  ;;  %s3315_s17 = sshll.u32 %s6154_s11, 4  ;;  %s3314_s15 = int_to_ptr.vmem [resolvable:$true] %s3313_s15  ;;  %s3316_s17 = int_to_ptr.hbm [resolvable:$true] %s3315_s17 }
  0x19   :  { %223 = vmatpush.msra.mxu1 %v130_v1  ;;  %3416 = vmatpush.msra.mxu3 %v130_v1  ;;  %v4068_v4 = vld [vmem:[%s6143_s0] sm:$0xff]  ;;  %v132_v6 = vld [vmem:[%s6144_s1 + $0x38] sm:$0xff]  ;;  %v131_v7 = vld [vmem:[%s6144_s1 + $0x30] sm:$0xff] }
  0x1a   :  { %183 = vmatpush.msra.mxu0 %v125_v2  ;;  %3415 = vmatpush.msra.mxu2 %v125_v2  ;;  %v4085_v8 = vld [vmem:[#allocation4 + $0x1e0] sm:$0xff]  ;;  %v4087_v9 = vld [vmem:[#allocation4 + $0x1e8] sm:$0xff]  ;;  %v128_v10 = vld [vmem:[%s6144_s1 + $0x18] sm:$0xff] }
  0x1b   :  { %224 = vmatpush.msra.mxu1 %v126_v3  ;;  %3417 = vmatpush.msra.mxu3 %v126_v3  ;;  %v127_v11 = vld [vmem:[%s6144_s1 + $0x10] sm:$0xff]  ;;  %v4099_v12 = vld [vmem:[#allocation4 + $0x1f8] sm:$0xff]  ;;  %v4101_v13 = vld [vmem:[#allocation4 + $0x1c0] sm:$0xff] }
  0x1c   :  { %3334 = vmatmul.msk.f32.vlgmr.msra.gmra.mxu0 %vm143_vm0, %v4068_v4  ;;  %3340 = vmatmul.msk.f32.vlgmr.msra.gmra.mxu2 %vm143_vm0, %v4073_v5  ;;  %v4105_v14 = vld [vmem:[#allocation4 + $0x1c8] sm:$0xff]  ;;  %v4107_v15 = vld [vmem:[#allocation4 + $0x1d8] sm:$0xff]  ;;  %v4109_v16 = vld [vmem:[#allocation4 + $0x1a0] sm:$0xff] }
  0x1d   :  { %3342 = vmatmul.msk.f32.vlgmr.msra.gmra.mxu1 %vm143_vm0, %v4068_v4  ;;  %3348 = vmatmul.msk.f32.vlgmr.msra.gmra.mxu3 %vm143_vm0, %v4073_v5  ;;  %v4111_v17 = vld [vmem:[#allocation4 + $0x1f0] sm:$0xff]  ;;  %v4116_v18 = vld [vmem:[%s6143_s0 + $0x8] sm:$0xff]  ;;  %v4121_v19 = vld [vmem:[%s6143_s0 + $0x38] sm:$0xff] }
  0x1e   :  { %305 = vmatpush.msrb.mxu3 %v132_v6  ;;  %264 = vmatpush.msrb.mxu2 %v131_v7  ;;  %v4129_v20 = vld [vmem:[#allocation4 + $0x1a8] sm:$0xff]  ;;  %v4131_v21 = vld [vmem:[#allocation4 + $0x180] sm:$0xff]  ;;  %v4137_v22 = vld [vmem:[#allocation4 + $0x1b8] sm:$0xff] }
  0x1f   :  { %435 = vmatpush.msrb.mxu0 %v4085_v8  ;;  %455 = vmatpush.msrb.mxu1 %v4087_v9  ;;  %v4139_v23 = vld [vmem:[#allocation4 + $0x1d0] sm:$0xff]  ;;  %v4145_v24 = vld [vmem:[#allocation4 + $0x188] sm:$0xff]  ;;  %v4147_v25 = vld [vmem:[#allocation4 + $0x160] sm:$0xff] }
  0x20   :  { %306 = vmatpush.msrb.mxu3 %v128_v10  ;;  %265 = vmatpush.msrb.mxu2 %v127_v11  ;;  %v4151_v26 = vld [vmem:[#allocation4 + $0x198] sm:$0xff]  ;;  %v4153_v27 = vld [vmem:[#allocation4 + $0x1b0] sm:$0xff]  ;;  %v4156_v28 = vld [vmem:[#allocation4 + $0x168] sm:$0xff] }
  0x21   :  { %436 = vmatpush.msrb.mxu0 %v4101_v13  ;;  %456 = vmatpush.msrb.mxu1 %v4105_v14  ;;  %v4158_v29 = vld [vmem:[#allocation4 + $0x140] sm:$0xff]  ;;  %v4163_v30 = vld [vmem:[#allocation4 + $0x178] sm:$0xff]  ;;  %v4165_v31 = vld [vmem:[#allocation4 + $0x190] sm:$0xff] }
  0x22   :  { %495 = vmatpush.msra.mxu3 %v4099_v12  ;;  %475 = vmatpush.msra.mxu2 %v4111_v17  ;;  %v4170_v32 = vld [vmem:[%s6143_s0 + $0x10] sm:$0xff]  ;;  %v4176_v33 = vld [vmem:[#allocation4 + $0x148] sm:$0xff]  ;;  %v4178_v34 = vld [vmem:[#allocation4 + $0x120] sm:$0xff] }
  0x23   :  { %437 = vmatpush.msrb.mxu0 %v4109_v16  ;;  %457 = vmatpush.msrb.mxu1 %v4129_v20  ;;  %v4186_v35 = vld [vmem:[#allocation4 + $0x158] sm:$0xff]  ;;  %v4188_v36 = vld [vmem:[#allocation4 + $0x170] sm:$0xff]  ;;  %v4194_v37 = vld [vmem:[#allocation4 + $0x128] sm:$0xff] }
  0x24   :  { %496 = vmatpush.msra.mxu3 %v4107_v15  ;;  %3335 = vmatmul.msk.f32.gmra.mxu0 %vm143_vm0, %v4116_v18  ;;  %v4196_v38 = vld [vmem:[#allocation4 + $0x100] sm:$0xff]  ;;  %v4200_v39 = vld [vmem:[#allocation4 + $0x138] sm:$0xff]  ;;  %v4202_v40 = vld [vmem:[#allocation4 + $0x150] sm:$0xff] }
  0x25   :  { %3341 = vmatmul.msk.f32.gmra.mxu2 %vm143_vm0, %v4121_v19  ;;  %3343 = vmatmul.msk.f32.gmra.mxu1 %vm143_vm0, %v4116_v18  ;;  %v4204_v41 = vld [vmem:[#allocation4 + $0x108] sm:$0xff]  ;;  %v4206_v42 = vld [vmem:[#allocation4 + $0xe0] sm:$0xff]  ;;  %v4212_v43 = vld [vmem:[#allocation4 + $0x118] sm:$0xff] }
  0x26   :  { %3349 = vmatmul.msk.f32.gmra.mxu3 %vm143_vm0, %v4121_v19  ;;  %438 = vmatpush.msrb.mxu0 %v4131_v21  ;;  %v4214_v44 = vld [vmem:[#allocation4 + $0x130] sm:$0xff]  ;;  %v4219_v45 = vld [vmem:[%s6143_s0 + $0x18] sm:$0xff]  ;;  %v4225_v46 = vld [vmem:[#allocation4 + $0xe8] sm:$0xff] }
  0x27   :  { %497 = vmatpush.msra.mxu3 %v4137_v22  ;;  %476 = vmatpush.msra.mxu2 %v4139_v23  ;;  %v4227_v47 = vld [vmem:[#allocation4 + $0xc0] sm:$0xff]  ;;  %v4235_v48 = vld [vmem:[#allocation4 + $0xf8] sm:$0xff]  ;;  %v4237_v49 = vld [vmem:[#allocation4 + $0x110] sm:$0xff] }
  0x28   :  { %458 = vmatpush.msrb.mxu1 %v4145_v24  ;;  %439 = vmatpush.msrb.mxu0 %v4147_v25  ;;  %v4243_v50 = vld [vmem:[#allocation4 + $0xc8] sm:$0xff]  ;;  %v4245_v51 = vld [vmem:[#allocation4 + $0xa0] sm:$0xff]  ;;  %v4249_v52 = vld [vmem:[#allocation4 + $0xd8] sm:$0xff] }
  0x29   :  { %498 = vmatpush.msra.mxu3 %v4151_v26  ;;  %477 = vmatpush.msra.mxu2 %v4153_v27  ;;  %6419 = vst [vmem:[#allocation18_spill] sm:$0xff] %v4245_v51  ;;  %v4251_v53 = vld [vmem:[#allocation4 + $0xf0] sm:$0xff]  ;;  %v4253_v54 = vld [vmem:[#allocation4 + $0xa8] sm:$0xff]  ;;  %v4255_v55 = vld [vmem:[#allocation4 + $0x80] sm:$0xff] }
  0x2a   :  { %459 = vmatpush.msrb.mxu1 %v4156_v28  ;;  %440 = vmatpush.msrb.mxu0 %v4158_v29  ;;  %6420 = vst [vmem:[#allocation19_spill] sm:$0xff] %v4253_v54  ;;  %v4261_v56 = vld [vmem:[#allocation4 + $0xb8] sm:$0xff]  ;;  %v4263_v57 = vld [vmem:[#allocation4 + $0xd0] sm:$0xff]  ;;  %v121_v58 = vld [vmem:[%s6143_s0 + $0x20] sm:$0xff] }
  0x2b   :  { %499 = vmatpush.msra.mxu3 %v4163_v30  ;;  %478 = vmatpush.msra.mxu2 %v4165_v31  ;;  %6421 = vst [vmem:[#allocation20_spill] sm:$0xff] %v4255_v55  ;;  %v4272_v59 = vld [vmem:[#allocation4 + $0x88] sm:$0xff]  ;;  %v4274_v60 = vld [vmem:[#allocation4 + $0x60] sm:$0xff]  ;;  %v4281_v61 = vld [vmem:[#allocation4 + $0x98] sm:$0xff] }
  0x2c   :  { %3336 = vmatmul.msk.f32.gmra.mxu0 %vm143_vm0, %v4170_v32  ;;  %460 = vmatpush.msrb.mxu1 %v4176_v33  ;;  %6422 = vst [vmem:[#allocation21_spill] sm:$0xff] %v4261_v56  ;;  %v4286_v62 = vld [vmem:[#allocation4 + $0x68] sm:$0xff]  ;;  %v4288_v63 = vld [vmem:[#allocation4 + $0x40] sm:$0xff]  ;;  %v4290_v0 = vld [vmem:[#allocation4 + $0xb0] sm:$0xff] }
  0x2d   :  { %3350 = vmatmul.msk.f32.vlgmr.msrb.gmra.mxu2 %vm143_vm0, %v4068_v4  ;;  %3344 = vmatmul.msk.f32.gmra.mxu1 %vm143_vm0, %v4170_v32  ;;  %6423 = vst [vmem:[#allocation22_spill] sm:$0xff] %v4272_v59  ;;  %v4294_v1 = vld [vmem:[#allocation4 + $0x78] sm:$0xff]  ;;  %v4296_v2 = vld [vmem:[#allocation4 + $0x90] sm:$0xff]  ;;  %v4298_v3 = vld [vmem:[#allocation4 + $0x48] sm:$0xff] }
  0x2e   :  { %3358 = vmatmul.msk.f32.vlgmr.msrb.gmra.mxu3 %vm143_vm0, %v4068_v4  ;;  %441 = vmatpush.msrb.mxu0 %v4178_v34  ;;  %6424 = vst [vmem:[#allocation23_spill] sm:$0xff] %v4274_v60  ;;  %v4300_v4 = vld [vmem:[#allocation4 + $0x20] sm:$0xff]  ;;  %v4306_v6 = vld [vmem:[#allocation4 + $0x58] sm:$0xff]  ;;  %v122_v7 = vld [vmem:[%s6143_s0 + $0x28] sm:$0xff] }
  0x2f   :  { %500 = vmatpush.msra.mxu3 %v4186_v35  ;;  %479 = vmatpush.msra.mxu2 %v4188_v36  ;;  %6425 = vst [vmem:[#allocation24_spill] sm:$0xff] %v4281_v61  ;;  %v4315_v10 = vld [vmem:[#allocation4 + $0x28] sm:$0xff]  ;;  %v4317_v11 = vld [vmem:[#allocation4] sm:$0xff] }
  0x30   :  { %461 = vmatpush.msrb.mxu1 %v4194_v37  ;;  %442 = vmatpush.msrb.mxu0 %v4196_v38  ;;  %6426 = vst [vmem:[#allocation25_spill] sm:$0xff] %v4286_v62 }
  0x31   :  { %501 = vmatpush.msra.mxu3 %v4200_v39  ;;  %480 = vmatpush.msra.mxu2 %v4202_v40  ;;  %6427 = vst [vmem:[#allocation26_spill] sm:$0xff] %v4288_v63 }
  0x32   :  { %462 = vmatpush.msrb.mxu1 %v4204_v41  ;;  %443 = vmatpush.msrb.mxu0 %v4206_v42  ;;  %6428 = vst [vmem:[#allocation27_spill] sm:$0xff] %v4290_v0 }
  0x33   :  { %502 = vmatpush.msra.mxu3 %v4212_v43  ;;  %481 = vmatpush.msra.mxu2 %v4214_v44  ;;  %6429 = vst [vmem:[#allocation28_spill] sm:$0xff] %v4294_v1 }
  0x34   :  { %3337 = vmatmul.msk.f32.gmra.mxu0 %vm143_vm0, %v4219_v45  ;;  %463 = vmatpush.msrb.mxu1 %v4225_v46  ;;  %6430 = vst [vmem:[#allocation29_spill] sm:$0xff] %v4296_v2 }
  0x35   :  { %3351 = vmatmul.msk.f32.gmra.mxu2 %vm143_vm0, %v4116_v18  ;;  %3345 = vmatmul.msk.f32.gmra.mxu1 %vm143_vm0, %v4219_v45  ;;  %6431 = vst [vmem:[#allocation30_spill] sm:$0xff] %v4298_v3 }
  0x36   :  { %3359 = vmatmul.msk.f32.gmra.mxu3 %vm143_vm0, %v4116_v18  ;;  %444 = vmatpush.msrb.mxu0 %v4227_v47  ;;  %6432 = vst [vmem:[#allocation31_spill] sm:$0xff] %v4300_v4  ;;  %v4326_v18 = vld [vmem:[#allocation4 + $0x8] sm:$0xff] }
  0x37   :  { %503 = vmatpush.msra.mxu3 %v4235_v48  ;;  %482 = vmatpush.msra.mxu2 %v4237_v49  ;;  %6433 = vst [vmem:[#allocation32_spill] sm:$0xff] %v4306_v6 }
  0x38   :  { %464 = vmatpush.msrb.mxu1 %v4243_v50  ;;  %445 = vmatpush.msrb.mxu0 %v4245_v51  ;;  %6434 = vst [vmem:[#allocation33_spill] sm:$0xff] %v4315_v10 }
  0x39   :  { %504 = vmatpush.msra.mxu3 %v4249_v52  ;;  %483 = vmatpush.msra.mxu2 %v4251_v53  ;;  %6435 = vst [vmem:[#allocation34_spill] sm:$0xff] %v4317_v11 }
  0x3a   :  { %465 = vmatpush.msrb.mxu1 %v4253_v54  ;;  %446 = vmatpush.msrb.mxu0 %v4255_v55  ;;  %6436 = vst [vmem:[#allocation35_spill] sm:$0xff] %v4326_v18 }
  0x3b   :  { %505 = vmatpush.msra.mxu3 %v4261_v56  ;;  %484 = vmatpush.msra.mxu2 %v4263_v57 }
  0x3c   :  { %3338 = vmatmul.msk.f32.gmra.mxu0 %vm143_vm0, %v121_v58  ;;  %466 = vmatpush.msrb.mxu1 %v4272_v59 }
  0x3d   :  { %3352 = vmatmul.msk.f32.gmra.mxu2 %vm143_vm0, %v4170_v32  ;;  %3346 = vmatmul.msk.f32.gmra.mxu1 %vm143_vm0, %v121_v58 }
  0x3e   :  { %3360 = vmatmul.msk.f32.gmra.mxu3 %vm143_vm0, %v4170_v32  ;;  %447 = vmatpush.msrb.mxu0 %v4274_v60  ;;  %v4328_v32 = vld [vmem:[#allocation4 + $0x38] sm:$0xff] }
  0x3f   :  { %506 = vmatpush.msra.mxu3 %v4281_v61  ;;  %485 = vmatpush.msra.mxu2 %v4290_v0  ;;  %6437 = vst [vmem:[#allocation36_spill] sm:$0xff] %v4328_v32 }
  0x40   :  { %467 = vmatpush.msrb.mxu1 %v4286_v62  ;;  %448 = vmatpush.msrb.mxu0 %v4288_v63 }
  0x41   :  { %507 = vmatpush.msra.mxu3 %v4294_v1  ;;  %486 = vmatpush.msra.mxu2 %v4296_v2 }
  0x42   :  { %468 = vmatpush.msrb.mxu1 %v4298_v3  ;;  %449 = vmatpush.msrb.mxu0 %v4300_v4  ;;  %v4330_v4 = vld [vmem:[#allocation4 + $0x70] sm:$0xff]  ;;  %v4336_v3 = vld [vmem:[#allocation4 + $0x18] sm:$0xff] }
  0x43   :  { %508 = vmatpush.msra.mxu3 %v4306_v6  ;;  %6438 = vst [vmem:[#allocation37_spill] sm:$0xff] %v4330_v4  ;;  %v4334_v6 = vld [vmem:[#allocation4 + $0x50] sm:$0xff]  ;;  %487 = vmatpush.msra.mxu2 %v4330_v4 }
  0x44   :  { %3339 = vmatmul.msk.f32.gmra.mxu0 %vm143_vm0, %v122_v7  ;;  %469 = vmatpush.msrb.mxu1 %v4315_v10  ;;  %6439 = vst [vmem:[#allocation38_spill] sm:$0xff] %v4334_v6 }
  0x45   :  { %3353 = vmatmul.msk.f32.gmra.mxu2 %vm143_vm0, %v4219_v45  ;;  %3347 = vmatmul.msk.f32.gmra.mxu1 %vm143_vm0, %v122_v7  ;;  %6440 = vst [vmem:[#allocation39_spill] sm:$0xff] %v4336_v3 }
  0x46   :  { %3361 = vmatmul.msk.f32.gmra.mxu3 %vm143_vm0, %v4219_v45  ;;  %450 = vmatpush.msrb.mxu0 %v4317_v11  ;;  %v4341_v45 = vld [vmem:[#allocation4 + $0x30] sm:$0xff] }
  0x47   :  { %509 = vmatpush.msra.mxu3 %v4328_v32  ;;  %470 = vmatpush.msrb.mxu1 %v4326_v18  ;;  %6441 = vst [vmem:[#allocation40_spill] sm:$0xff] %v4341_v45  ;;  %v4349_v11 = vld [vmem:[#allocation4 + $0x10] sm:$0xff]  ;;  %v6167_v18 = vmov 0.0  }
  0x48   :  { %590 = vmatpush.msra.mxu0 %v4085_v8  ;;  %488 = vmatpush.msra.mxu2 %v4334_v6  ;;  %6442 = vst [vmem:[#allocation41_spill] sm:$0xff] %v4349_v11 }
  0x49   :  { %510 = vmatpush.msra.mxu3 %v4336_v3  ;;  %610 = vmatpush.msra.mxu1 %v4087_v9 }
  0x4a   :  { %489 = vmatpush.msra.mxu2 %v4341_v45  ;;  %591 = vmatpush.msra.mxu0 %v4101_v13 }
  0x4b   :  { %650 = vmatpush.msrb.mxu3 %v4099_v12  ;;  %611 = vmatpush.msra.mxu1 %v4105_v14 }
  0x4c   :  { %451 = vmatmul.f32.vlgmr.msrb.gmra.mxu0 %v6167_v18  ;;  %490 = vmatpush.msra.mxu2 %v4349_v11 }
  0x4d   :  { %3354 = vmatmul.msk.f32.gmra.mxu2 %vm143_vm0, %v121_v58  ;;  %471 = vmatmul.f32.vlgmr.msrb.gmra.mxu1 %v6167_v18 }
  0x4e   :  { %3362 = vmatmul.msk.f32.gmra.mxu3 %vm143_vm0, %v121_v58  ;;  %630 = vmatpush.msrb.mxu2 %v4111_v17  ;;  %v6445_v58 = vld [vmem:[#allocation31_spill] sm:$0xff] }
  0x4f   :  { %651 = vmatpush.msrb.mxu3 %v4107_v15  ;;  %592 = vmatpush.msra.mxu0 %v4109_v16 }
  0x50   :  { %612 = vmatpush.msra.mxu1 %v4129_v20  ;;  %631 = vmatpush.msrb.mxu2 %v4139_v23 }
  0x51   :  { %652 = vmatpush.msrb.mxu3 %v4137_v22  ;;  %593 = vmatpush.msra.mxu0 %v4131_v21 }
  0x52   :  { %613 = vmatpush.msra.mxu1 %v4145_v24  ;;  %632 = vmatpush.msrb.mxu2 %v4153_v27 }
  0x53   :  { %653 = vmatpush.msrb.mxu3 %v4151_v26  ;;  %594 = vmatpush.msra.mxu0 %v4147_v25 }
  0x54   :  { %633 = vmatpush.msrb.mxu2 %v4165_v31  ;;  %614 = vmatpush.msra.mxu1 %v4156_v28 }
  0x55   :  { %3355 = vmatmul.msk.f32.gmra.mxu2 %vm143_vm0, %v122_v7  ;;  %654 = vmatpush.msrb.mxu3 %v4163_v30 }
  0x56   :  { %3363 = vmatmul.msk.f32.gmra.mxu3 %vm143_vm0, %v122_v7  ;;  %634 = vmatpush.msrb.mxu2 %v4188_v36  ;;  %v6446_v7 = vld [vmem:[#allocation34_spill] sm:$0xff] }
  0x57   :  { %595 = vmatpush.msra.mxu0 %v4158_v29  ;;  %615 = vmatpush.msra.mxu1 %v4176_v33 }
  0x58   :  { %655 = vmatpush.msrb.mxu3 %v4186_v35  ;;  %635 = vmatpush.msrb.mxu2 %v4202_v40 }
  0x59   :  { %596 = vmatpush.msra.mxu0 %v4178_v34  ;;  %616 = vmatpush.msra.mxu1 %v4194_v37 }
  0x5a   :  { %656 = vmatpush.msrb.mxu3 %v4200_v39  ;;  %636 = vmatpush.msrb.mxu2 %v4214_v44 }
  0x5b   :  { %597 = vmatpush.msra.mxu0 %v4196_v38  ;;  %617 = vmatpush.msra.mxu1 %v4204_v41 }
  0x5c   :  { %637 = vmatpush.msrb.mxu2 %v4237_v49  ;;  %657 = vmatpush.msrb.mxu3 %v4212_v43 }
  0x5d   :  { %3356 = vmatmul.msk.f32.gmra.mxu2 %vm143_vm0, %v4073_v5  ;;  %598 = vmatpush.msra.mxu0 %v4206_v42 }
  0x5e   :  { %3364 = vmatmul.msk.f32.gmra.mxu3 %vm143_vm0, %v4073_v5  ;;  %618 = vmatpush.msra.mxu1 %v4225_v46  ;;  %v6443_v5 = vld [vmem:[#allocation30_spill] sm:$0xff] }
  0x5f   :  { %638 = vmatpush.msrb.mxu2 %v4251_v53  ;;  %658 = vmatpush.msrb.mxu3 %v4235_v48 }
  0x60   :  { %599 = vmatpush.msra.mxu0 %v4227_v47  ;;  %619 = vmatpush.msra.mxu1 %v4243_v50 }
  0x61   :  { %639 = vmatpush.msrb.mxu2 %v4263_v57  ;;  %659 = vmatpush.msrb.mxu3 %v4249_v52 }
  0x62   :  { %600 = vmatpush.msra.mxu0 %v4245_v51  ;;  %620 = vmatpush.msra.mxu1 %v4253_v54 }
  0x63   :  { %640 = vmatpush.msrb.mxu2 %v4290_v0  ;;  %660 = vmatpush.msrb.mxu3 %v4261_v56 }
  0x64   :  { %601 = vmatpush.msra.mxu0 %v4255_v55  ;;  %621 = vmatpush.msra.mxu1 %v4272_v59 }
  0x65   :  { %3357 = vmatmul.msk.f32.gmra.mxu2 %vm143_vm0, %v4121_v19  ;;  %661 = vmatpush.msrb.mxu3 %v4281_v61 }
  0x66   :  { %3365 = vmatmul.msk.f32.gmra.mxu3 %vm143_vm0, %v4121_v19  ;;  %641 = vmatpush.msrb.mxu2 %v4296_v2  ;;  %v6444_v19 = vld [vmem:[#allocation32_spill] sm:$0xff] }
  0x67   :  { %602 = vmatpush.msra.mxu0 %v4274_v60  ;;  %622 = vmatpush.msra.mxu1 %v4286_v62 }
  0x68   :  { %642 = vmatpush.msrb.mxu2 %v4330_v4  ;;  %662 = vmatpush.msrb.mxu3 %v4294_v1 }
  0x69   :  { %603 = vmatpush.msra.mxu0 %v4288_v63  ;;  %623 = vmatpush.msra.mxu1 %v6443_v5  ;;  %v6447_v63 = vld [vmem:[#allocation35_spill] sm:$0xff] }
  0x6a   :  { %643 = vmatpush.msrb.mxu2 %v4334_v6  ;;  %663 = vmatpush.msrb.mxu3 %v6444_v19 }
  0x6b   :  { %604 = vmatpush.msra.mxu0 %v6445_v58  ;;  %624 = vmatpush.msra.mxu1 %v4315_v10 }
  0x6c   :  { %644 = vmatpush.msrb.mxu2 %v4341_v45  ;;  %664 = vmatpush.msrb.mxu3 %v4328_v32 }
  0x6d   :  { %491 = vmatmul.f32.vlgmr.msra.gmra.mxu2 %v6167_v18  ;;  %605 = vmatpush.msra.mxu0 %v6446_v7 }
  0x6e   :  { %511 = vmatmul.f32.vlgmr.msra.gmra.mxu3 %v6167_v18  ;;  %625 = vmatpush.msra.mxu1 %v6447_v63  ;;  %v6448_v18 = vld [vmem:[#allocation26_spill] sm:$0xff] }
  0x6f   :  { %645 = vmatpush.msrb.mxu2 %v4349_v11  ;;  %665 = vmatpush.msrb.mxu3 %v4336_v3 }
  0x70   :  { %746 = vmatpush.msrb.mxu0 %v4085_v8  ;;  %766 = vmatpush.msrb.mxu1 %v4087_v9 }
  0x71   :  { %786 = vmatpush.msra.mxu2 %v4111_v17  ;;  %806 = vmatpush.msra.mxu3 %v4099_v12 }
  0x72   :  { %747 = vmatpush.msrb.mxu0 %v4101_v13  ;;  %767 = vmatpush.msrb.mxu1 %v4105_v14 }
  0x73   :  { %787 = vmatpush.msra.mxu2 %v4139_v23  ;;  %807 = vmatpush.msra.mxu3 %v4107_v15 }
  0x74   :  { %748 = vmatpush.msrb.mxu0 %v4109_v16  ;;  %768 = vmatpush.msrb.mxu1 %v4129_v20 }
  0x75   :  { %788 = vmatpush.msra.mxu2 %v4153_v27  ;;  %808 = vmatpush.msra.mxu3 %v4137_v22 }
  0x76   :  { %749 = vmatpush.msrb.mxu0 %v4131_v21  ;;  %769 = vmatpush.msrb.mxu1 %v4145_v24 }
  0x77   :  { %789 = vmatpush.msra.mxu2 %v4165_v31  ;;  %809 = vmatpush.msra.mxu3 %v4151_v26 }
  0x78   :  { %750 = vmatpush.msrb.mxu0 %v4147_v25  ;;  %770 = vmatpush.msrb.mxu1 %v4156_v28 }
  0x79   :  { %790 = vmatpush.msra.mxu2 %v4188_v36  ;;  %810 = vmatpush.msra.mxu3 %v4163_v30 }
  0x7a   :  { %751 = vmatpush.msrb.mxu0 %v4158_v29  ;;  %771 = vmatpush.msrb.mxu1 %v4176_v33 }
  0x7b   :  { %791 = vmatpush.msra.mxu2 %v4202_v40  ;;  %811 = vmatpush.msra.mxu3 %v4186_v35 }
  0x7c   :  { %752 = vmatpush.msrb.mxu0 %v4178_v34  ;;  %772 = vmatpush.msrb.mxu1 %v4194_v37 }
  0x7d   :  { %792 = vmatpush.msra.mxu2 %v4214_v44  ;;  %812 = vmatpush.msra.mxu3 %v4200_v39 }
  0x7e   :  { %753 = vmatpush.msrb.mxu0 %v4196_v38  ;;  %773 = vmatpush.msrb.mxu1 %v4204_v41 }
  0x7f   :  { %793 = vmatpush.msra.mxu2 %v4237_v49  ;;  %813 = vmatpush.msra.mxu3 %v4212_v43 }
  0x80   :  { %754 = vmatpush.msrb.mxu0 %v4206_v42  ;;  %774 = vmatpush.msrb.mxu1 %v4225_v46 }
  0x81   :  { %794 = vmatpush.msra.mxu2 %v4251_v53  ;;  %814 = vmatpush.msra.mxu3 %v4235_v48 }
  0x82   :  { %755 = vmatpush.msrb.mxu0 %v4227_v47  ;;  %775 = vmatpush.msrb.mxu1 %v4243_v50 }
  0x83   :  { %795 = vmatpush.msra.mxu2 %v4263_v57  ;;  %815 = vmatpush.msra.mxu3 %v4249_v52 }
  0x84   :  { %756 = vmatpush.msrb.mxu0 %v4245_v51  ;;  %776 = vmatpush.msrb.mxu1 %v4253_v54 }
  0x85   :  { %796 = vmatpush.msra.mxu2 %v4290_v0  ;;  %816 = vmatpush.msra.mxu3 %v4261_v56 }
  0x86   :  { %757 = vmatpush.msrb.mxu0 %v4255_v55  ;;  %777 = vmatpush.msrb.mxu1 %v4272_v59 }
  0x87   :  { %797 = vmatpush.msra.mxu2 %v4296_v2  ;;  %817 = vmatpush.msra.mxu3 %v4281_v61 }
  0x88   :  { %758 = vmatpush.msrb.mxu0 %v4274_v60  ;;  %778 = vmatpush.msrb.mxu1 %v4286_v62 }
  0x89   :  { %798 = vmatpush.msra.mxu2 %v4330_v4  ;;  %818 = vmatpush.msra.mxu3 %v4294_v1 }
  0x8a   :  { %759 = vmatpush.msrb.mxu0 %v6448_v18  ;;  %779 = vmatpush.msrb.mxu1 %v6443_v5 }
  0x8b   :  { %799 = vmatpush.msra.mxu2 %v4334_v6  ;;  %819 = vmatpush.msra.mxu3 %v6444_v19 }
  0x8c   :  { %760 = vmatpush.msrb.mxu0 %v6445_v58  ;;  %780 = vmatpush.msrb.mxu1 %v4315_v10 }
  0x8d   :  { %800 = vmatpush.msra.mxu2 %v4341_v45  ;;  %820 = vmatpush.msra.mxu3 %v4328_v32 }
  0x8e   :  { %761 = vmatpush.msrb.mxu0 %v6446_v7  ;;  %781 = vmatpush.msrb.mxu1 %v6447_v63 }
  0x8f   :  { %801 = vmatpush.msra.mxu2 %v4349_v11  ;;  %821 = vmatpush.msra.mxu3 %v4336_v3 }
  0x99   :  { %v185_v5 = vpop.f32.mrf.mxu0 }
  0x9a   :  { %v226_v6 = vpop.f32.mrf.mxu1 }
  0x9f   :  { %v4493_v18 = vpop.f32.mrf.mxu2 }
  0xa0   :  { %6449 = vst [vmem:[#allocation42_spill] sm:$0xff] %v4493_v18  ;;  %v4495_v19 = vpop.f32.mrf.mxu3 }
  0xa1   :  { %6450 = vst [vmem:[#allocation43_spill] sm:$0xff] %v4495_v19  ;;  %v4497_v58 = vpop.f32.mrf.mxu0 }
  0xa2   :  { %6451 = vst [vmem:[#allocation44_spill] sm:$0xff] %v4497_v58  ;;  %v4499_v10 = vpop.f32.mrf.mxu1 }
  0xa3   :  { %6452 = vst [vmem:[#allocation45_spill] sm:$0xff] %v4499_v10 }
  0xa8   :  { %v4501_v45 = vpop.f32.mrf.mxu2 }
  0xa9   :  { %6453 = vst [vmem:[#allocation46_spill] sm:$0xff] %v4501_v45  ;;  %v4503_v32 = vpop.f32.mrf.mxu3  ;;  %v4505_v7 = vpop.f32.mrf.mxu0 }
  0xaa   :  { %6454 = vst [vmem:[#allocation47_spill] sm:$0xff] %v4503_v32  ;;  %v4507_v63 = vpop.f32.mrf.mxu1 }
  0xab   :  { %6455 = vst [vmem:[#allocation48_spill] sm:$0xff] %v4505_v7 }
  0xac   :  { %6456 = vst [vmem:[#allocation49_spill] sm:$0xff] %v4507_v63 }
  0xb0   :  { %v267_v11 = vpop.f32.mrf.mxu2 }
  0xb1   :  { %v308_v3 = vpop.f32.mrf.mxu3  ;;  %v4509_v1 = vpop.f32.mrf.mxu0 }
  0xb2   :  { %6457 = vst [vmem:[#allocation50_spill] sm:$0xff] %v4509_v1  ;;  %v4511_v4 = vpop.f32.mrf.mxu1 }
  0xb3   :  { %6458 = vst [vmem:[#allocation51_spill] sm:$0xff] %v4511_v4  ;;  %v133_v4 = vld [vmem:[%s6146_s3] sm:$0xf] }
  0xb8   :  { %v4513_v18 = vpop.f32.mrf.mxu2 }
  0xb9   :  { %6459 = vst [vmem:[#allocation52_spill] sm:$0xff] %v4513_v18  ;;  %v4515_v19 = vpop.f32.mrf.mxu3  ;;  %v4517_v58 = vpop.f32.mrf.mxu0 }
  0xba   :  { %6460 = vst [vmem:[#allocation53_spill] sm:$0xff] %v4515_v19  ;;  %v4519_v10 = vpop.f32.mrf.mxu1  ;;  %v4536_v19 = vperm.slane %v133_v4, 0 }
  0xbb   :  { %6461 = vst [vmem:[#allocation54_spill] sm:$0xff] %v4517_v58  ;;  %v4538_v58 = vperm.slane %v133_v4, 1 }
  0xbc   :  { %6462 = vst [vmem:[#allocation55_spill] sm:$0xff] %v4519_v10 }
  0xbd   :  { %6469 = vst [vmem:[#allocation62_spill] sm:$0xff] %v4536_v19 }
  0xbe   :  { %6470 = vst [vmem:[#allocation63_spill] sm:$0xff] %v4538_v58 }
  0xc0   :  { %v4521_v45 = vpop.f32.mrf.mxu2 }
  0xc1   :  { %6463 = vst [vmem:[#allocation56_spill] sm:$0xff] %v4521_v45  ;;  %v4523_v32 = vpop.f32.mrf.mxu3  ;;  %v4525_v7 = vpop.f32.mrf.mxu0  ;;  %v186_v45 = vadd.f32 %v185_v5, %v4536_v19 }
  0xc2   :  { %6464 = vst [vmem:[#allocation57_spill] sm:$0xff] %v4523_v32  ;;  %v4527_v63 = vpop.f32.mrf.mxu1 }
  0xc3   :  { %6465 = vst [vmem:[#allocation58_spill] sm:$0xff] %v4525_v7  ;;  %v227_v7 = vadd.f32 %v226_v6, %v4538_v58 }
  0xc4   :  { %6466 = vst [vmem:[#allocation59_spill] sm:$0xff] %v4527_v63 }
  0xc8   :  { %v4532_v1 = vpop.f32.mrf.mxu2 }
  0xc9   :  { %6467 = vst [vmem:[#allocation60_spill] sm:$0xff] %v4532_v1  ;;  %v4534_v18 = vpop.f32.mrf.mxu3  ;;  %v452_v10 = vpop.f32.mrf.mxu0 }
  0xca   :  { %6468 = vst [vmem:[#allocation61_spill] sm:$0xff] %v4534_v18  ;;  %v472_v32 = vpop.f32.mrf.mxu1  ;;  %v515_v62 = vadd.f32 %v452_v10, %v186_v45 }
  0xcb   :  { %v516_v63 = vadd.f32 %v472_v32, %v227_v7  ;;  %v4560_v7 = vperm.slane %v133_v4, 2 }
  0xcc   :  { %v3366_v2 = vmul.f32 -1.442695, %v515_v62 }
  0xcd   :  { %v3367_v1 = vmul.f32 -1.442695, %v516_v63  ;;  %6480 = vst [vmem:[#allocation73_spill] sm:$0xff] %v4560_v7 }
  0xce   :  { %3431 = vpow2.f32 %v3366_v2  ;;  %v4558_v2 = vperm.slane %v133_v4, 3 }
  0xcf   :  { %3433 = vpow2.f32 %v3367_v1 }
  0xd0   :  { %v4542_v60 = vpop.f32.mrf.mxu2  ;;  %6479 = vst [vmem:[#allocation72_spill] sm:$0xff] %v4558_v2 }
  0xd1   :  { %6471 = vst [vmem:[#allocation64_spill] sm:$0xff] %v4542_v60  ;;  %v4544_v61 = vpop.f32.mrf.mxu3 }
  0xd2   :  { %6472 = vst [vmem:[#allocation65_spill] sm:$0xff] %v4544_v61 }
  0xd4   :  { %v3432_v55 = vpop.eup %3431 }
  0xd5   :  { %v3434_v56 = vpop.eup %3433  ;;  %v522_v5 = vadd.f32 1.0, %v3432_v55  ;;  %v309_v55 = vadd.f32 %v308_v3, %v4558_v2 }
  0xd6   :  { %v541_v19 = vadd.f32 1.0, %v3434_v56 }
  0xd7   :  { %3435 = vrcp.f32 %v522_v5  ;;  %vm528_vm3 = vweird.f32 %v522_v5  ;;  %v534_v3 = vand.u32 2147483648, %v522_v5 }
  0xd8   :  { %v4546_v18 = vpop.f32.mrf.mxu2  ;;  %3437 = vrcp.f32 %v541_v19  ;;  %v553_v4 = vand.u32 2147483648, %v541_v19  ;;  %vm547_vm4 = vweird.f32 %v541_v19 }
  0xd9   :  { %6473 = vst [vmem:[#allocation66_spill] sm:$0xff] %v4546_v18  ;;  %v4548_v59 = vpop.f32.mrf.mxu3 }
  0xda   :  { %6474 = vst [vmem:[#allocation67_spill] sm:$0xff] %v4548_v59  ;;  %v268_v59 = vadd.f32 %v267_v11, %v4560_v7 }
  0xdd   :  { %v3436_v62 = vpop.eup %3435 }
  0xde   :  { %v3438_v1 = vpop.eup %3437  ;;  %v524_v32 = vmul.f32 %v3436_v62, %v522_v5  ;;  %vm529_vm1 = vweird.f32 %v3436_v62 }
  0xdf   :  { %v543_v45 = vmul.f32 %v3438_v1, %v541_v19  ;;  %vm548_vm2 = vweird.f32 %v3438_v1  ;;  %vm530_vm5 = vmor %vm528_vm3, %vm529_vm1 }
  0xe0   :  { %v4550_v0 = vpop.f32.mrf.mxu2  ;;  %v525_v56 = vsub.f32 1.0, %v524_v32  ;;  %v532_v32 = vand.u32 2147483647, %v522_v5  ;;  %vm549_vm6 = vmor %vm547_vm4, %vm548_vm2 }
  0xe1   :  { %6475 = vst [vmem:[#allocation68_spill] sm:$0xff] %v4550_v0  ;;  %v4552_v6 = vpop.f32.mrf.mxu3  ;;  %v544_v0 = vsub.f32 1.0, %v543_v45  ;;  %v551_v45 = vand.u32 2147483647, %v541_v19 }
  0xe2   :  { %6476 = vst [vmem:[#allocation69_spill] sm:$0xff] %v4552_v6  ;;  %vm533_vm7 = vcmp.eq.f32.partialorder %v532_v32, 8.507059e+37 }
  0xe3   :  { %v545_v58 = vmul.f32 %v3438_v1, %v544_v0  ;;  %vm552_vm8 = vcmp.eq.f32.partialorder %v551_v45, 8.507059e+37 }
  0xe5   :  { %v546_v51 = vadd.f32 %v3438_v1, %v545_v58 }
  0xe8   :  { %v4554_v10 = vpop.f32.mrf.mxu2 }
  0xe9   :  { %6477 = vst [vmem:[#allocation70_spill] sm:$0xff] %v4554_v10  ;;  %v4556_v63 = vpop.f32.mrf.mxu3 }
  0xea   :  { %6478 = vst [vmem:[#allocation71_spill] sm:$0xff] %v4556_v63  ;;  %v526_v63 = vmul.f32 %v3436_v62, %v525_v56 }
  0xec   :  { %v527_v54 = vadd.f32 %v3436_v62, %v526_v63 }
  0xee   :  { %v531_v11 = vsel %vm530_vm5, %v3436_v62, %v527_v54 }
  0xf0   :  { %v492_v18 = vpop.f32.mrf.mxu2 }
  0xf1   :  { %v512_v6 = vpop.f32.mrf.mxu3  ;;  %v517_v10 = vadd.f32 %v492_v18, %v268_v59  ;;  %v550_v59 = vsel %vm549_vm6, %v3438_v1, %v546_v51  ;;  %v535_v18 = vor.u32 1.1754944e-38, %v534_v3 }
  0xf2   :  { %v518_v60 = vadd.f32 %v512_v6, %v309_v55 }
  0xf3   :  { %v536_v58 = vsel %vm533_vm7, %v535_v18, %v531_v11 }
  0xf4   :  { %v3368_v61 = vmul.f32 -1.442695, %v518_v60 }
  0xf6   :  { %3439 = vpow2.f32 %v3368_v61  ;;  %v554_v61 = vor.u32 1.1754944e-38, %v553_v4 }
  0xf7   :  { %3441 = vtanh.f32 %v517_v10 }
  0xf8   :  { %v555_v6 = vsel %vm552_vm8, %v554_v61, %v550_v59  ;;  %v6510_v59 = vld [vmem:[#allocation72_spill] sm:$0xff] }
  0xf9   :  { %v577_v63 = vmul.f32 0.0, %v555_v6 }
  0xfc   :  { %v3440_v2 = vpop.eup %3439 }
  0xfd   :  { %v561_v60 = vadd.f32 1.0, %v3440_v2  ;;  %v3442_v0 = vpop.eup %3441 }
  0xfe   :  { %v578_v10 = vmul.f32 %v3442_v0, %v536_v58 }
  0xff   :  { %3443 = vrcp.f32 %v561_v60  ;;  %v573_v54 = vand.u32 2147483648, %v561_v60  ;;  %v571_v62 = vand.u32 2147483647, %v561_v60  ;;  %vm567_vm10 = vweird.f32 %v561_v60 }
 0x100   :  { %v4564_v56 = vadd.f32 %v578_v10, %v577_v63 }
 0x101   :  { %v574_v2 = vor.u32 1.1754944e-38, %v573_v54  ;;  %vm572_vm12 = vcmp.eq.f32.partialorder %v571_v62, 8.507059e+37  ;;  %v6512_v54 = vld [vmem:[#allocation52_spill] sm:$0xff] }
 0x102   :  { %3445 = vtanh.f32 %v4564_v56 }
 0x105   :  { %v3444_v55 = vpop.eup %3443 }
 0x106   :  { %v563_v5 = vmul.f32 %v3444_v55, %v561_v60  ;;  %vm568_vm9 = vweird.f32 %v3444_v55  ;;  %v6511_v60 = vld [vmem:[#allocation53_spill] sm:$0xff] }
 0x107   :  { %vm569_vm11 = vmor %vm567_vm10, %vm568_vm9  ;;  %v312_v0 = vadd.f32 %v6511_v60, %v6510_v59 }
 0x108   :  { %v564_v19 = vsub.f32 1.0, %v563_v5  ;;  %v3446_v3 = vpop.eup %3445 }
 0x10a   :  { %v565_v51 = vmul.f32 %v3444_v55, %v564_v19 }
 0x10c   :  { %v566_v1 = vadd.f32 %v3444_v55, %v565_v51  ;;  %v271_v51 = vadd.f32 %v6512_v54, %v4560_v7 }
 0x10e   :  { %v570_v4 = vsel %vm569_vm11, %v3444_v55, %v566_v1 }
 0x10f   :  { %v575_v32 = vsel %vm572_vm12, %v574_v2, %v570_v4 }
 0x110   :  { %v4567_v45 = vmul.f32 %v3446_v3, %v575_v32 }
 0x112   :  { %6481 = vst [vmem:[#allocation74_spill] sm:$0xff] %v4567_v45  ;;  %606 = vmatmul.f32.vlgmr.msra.gmra.mxu0 %v4567_v45  ;;  %626 = vmatmul.f32.vlgmr.msra.gmra.mxu1 %v4567_v45 }
 0x113   :  { %646 = vmatmul.f32.vlgmr.msrb.gmra.mxu2 %v4567_v45  ;;  %666 = vmatmul.f32.vlgmr.msrb.gmra.mxu3 %v4567_v45  ;;  %v4746_v45 = vld [vmem:[#allocation4 + $0x118] sm:$0xff] }
 0x114   :  { %902 = vmatpush.msra.mxu0 %v4085_v8  ;;  %922 = vmatpush.msra.mxu1 %v4087_v9  ;;  %v6482_v8 = vld [vmem:[#allocation18_spill] sm:$0xff]  ;;  %v6483_v9 = vld [vmem:[#allocation19_spill] sm:$0xff] }
 0x115   :  { %942 = vmatpush.msrb.mxu2 %v4111_v17  ;;  %962 = vmatpush.msrb.mxu3 %v4099_v12  ;;  %v6484_v12 = vld [vmem:[#allocation27_spill] sm:$0xff]  ;;  %v6489_v17 = vld [vmem:[#allocation24_spill] sm:$0xff] }
 0x116   :  { %903 = vmatpush.msra.mxu0 %v4101_v13  ;;  %923 = vmatpush.msra.mxu1 %v4105_v14  ;;  %v6485_v13 = vld [vmem:[#allocation21_spill] sm:$0xff]  ;;  %v6486_v14 = vld [vmem:[#allocation20_spill] sm:$0xff] }
 0x117   :  { %943 = vmatpush.msrb.mxu2 %v4139_v23  ;;  %963 = vmatpush.msrb.mxu3 %v4107_v15  ;;  %v6487_v15 = vld [vmem:[#allocation22_spill] sm:$0xff]  ;;  %v6493_v23 = vld [vmem:[#allocation28_spill] sm:$0xff] }
 0x118   :  { %904 = vmatpush.msra.mxu0 %v4109_v16  ;;  %924 = vmatpush.msra.mxu1 %v4129_v20  ;;  %v6488_v16 = vld [vmem:[#allocation29_spill] sm:$0xff]  ;;  %v6490_v20 = vld [vmem:[#allocation23_spill] sm:$0xff] }
 0x119   :  { %944 = vmatpush.msrb.mxu2 %v4153_v27  ;;  %964 = vmatpush.msrb.mxu3 %v4137_v22  ;;  %v6492_v22 = vld [vmem:[#allocation37_spill] sm:$0xff]  ;;  %v6497_v27 = vld [vmem:[#allocation32_spill] sm:$0xff] }
 0x11a   :  { %905 = vmatpush.msra.mxu0 %v4131_v21  ;;  %925 = vmatpush.msra.mxu1 %v4145_v24  ;;  %v6491_v21 = vld [vmem:[#allocation25_spill] sm:$0xff]  ;;  %v6494_v24 = vld [vmem:[#allocation26_spill] sm:$0xff] }
 0x11b   :  { %945 = vmatpush.msrb.mxu2 %v4165_v31  ;;  %965 = vmatpush.msrb.mxu3 %v4151_v26  ;;  %v6496_v26 = vld [vmem:[#allocation38_spill] sm:$0xff]  ;;  %v6501_v31 = vld [vmem:[#allocation36_spill] sm:$0xff] }
 0x11c   :  { %906 = vmatpush.msra.mxu0 %v4147_v25  ;;  %926 = vmatpush.msra.mxu1 %v4156_v28  ;;  %v6495_v25 = vld [vmem:[#allocation30_spill] sm:$0xff]  ;;  %v6498_v28 = vld [vmem:[#allocation31_spill] sm:$0xff] }
 0x11d   :  { %946 = vmatpush.msrb.mxu2 %v4188_v36  ;;  %966 = vmatpush.msrb.mxu3 %v4163_v30  ;;  %v6500_v30 = vld [vmem:[#allocation40_spill] sm:$0xff]  ;;  %v6505_v36 = vld [vmem:[#allocation39_spill] sm:$0xff] }
 0x11e   :  { %907 = vmatpush.msra.mxu0 %v4158_v29  ;;  %927 = vmatpush.msra.mxu1 %v4176_v33  ;;  %v6499_v29 = vld [vmem:[#allocation33_spill] sm:$0xff]  ;;  %v6502_v33 = vld [vmem:[#allocation34_spill] sm:$0xff] }
 0x11f   :  { %947 = vmatpush.msrb.mxu2 %v4202_v40  ;;  %967 = vmatpush.msrb.mxu3 %v4186_v35  ;;  %v6504_v35 = vld [vmem:[#allocation41_spill] sm:$0xff]  ;;  %v6508_v40 = vld [vmem:[#allocation63_spill] sm:$0xff] }
 0x120   :  { %908 = vmatpush.msra.mxu0 %v4178_v34  ;;  %928 = vmatpush.msra.mxu1 %v4194_v37  ;;  %v6503_v34 = vld [vmem:[#allocation35_spill] sm:$0xff]  ;;  %v6506_v37 = vld [vmem:[#allocation62_spill] sm:$0xff] }
 0x121   :  { %948 = vmatpush.msrb.mxu2 %v4214_v44  ;;  %968 = vmatpush.msrb.mxu3 %v4200_v39 }
 0x122   :  { %909 = vmatpush.msra.mxu0 %v4196_v38  ;;  %929 = vmatpush.msra.mxu1 %v4204_v41  ;;  %v6507_v38 = vld [vmem:[#allocation44_spill] sm:$0xff]  ;;  %v6509_v41 = vld [vmem:[#allocation45_spill] sm:$0xff] }
 0x123   :  { %949 = vmatpush.msrb.mxu2 %v4237_v49  ;;  %969 = vmatpush.msrb.mxu3 %v4212_v43  ;;  %v189_v39 = vadd.f32 %v6507_v38, %v6506_v37 }
 0x124   :  { %910 = vmatpush.msra.mxu0 %v4206_v42  ;;  %930 = vmatpush.msra.mxu1 %v4225_v46  ;;  %v230_v42 = vadd.f32 %v6509_v41, %v6508_v40 }
 0x125   :  { %950 = vmatpush.msrb.mxu2 %v4251_v53  ;;  %970 = vmatpush.msrb.mxu3 %v4235_v48 }
 0x126   :  { %911 = vmatpush.msra.mxu0 %v4227_v47  ;;  %931 = vmatpush.msra.mxu1 %v4243_v50 }
 0x127   :  { %951 = vmatpush.msrb.mxu2 %v4263_v57  ;;  %971 = vmatpush.msrb.mxu3 %v4249_v52 }
 0x128   :  { %912 = vmatpush.msra.mxu0 %v6482_v8  ;;  %932 = vmatpush.msra.mxu1 %v6483_v9 }
 0x129   :  { %952 = vmatpush.msrb.mxu2 %v6484_v12  ;;  %972 = vmatpush.msrb.mxu3 %v6485_v13 }
 0x12a   :  { %913 = vmatpush.msra.mxu0 %v6486_v14  ;;  %933 = vmatpush.msra.mxu1 %v6487_v15 }
 0x12b   :  { %953 = vmatpush.msrb.mxu2 %v6488_v16  ;;  %973 = vmatpush.msrb.mxu3 %v6489_v17 }
 0x12c   :  { %914 = vmatpush.msra.mxu0 %v6490_v20  ;;  %934 = vmatpush.msra.mxu1 %v6491_v21 }
 0x12d   :  { %954 = vmatpush.msrb.mxu2 %v6492_v22  ;;  %974 = vmatpush.msrb.mxu3 %v6493_v23 }
 0x12e   :  { %915 = vmatpush.msra.mxu0 %v6494_v24  ;;  %935 = vmatpush.msra.mxu1 %v6495_v25 }
 0x12f   :  { %955 = vmatpush.msrb.mxu2 %v6496_v26  ;;  %975 = vmatpush.msrb.mxu3 %v6497_v27 }
 0x130   :  { %916 = vmatpush.msra.mxu0 %v6498_v28  ;;  %936 = vmatpush.msra.mxu1 %v6499_v29 }
 0x131   :  { %956 = vmatpush.msrb.mxu2 %v6500_v30  ;;  %976 = vmatpush.msrb.mxu3 %v6501_v31 }
 0x132   :  { %917 = vmatpush.msra.mxu0 %v6502_v33  ;;  %937 = vmatpush.msra.mxu1 %v6503_v34 }
 0x133   :  { %957 = vmatpush.msrb.mxu2 %v6504_v35  ;;  %977 = vmatpush.msrb.mxu3 %v6505_v36 }
 0x18f   :  { %v607_v43 = vpop.f32.mrf.mxu0  ;;  %v627_v44 = vpop.f32.mrf.mxu1 }
 0x190   :  { %v670_v46 = vadd.f32 %v607_v43, %v189_v39  ;;  %v671_v47 = vadd.f32 %v627_v44, %v230_v42 }
 0x192   :  { %v3369_v48 = vmul.f32 -1.442695, %v670_v46  ;;  %v3370_v11 = vmul.f32 -1.442695, %v671_v47 }
 0x194   :  { %3447 = vpow2.f32 %v3369_v48 }
 0x195   :  { %3449 = vpow2.f32 %v3370_v11 }
 0x196   :  { %v667_v18 = vpop.f32.mrf.mxu3  ;;  %v647_v5 = vpop.f32.mrf.mxu2 }
 0x197   :  { %v673_v61 = vadd.f32 %v667_v18, %v312_v0  ;;  %v672_v2 = vadd.f32 %v647_v5, %v271_v51 }
 0x199   :  { %v3371_v58 = vmul.f32 -1.442695, %v673_v61 }
 0x19a   :  { %v3448_v6 = vpop.eup %3447 }
 0x19b   :  { %v3450_v10 = vpop.eup %3449  ;;  %v677_v63 = vadd.f32 1.0, %v3448_v6  ;;  %3451 = vpow2.f32 %v3371_v58 }
 0x19c   :  { %v696_v55 = vadd.f32 1.0, %v3450_v10 }
 0x19d   :  { %3453 = vrcp.f32 %v677_v63  ;;  %v689_v39 = vand.u32 2147483648, %v677_v63  ;;  %v687_v43 = vand.u32 2147483647, %v677_v63  ;;  %vm683_vm15 = vweird.f32 %v677_v63 }
 0x19e   :  { %3455 = vrcp.f32 %v696_v55  ;;  %v708_v41 = vand.u32 2147483648, %v696_v55  ;;  %v706_v46 = vand.u32 2147483647, %v696_v55  ;;  %vm702_vm0 = vweird.f32 %v696_v55 }
 0x19f   :  { %v690_v11 = vor.u32 1.1754944e-38, %v689_v39  ;;  %vm688_vm3 = vcmp.eq.f32.partialorder %v687_v43, 8.507059e+37  ;;  %v4667_v43 = vld [vmem:[#allocation4 + $0x1c0] sm:$0xff] }
 0x1a0   :  { %v709_v18 = vor.u32 1.1754944e-38, %v708_v41  ;;  %vm707_vm4 = vcmp.eq.f32.partialorder %v706_v46, 8.507059e+37  ;;  %v4661_v41 = vld [vmem:[#allocation4 + $0x1f0] sm:$0xff] }
 0x1a1   :  { %v3452_v19 = vpop.eup %3451  ;;  %v4673_v46 = vld [vmem:[#allocation4 + $0x1d0] sm:$0xff] }
 0x1a2   :  { %v716_v62 = vadd.f32 1.0, %v3452_v19 }
 0x1a3   :  { %v3454_v1 = vpop.eup %3453 }
 0x1a4   :  { %v3456_v4 = vpop.eup %3455  ;;  %v679_v3 = vmul.f32 %v3454_v1, %v677_v63  ;;  %3457 = vrcp.f32 %v716_v62  ;;  %vm684_vm13 = vweird.f32 %v3454_v1  ;;  %vm722_vm6 = vweird.f32 %v716_v62 }
 0x1a5   :  { %v698_v32 = vmul.f32 %v3456_v4, %v696_v55  ;;  %3459 = vtanh.f32 %v672_v2  ;;  %vm703_vm14 = vweird.f32 %v3456_v4  ;;  %vm685_vm1 = vmor %vm683_vm15, %vm684_vm13 }
 0x1a6   :  { %v680_v8 = vsub.f32 1.0, %v679_v3  ;;  %vm704_vm2 = vmor %vm702_vm0, %vm703_vm14  ;;  %v728_v3 = vand.u32 2147483648, %v716_v62 }
 0x1a7   :  { %v699_v38 = vsub.f32 1.0, %v698_v32 }
 0x1a8   :  { %v681_v42 = vmul.f32 %v3454_v1, %v680_v8  ;;  %v729_v8 = vor.u32 1.1754944e-38, %v728_v3  ;;  %v4724_v3 = vld [vmem:[#allocation4 + $0x158] sm:$0xff] }
 0x1a9   :  { %v700_v44 = vmul.f32 %v3456_v4, %v699_v38 }
 0x1aa   :  { %v3458_v47 = vpop.eup %3457  ;;  %v682_v48 = vadd.f32 %v3454_v1, %v681_v42  ;;  %v4664_v42 = vld [vmem:[#allocation4 + $0x1f8] sm:$0xff] }
 0x1ab   :  { %v701_v60 = vadd.f32 %v3456_v4, %v700_v44  ;;  %v718_v0 = vmul.f32 %v3458_v47, %v716_v62  ;;  %v3460_v58 = vpop.eup %3459  ;;  %vm723_vm5 = vweird.f32 %v3458_v47  ;;  %v4670_v44 = vld [vmem:[#allocation4 + $0x1c8] sm:$0xff] }
 0x1ac   :  { %v686_v61 = vsel %vm685_vm1, %v3454_v1, %v682_v48  ;;  %v726_v1 = vand.u32 2147483647, %v716_v62  ;;  %vm724_vm7 = vmor %vm722_vm6, %vm723_vm5  ;;  %v4658_v62 = vld [vmem:[#allocation4 + $0x1e8] sm:$0xff]  ;;  %v4679_v48 = vld [vmem:[#allocation4 + $0x1a0] sm:$0xff] }
 0x1ad   :  { %v691_v6 = vsel %vm688_vm3, %v690_v11, %v686_v61  ;;  %v705_v10 = vsel %vm704_vm2, %v3456_v4, %v701_v60  ;;  %v719_v5 = vsub.f32 1.0, %v718_v0  ;;  %v4682_v11 = vld [vmem:[#allocation4 + $0x1a8] sm:$0xff]  ;;  %v4685_v60 = vld [vmem:[#allocation4 + $0x1b0] sm:$0xff]  ;;  %v4688_v0 = vld [vmem:[#allocation4 + $0x1b8] sm:$0xff] }
 0x1ae   :  { %v710_v19 = vsel %vm707_vm4, %v709_v18, %v705_v10  ;;  %v733_v54 = vmul.f32 %v3460_v58, %v691_v6  ;;  %vm727_vm8 = vcmp.eq.f32.partialorder %v726_v1, 8.507059e+37  ;;  %v4691_v18 = vld [vmem:[#allocation4 + $0x180] sm:$0xff]  ;;  %v4694_v61 = vld [vmem:[#allocation4 + $0x188] sm:$0xff]  ;;  %v4697_v58 = vld [vmem:[#allocation4 + $0x190] sm:$0xff] }
 0x1af   :  { %v732_v51 = vmul.f32 %v710_v19, %v4564_v56  ;;  %v720_v2 = vmul.f32 %v3458_v47, %v719_v5  ;;  %v4655_v56 = vld [vmem:[#allocation4 + $0x1e0] sm:$0xff]  ;;  %v4700_v6 = vld [vmem:[#allocation4 + $0x198] sm:$0xff]  ;;  %v4706_v5 = vld [vmem:[#allocation4 + $0x168] sm:$0xff] }
 0x1b0   :  { %v4703_v10 = vld [vmem:[#allocation4 + $0x160] sm:$0xff]  ;;  %v4709_v19 = vld [vmem:[#allocation4 + $0x170] sm:$0xff] }
 0x1b1   :  { %v4646_v63 = vadd.f32 %v733_v54, %v732_v51  ;;  %v721_v55 = vadd.f32 %v3458_v47, %v720_v2  ;;  %v4712_v54 = vld [vmem:[#allocation4 + $0x178] sm:$0xff]  ;;  %v4715_v51 = vld [vmem:[#allocation4 + $0x140] sm:$0xff]  ;;  %v4718_v2 = vld [vmem:[#allocation4 + $0x148] sm:$0xff] }
 0x1b2   :  { %v4727_v1 = vld [vmem:[#allocation4 + $0x120] sm:$0xff] }
 0x1b3   :  { %3461 = vtanh.f32 %v4646_v63  ;;  %v725_v32 = vsel %vm724_vm7, %v3458_v47, %v721_v55  ;;  %v4676_v47 = vld [vmem:[#allocation4 + $0x1d8] sm:$0xff]  ;;  %v4721_v55 = vld [vmem:[#allocation4 + $0x150] sm:$0xff] }
 0x1b4   :  { %v730_v38 = vsel %vm727_vm8, %v729_v8, %v725_v32  ;;  %v4730_v32 = vld [vmem:[#allocation4 + $0x128] sm:$0xff]  ;;  %v4733_v8 = vld [vmem:[#allocation4 + $0x130] sm:$0xff] }
 0x1b5   :  { %6514 = vst [vmem:[#allocation19_spill] sm:$0xff] %v4730_v32 }
 0x1b6   :  { %6515 = vst [vmem:[#allocation27_spill] sm:$0xff] %v4733_v8 }
 0x1b9   :  { %v3462_v4 = vpop.eup %3461 }
 0x1ba   :  { %v4649_v39 = vmul.f32 %v3462_v4, %v730_v38  ;;  %v4736_v4 = vld [vmem:[#allocation4 + $0x138] sm:$0xff]  ;;  %v4739_v38 = vld [vmem:[#allocation4 + $0x100] sm:$0xff] }
 0x1bb   :  { %6516 = vst [vmem:[#allocation21_spill] sm:$0xff] %v4739_v38 }
 0x1bc   :  { %6513 = vst [vmem:[#allocation18_spill] sm:$0xff] %v4649_v39  ;;  %762 = vmatmul.f32.vlgmr.msrb.gmra.mxu0 %v4649_v39  ;;  %782 = vmatmul.f32.vlgmr.msrb.gmra.mxu1 %v4649_v39 }
 0x1bd   :  { %802 = vmatmul.f32.vlgmr.msra.gmra.mxu2 %v4649_v39  ;;  %822 = vmatmul.f32.vlgmr.msra.gmra.mxu3 %v4649_v39  ;;  %v4742_v39 = vld [vmem:[#allocation4 + $0x108] sm:$0xff] }
 0x1be   :  { %1058 = vmatpush.msrb.mxu0 %v4655_v56  ;;  %1078 = vmatpush.msrb.mxu1 %v4658_v62  ;;  %6517 = vst [vmem:[#allocation20_spill] sm:$0xff] %v4742_v39 }
 0x1bf   :  { %1098 = vmatpush.msra.mxu2 %v4661_v41  ;;  %1118 = vmatpush.msra.mxu3 %v4664_v42 }
 0x1c0   :  { %1059 = vmatpush.msrb.mxu0 %v4667_v43  ;;  %1079 = vmatpush.msrb.mxu1 %v4670_v44 }
 0x1c1   :  { %1099 = vmatpush.msra.mxu2 %v4673_v46  ;;  %1119 = vmatpush.msra.mxu3 %v4676_v47 }
 0x1c2   :  { %1060 = vmatpush.msrb.mxu0 %v4679_v48  ;;  %1080 = vmatpush.msrb.mxu1 %v4682_v11 }
 0x1c3   :  { %1100 = vmatpush.msra.mxu2 %v4685_v60  ;;  %1120 = vmatpush.msra.mxu3 %v4688_v0 }
 0x1c4   :  { %1061 = vmatpush.msrb.mxu0 %v4691_v18  ;;  %1081 = vmatpush.msrb.mxu1 %v4694_v61 }
 0x1c5   :  { %1101 = vmatpush.msra.mxu2 %v4697_v58  ;;  %1121 = vmatpush.msra.mxu3 %v4700_v6 }
 0x1c6   :  { %1062 = vmatpush.msrb.mxu0 %v4703_v10  ;;  %1082 = vmatpush.msrb.mxu1 %v4706_v5 }
 0x1c7   :  { %1102 = vmatpush.msra.mxu2 %v4709_v19  ;;  %1122 = vmatpush.msra.mxu3 %v4712_v54 }
 0x1c8   :  { %1063 = vmatpush.msrb.mxu0 %v4715_v51  ;;  %1083 = vmatpush.msrb.mxu1 %v4718_v2 }
 0x1c9   :  { %1103 = vmatpush.msra.mxu2 %v4721_v55  ;;  %1123 = vmatpush.msra.mxu3 %v4724_v3 }
 0x1ca   :  { %1064 = vmatpush.msrb.mxu0 %v4727_v1  ;;  %1084 = vmatpush.msrb.mxu1 %v4730_v32  ;;  %v4749_v32 = vld [vmem:[#allocation4 + $0xe0] sm:$0xff] }
 0x1cb   :  { %1104 = vmatpush.msra.mxu2 %v4733_v8  ;;  %1124 = vmatpush.msra.mxu3 %v4736_v4  ;;  %v4752_v8 = vld [vmem:[#allocation4 + $0xe8] sm:$0xff] }
 0x1cc   :  { %1065 = vmatpush.msrb.mxu0 %v4739_v38  ;;  %1085 = vmatpush.msrb.mxu1 %v4742_v39  ;;  %v4756_v38 = vld [vmem:[#allocation4 + $0xf8] sm:$0xff]  ;;  %v4759_v39 = vld [vmem:[#allocation4 + $0xc0] sm:$0xff] }
 0x1cd   :  { %1105 = vmatpush.msra.mxu2 %v4237_v49  ;;  %1125 = vmatpush.msra.mxu3 %v4746_v45  ;;  %v4765_v49 = vld [vmem:[#allocation4 + $0xa0] sm:$0xff] }
 0x1ce   :  { %1066 = vmatpush.msrb.mxu0 %v4749_v32  ;;  %1086 = vmatpush.msrb.mxu1 %v4752_v8  ;;  %6518 = vst [vmem:[#allocation22_spill] sm:$0xff] %v4765_v49 }
 0x1cf   :  { %1106 = vmatpush.msra.mxu2 %v4251_v53  ;;  %1126 = vmatpush.msra.mxu3 %v4756_v38  ;;  %v6520_v53 = vld [vmem:[#allocation49_spill] sm:$0xff] }
 0x1d0   :  { %1067 = vmatpush.msrb.mxu0 %v4759_v39  ;;  %1087 = vmatpush.msrb.mxu1 %v4243_v50  ;;  %v6519_v50 = vld [vmem:[#allocation48_spill] sm:$0xff] }
 0x1d1   :  { %1107 = vmatpush.msra.mxu2 %v4263_v57  ;;  %1127 = vmatpush.msra.mxu3 %v4249_v52  ;;  %v192_v52 = vadd.f32 %v6519_v50, %v6506_v37  ;;  %v233_v57 = vadd.f32 %v6520_v53, %v6508_v40 }
 0x1d2   :  { %1068 = vmatpush.msrb.mxu0 %v4765_v49  ;;  %1088 = vmatpush.msrb.mxu1 %v6483_v9 }
 0x1d3   :  { %1108 = vmatpush.msra.mxu2 %v6484_v12  ;;  %1128 = vmatpush.msra.mxu3 %v6485_v13 }
 0x1d4   :  { %1069 = vmatpush.msrb.mxu0 %v6486_v14  ;;  %1089 = vmatpush.msrb.mxu1 %v6487_v15 }
 0x1d5   :  { %1109 = vmatpush.msra.mxu2 %v6488_v16  ;;  %1129 = vmatpush.msra.mxu3 %v6489_v17  ;;  %v6521_v17 = vld [vmem:[#allocation57_spill] sm:$0xff] }
 0x1d6   :  { %1070 = vmatpush.msrb.mxu0 %v6490_v20  ;;  %1090 = vmatpush.msrb.mxu1 %v6491_v21  ;;  %v315_v20 = vadd.f32 %v6521_v17, %v6510_v59 }
 0x1d7   :  { %1110 = vmatpush.msra.mxu2 %v6492_v22  ;;  %1130 = vmatpush.msra.mxu3 %v6493_v23 }
 0x1d8   :  { %1071 = vmatpush.msrb.mxu0 %v6494_v24  ;;  %1091 = vmatpush.msrb.mxu1 %v6495_v25 }
 0x1d9   :  { %1111 = vmatpush.msra.mxu2 %v6496_v26  ;;  %1131 = vmatpush.msra.mxu3 %v6497_v27 }
 0x1da   :  { %1072 = vmatpush.msrb.mxu0 %v6498_v28  ;;  %1092 = vmatpush.msrb.mxu1 %v6499_v29 }
 0x1db   :  { %1112 = vmatpush.msra.mxu2 %v6500_v30  ;;  %1132 = vmatpush.msra.mxu3 %v6501_v31  ;;  %v6522_v30 = vld [vmem:[#allocation56_spill] sm:$0xff] }
 0x1dc   :  { %1073 = vmatpush.msrb.mxu0 %v6502_v33  ;;  %1093 = vmatpush.msrb.mxu1 %v6503_v34  ;;  %v274_v31 = vadd.f32 %v6522_v30, %v4560_v7 }
 0x1dd   :  { %1113 = vmatpush.msra.mxu2 %v6504_v35  ;;  %1133 = vmatpush.msra.mxu3 %v6505_v36 }
 0x239   :  { %v763_v9 = vpop.f32.mrf.mxu0  ;;  %v783_v12 = vpop.f32.mrf.mxu1 }
 0x23a   :  { %v826_v13 = vadd.f32 %v763_v9, %v192_v52  ;;  %v827_v14 = vadd.f32 %v783_v12, %v233_v57 }
 0x23c   :  { %v3372_v15 = vmul.f32 -1.442695, %v826_v13  ;;  %v3373_v16 = vmul.f32 -1.442695, %v827_v14 }
 0x23e   :  { %3463 = vpow2.f32 %v3372_v15 }
 0x23f   :  { %3465 = vpow2.f32 %v3373_v16 }
 0x240   :  { %v823_v21 = vpop.f32.mrf.mxu3  ;;  %v803_v28 = vpop.f32.mrf.mxu2 }
 0x241   :  { %v829_v22 = vadd.f32 %v823_v21, %v315_v20  ;;  %v828_v35 = vadd.f32 %v803_v28, %v274_v31 }
 0x243   :  { %v3374_v23 = vmul.f32 -1.442695, %v829_v22 }
 0x244   :  { %v3464_v24 = vpop.eup %3463 }
 0x245   :  { %v3466_v25 = vpop.eup %3465  ;;  %v833_v26 = vadd.f32 1.0, %v3464_v24  ;;  %3467 = vpow2.f32 %v3374_v23 }
 0x246   :  { %v852_v27 = vadd.f32 1.0, %v3466_v25 }
 0x247   :  { %3469 = vrcp.f32 %v833_v26  ;;  %v845_v9 = vand.u32 2147483648, %v833_v26  ;;  %v843_v14 = vand.u32 2147483647, %v833_v26  ;;  %vm839_vm11 = vweird.f32 %v833_v26 }
 0x248   :  { %3471 = vrcp.f32 %v852_v27  ;;  %v864_v12 = vand.u32 2147483648, %v852_v27  ;;  %v862_v16 = vand.u32 2147483647, %v852_v27  ;;  %vm858_vm12 = vweird.f32 %v852_v27 }
 0x249   :  { %v846_v21 = vor.u32 1.1754944e-38, %v845_v9  ;;  %vm844_vm15 = vcmp.eq.f32.partialorder %v843_v14, 8.507059e+37 }
 0x24a   :  { %v865_v24 = vor.u32 1.1754944e-38, %v864_v12  ;;  %vm863_vm0 = vcmp.eq.f32.partialorder %v862_v16, 8.507059e+37  ;;  %v6527_v16 = vld [vmem:[#allocation20_spill] sm:$0xff] }
 0x24b   :  { %v3468_v29 = vpop.eup %3467 }
 0x24c   :  { %v872_v33 = vadd.f32 1.0, %v3468_v29 }
 0x24d   :  { %v3470_v34 = vpop.eup %3469 }
 0x24e   :  { %v3472_v36 = vpop.eup %3471  ;;  %v835_v50 = vmul.f32 %v3470_v34, %v833_v26  ;;  %3473 = vrcp.f32 %v872_v33  ;;  %vm840_vm9 = vweird.f32 %v3470_v34  ;;  %vm878_vm2 = vweird.f32 %v872_v33 }
 0x24f   :  { %v854_v52 = vmul.f32 %v3472_v36, %v852_v27  ;;  %3475 = vtanh.f32 %v828_v35  ;;  %vm859_vm10 = vweird.f32 %v3472_v36  ;;  %vm841_vm13 = vmor %vm839_vm11, %vm840_vm9 }
 0x250   :  { %v836_v53 = vsub.f32 1.0, %v835_v50  ;;  %vm860_vm14 = vmor %vm858_vm12, %vm859_vm10 }
 0x251   :  { %v855_v57 = vsub.f32 1.0, %v854_v52 }
 0x252   :  { %v837_v13 = vmul.f32 %v3470_v34, %v836_v53 }
 0x253   :  { %v856_v15 = vmul.f32 %v3472_v36, %v855_v57  ;;  %v884_v57 = vand.u32 2147483648, %v872_v33 }
 0x254   :  { %v3474_v17 = vpop.eup %3473  ;;  %v838_v20 = vadd.f32 %v3470_v34, %v837_v13 }
 0x255   :  { %v857_v22 = vadd.f32 %v3472_v36, %v856_v15  ;;  %v874_v23 = vmul.f32 %v3474_v17, %v872_v33  ;;  %v3476_v28 = vpop.eup %3475  ;;  %vm879_vm1 = vweird.f32 %v3474_v17  ;;  %v885_v12 = vor.u32 1.1754944e-38, %v884_v57  ;;  %v6526_v15 = vld [vmem:[#allocation21_spill] sm:$0xff] }
 0x256   :  { %v842_v25 = vsel %vm841_vm13, %v3470_v34, %v838_v20  ;;  %v882_v34 = vand.u32 2147483647, %v872_v33  ;;  %vm880_vm3 = vmor %vm878_vm2, %vm879_vm1  ;;  %v6525_v33 = vld [vmem:[#allocation27_spill] sm:$0xff]  ;;  %v4893_v57 = vld [vmem:[#allocation4 + $0x40] sm:$0xff] }
 0x257   :  { %v847_v29 = vsel %vm844_vm15, %v846_v21, %v842_v25  ;;  %v861_v30 = vsel %vm860_vm14, %v3472_v36, %v857_v22  ;;  %v875_v31 = vsub.f32 1.0, %v874_v23  ;;  %v4845_v20 = vld [vmem:[#allocation4 + $0xf0] sm:$0xff]  ;;  %v4850_v21 = vld [vmem:[#allocation4 + $0xc8] sm:$0xff]  ;;  %v4856_v23 = vld [vmem:[#allocation4 + $0xd8] sm:$0xff]  ;;  %6541 = vst [vmem:[#allocation34_spill] sm:$0xff] %v4893_v57 }
 0x258   :  { %v866_v35 = vsel %vm863_vm0, %v865_v24, %v861_v30  ;;  %v889_v50 = vmul.f32 %v3476_v28, %v847_v29  ;;  %vm883_vm4 = vcmp.eq.f32.partialorder %v882_v34, 8.507059e+37  ;;  %v4853_v22 = vld [vmem:[#allocation4 + $0xd0] sm:$0xff]  ;;  %6529 = vst [vmem:[#allocation23_spill] sm:$0xff] %v4856_v23  ;;  %v4860_v24 = vld [vmem:[#allocation4 + $0xa8] sm:$0xff]  ;;  %v4866_v28 = vld [vmem:[#allocation4 + $0xb8] sm:$0xff] }
 0x259   :  { %v888_v52 = vmul.f32 %v866_v35, %v4646_v63  ;;  %v876_v53 = vmul.f32 %v3474_v17, %v875_v31  ;;  %v6524_v63 = vld [vmem:[#allocation19_spill] sm:$0xff]  ;;  %6528 = vst [vmem:[#allocation24_spill] sm:$0xff] %v4853_v22  ;;  %v4869_v29 = vld [vmem:[#allocation4 + $0x80] sm:$0xff]  ;;  %v4872_v30 = vld [vmem:[#allocation4 + $0x88] sm:$0xff] }
 0x25a   :  { %6530 = vst [vmem:[#allocation25_spill] sm:$0xff] %v4860_v24  ;;  %v4863_v25 = vld [vmem:[#allocation4 + $0xb0] sm:$0xff]  ;;  %v4878_v35 = vld [vmem:[#allocation4 + $0x98] sm:$0xff]  ;;  %v4896_v34 = vld [vmem:[#allocation4 + $0x48] sm:$0xff] }
 0x25b   :  { %v4800_v26 = vadd.f32 %v889_v50, %v888_v52  ;;  %v877_v27 = vadd.f32 %v3474_v17, %v876_v53  ;;  %6531 = vst [vmem:[#allocation37_spill] sm:$0xff] %v4863_v25  ;;  %v4875_v31 = vld [vmem:[#allocation4 + $0x90] sm:$0xff]  ;;  %v4881_v50 = vld [vmem:[#allocation4 + $0x60] sm:$0xff]  ;;  %v4884_v52 = vld [vmem:[#allocation4 + $0x68] sm:$0xff] }
 0x25c   :  { %6532 = vst [vmem:[#allocation28_spill] sm:$0xff] %v4866_v28  ;;  %v4887_v53 = vld [vmem:[#allocation4 + $0x70] sm:$0xff] }
 0x25d   :  { %3477 = vtanh.f32 %v4800_v26  ;;  %v881_v9 = vsel %vm880_vm3, %v3474_v17, %v877_v27  ;;  %v4839_v17 = vld [vmem:[#allocation4 + $0x110] sm:$0xff]  ;;  %6533 = vst [vmem:[#allocation26_spill] sm:$0xff] %v4869_v29  ;;  %v4890_v27 = vld [vmem:[#allocation4 + $0x78] sm:$0xff] }
 0x25e   :  { %v886_v13 = vsel %vm883_vm4, %v885_v12, %v881_v9  ;;  %6534 = vst [vmem:[#allocation30_spill] sm:$0xff] %v4872_v30  ;;  %v4899_v9 = vld [vmem:[#allocation4 + $0x50] sm:$0xff]  ;;  %v4902_v12 = vld [vmem:[#allocation4 + $0x58] sm:$0xff] }
 0x25f   :  { %6535 = vst [vmem:[#allocation38_spill] sm:$0xff] %v4875_v31 }
 0x260   :  { %6536 = vst [vmem:[#allocation32_spill] sm:$0xff] %v4878_v35 }
 0x261   :  { %6537 = vst [vmem:[#allocation31_spill] sm:$0xff] %v4881_v50 }
 0x262   :  { %6538 = vst [vmem:[#allocation33_spill] sm:$0xff] %v4884_v52 }
 0x263   :  { %v3478_v36 = vpop.eup %3477  ;;  %6539 = vst [vmem:[#allocation40_spill] sm:$0xff] %v4887_v53 }
 0x264   :  { %v4803_v14 = vmul.f32 %v3478_v36, %v886_v13  ;;  %6540 = vst [vmem:[#allocation36_spill] sm:$0xff] %v4890_v27  ;;  %v4905_v36 = vld [vmem:[#allocation4 + $0x20] sm:$0xff]  ;;  %v4908_v13 = vld [vmem:[#allocation4 + $0x28] sm:$0xff] }
 0x265   :  { %6542 = vst [vmem:[#allocation35_spill] sm:$0xff] %v4896_v34 }
 0x266   :  { %6523 = vst [vmem:[#allocation29_spill] sm:$0xff] %v4803_v14  ;;  %918 = vmatmul.f32.vlgmr.msra.gmra.mxu0 %v4803_v14  ;;  %938 = vmatmul.f32.vlgmr.msra.gmra.mxu1 %v4803_v14 }
 0x267   :  { %958 = vmatmul.f32.vlgmr.msrb.gmra.mxu2 %v4803_v14  ;;  %978 = vmatmul.f32.vlgmr.msrb.gmra.mxu3 %v4803_v14  ;;  %6543 = vst [vmem:[#allocation41_spill] sm:$0xff] %v4899_v9  ;;  %v4911_v14 = vld [vmem:[#allocation4 + $0x30] sm:$0xff] }
 0x268   :  { %1214 = vmatpush.msra.mxu0 %v4655_v56  ;;  %1234 = vmatpush.msra.mxu1 %v4658_v62  ;;  %6544 = vst [vmem:[#allocation39_spill] sm:$0xff] %v4902_v12 }
 0x269   :  { %1254 = vmatpush.msrb.mxu2 %v4661_v41  ;;  %1274 = vmatpush.msrb.mxu3 %v4664_v42  ;;  %6545 = vst [vmem:[#allocation44_spill] sm:$0xff] %v4905_v36 }
 0x26a   :  { %1215 = vmatpush.msra.mxu0 %v4667_v43  ;;  %1235 = vmatpush.msra.mxu1 %v4670_v44  ;;  %6546 = vst [vmem:[#allocation45_spill] sm:$0xff] %v4908_v13 }
 0x26b   :  { %1255 = vmatpush.msrb.mxu2 %v4673_v46  ;;  %1275 = vmatpush.msrb.mxu3 %v4676_v47  ;;  %6547 = vst [vmem:[#allocation53_spill] sm:$0xff] %v4911_v14 }
 0x26c   :  { %1216 = vmatpush.msra.mxu0 %v4679_v48  ;;  %1236 = vmatpush.msra.mxu1 %v4682_v11 }
 0x26d   :  { %1256 = vmatpush.msrb.mxu2 %v4685_v60  ;;  %1276 = vmatpush.msrb.mxu3 %v4688_v0 }
 0x26e   :  { %1217 = vmatpush.msra.mxu0 %v4691_v18  ;;  %1237 = vmatpush.msra.mxu1 %v4694_v61 }
 0x26f   :  { %1257 = vmatpush.msrb.mxu2 %v4697_v58  ;;  %1277 = vmatpush.msrb.mxu3 %v4700_v6 }
 0x270   :  { %1218 = vmatpush.msra.mxu0 %v4703_v10  ;;  %1238 = vmatpush.msra.mxu1 %v4706_v5 }
 0x271   :  { %1258 = vmatpush.msrb.mxu2 %v4709_v19  ;;  %1278 = vmatpush.msrb.mxu3 %v4712_v54 }
 0x272   :  { %1219 = vmatpush.msra.mxu0 %v4715_v51  ;;  %1239 = vmatpush.msra.mxu1 %v4718_v2 }
 0x273   :  { %1259 = vmatpush.msrb.mxu2 %v4721_v55  ;;  %1279 = vmatpush.msrb.mxu3 %v4724_v3 }
 0x274   :  { %1220 = vmatpush.msra.mxu0 %v4727_v1  ;;  %1240 = vmatpush.msra.mxu1 %v6524_v63 }
 0x275   :  { %1260 = vmatpush.msrb.mxu2 %v6525_v33  ;;  %1280 = vmatpush.msrb.mxu3 %v4736_v4 }
 0x276   :  { %1221 = vmatpush.msra.mxu0 %v6526_v15  ;;  %1241 = vmatpush.msra.mxu1 %v6527_v16 }
 0x277   :  { %1261 = vmatpush.msrb.mxu2 %v4839_v17  ;;  %1281 = vmatpush.msrb.mxu3 %v4746_v45 }
 0x278   :  { %1222 = vmatpush.msra.mxu0 %v4749_v32  ;;  %1242 = vmatpush.msra.mxu1 %v4752_v8 }
 0x279   :  { %1262 = vmatpush.msrb.mxu2 %v4845_v20  ;;  %1282 = vmatpush.msrb.mxu3 %v4756_v38 }
 0x27a   :  { %1223 = vmatpush.msra.mxu0 %v4759_v39  ;;  %1243 = vmatpush.msra.mxu1 %v4850_v21 }
 0x27b   :  { %1263 = vmatpush.msrb.mxu2 %v4853_v22  ;;  %1283 = vmatpush.msrb.mxu3 %v4856_v23 }
 0x27c   :  { %1224 = vmatpush.msra.mxu0 %v4765_v49  ;;  %1244 = vmatpush.msra.mxu1 %v4860_v24 }
 0x27d   :  { %1264 = vmatpush.msrb.mxu2 %v4863_v25  ;;  %1284 = vmatpush.msrb.mxu3 %v4866_v28 }
 0x27e   :  { %1225 = vmatpush.msra.mxu0 %v4869_v29  ;;  %1245 = vmatpush.msra.mxu1 %v4872_v30 }
 0x27f   :  { %1265 = vmatpush.msrb.mxu2 %v4875_v31  ;;  %1285 = vmatpush.msrb.mxu3 %v4878_v35  ;;  %v6555_v31 = vld [vmem:[#allocation61_spill] sm:$0xff] }
 0x280   :  { %1226 = vmatpush.msra.mxu0 %v4881_v50  ;;  %1246 = vmatpush.msra.mxu1 %v4884_v52 }
 0x281   :  { %1266 = vmatpush.msrb.mxu2 %v4887_v53  ;;  %1286 = vmatpush.msrb.mxu3 %v4890_v27 }
 0x282   :  { %1227 = vmatpush.msra.mxu0 %v4893_v57  ;;  %1247 = vmatpush.msra.mxu1 %v4896_v34  ;;  %v4914_v34 = vld [vmem:[#allocation4 + $0x38] sm:$0xff] }
 0x283   :  { %1267 = vmatpush.msrb.mxu2 %v4899_v9  ;;  %1287 = vmatpush.msrb.mxu3 %v4902_v12  ;;  %6548 = vst [vmem:[#allocation52_spill] sm:$0xff] %v4914_v34  ;;  %v4917_v9 = vld [vmem:[#allocation4] sm:$0xff]  ;;  %v4920_v12 = vld [vmem:[#allocation4 + $0x8] sm:$0xff] }
 0x284   :  { %1228 = vmatpush.msra.mxu0 %v4905_v36  ;;  %1248 = vmatpush.msra.mxu1 %v4908_v13  ;;  %6549 = vst [vmem:[#allocation48_spill] sm:$0xff] %v4917_v9  ;;  %v4923_v36 = vld [vmem:[#allocation4 + $0x10] sm:$0xff]  ;;  %v4926_v13 = vld [vmem:[#allocation4 + $0x18] sm:$0xff] }
 0x285   :  { %1268 = vmatpush.msrb.mxu2 %v4911_v14  ;;  %1288 = vmatpush.msrb.mxu3 %v4914_v34  ;;  %6550 = vst [vmem:[#allocation49_spill] sm:$0xff] %v4920_v12  ;;  %v6553_v14 = vld [vmem:[#allocation50_spill] sm:$0xff]  ;;  %v6554_v34 = vld [vmem:[#allocation51_spill] sm:$0xff] }
 0x286   :  { %1229 = vmatpush.msra.mxu0 %v4917_v9  ;;  %1249 = vmatpush.msra.mxu1 %v4920_v12  ;;  %6551 = vst [vmem:[#allocation57_spill] sm:$0xff] %v4923_v36  ;;  %v195_v57 = vadd.f32 %v6553_v14, %v6506_v37  ;;  %v236_v27 = vadd.f32 %v6554_v34, %v6508_v40 }
 0x287   :  { %1269 = vmatpush.msrb.mxu2 %v4923_v36  ;;  %6552 = vst [vmem:[#allocation56_spill] sm:$0xff] %v4926_v13  ;;  %1289 = vmatpush.msrb.mxu3 %v4926_v13  ;;  %v318_v36 = vadd.f32 %v6555_v31, %v6510_v59 }
 0x2e3   :  { %v919_v53 = vpop.f32.mrf.mxu0  ;;  %v939_v9 = vpop.f32.mrf.mxu1 }
 0x2e4   :  { %v982_v52 = vadd.f32 %v919_v53, %v195_v57  ;;  %v983_v50 = vadd.f32 %v939_v9, %v236_v27 }
 0x2e6   :  { %v3375_v35 = vmul.f32 -1.442695, %v982_v52  ;;  %v3376_v12 = vmul.f32 -1.442695, %v983_v50  ;;  %v6556_v52 = vld [vmem:[#allocation60_spill] sm:$0xff] }
 0x2e7   :  { %v277_v50 = vadd.f32 %v6556_v52, %v4560_v7 }
 0x2e8   :  { %3479 = vpow2.f32 %v3375_v35 }
 0x2e9   :  { %3481 = vpow2.f32 %v3376_v12 }
 0x2ea   :  { %v979_v30 = vpop.f32.mrf.mxu3  ;;  %v959_v34 = vpop.f32.mrf.mxu2 }
 0x2eb   :  { %v985_v29 = vadd.f32 %v979_v30, %v318_v36  ;;  %v984_v57 = vadd.f32 %v959_v34, %v277_v50 }
 0x2ed   :  { %v3377_v13 = vmul.f32 -1.442695, %v985_v29 }
 0x2ee   :  { %v3480_v28 = vpop.eup %3479 }
 0x2ef   :  { %v3482_v25 = vpop.eup %3481  ;;  %v989_v14 = vadd.f32 1.0, %v3480_v28  ;;  %3483 = vpow2.f32 %v3377_v13 }
 0x2f0   :  { %v1008_v37 = vadd.f32 1.0, %v3482_v25 }
 0x2f1   :  { %3485 = vrcp.f32 %v989_v14  ;;  %v1001_v36 = vand.u32 2147483648, %v989_v14  ;;  %v999_v13 = vand.u32 2147483647, %v989_v14  ;;  %vm995_vm7 = vweird.f32 %v989_v14 }
 0x2f2   :  { %3487 = vrcp.f32 %v1008_v37  ;;  %v1020_v28 = vand.u32 2147483648, %v1008_v37  ;;  %v1018_v40 = vand.u32 2147483647, %v1008_v37  ;;  %vm1014_vm8 = vweird.f32 %v1008_v37 }
 0x2f3   :  { %v1002_v34 = vor.u32 1.1754944e-38, %v1001_v36  ;;  %vm1000_vm11 = vcmp.eq.f32.partialorder %v999_v13, 8.507059e+37 }
 0x2f4   :  { %vm1019_vm12 = vcmp.eq.f32.partialorder %v1018_v40, 8.507059e+37 }
 0x2f5   :  { %v3484_v53 = vpop.eup %3483 }
 0x2f6   :  { %v1028_v35 = vadd.f32 1.0, %v3484_v53 }
 0x2f7   :  { %v3486_v27 = vpop.eup %3485 }
 0x2f8   :  { %v3488_v31 = vpop.eup %3487  ;;  %v991_v9 = vmul.f32 %v3486_v27, %v989_v14  ;;  %3489 = vrcp.f32 %v1028_v35  ;;  %vm996_vm5 = vweird.f32 %v3486_v27  ;;  %vm1034_vm14 = vweird.f32 %v1028_v35 }
 0x2f9   :  { %v1010_v30 = vmul.f32 %v3488_v31, %v1008_v37  ;;  %3491 = vtanh.f32 %v984_v57  ;;  %vm1015_vm6 = vweird.f32 %v3488_v31  ;;  %vm997_vm9 = vmor %vm995_vm7, %vm996_vm5 }
 0x2fa   :  { %v992_v29 = vsub.f32 1.0, %v991_v9  ;;  %vm1016_vm10 = vmor %vm1014_vm8, %vm1015_vm6  ;;  %v1021_v9 = vor.u32 1.1754944e-38, %v1020_v28 }
 0x2fb   :  { %v1011_v12 = vsub.f32 1.0, %v1010_v30 }
 0x2fc   :  { %v993_v25 = vmul.f32 %v3486_v27, %v992_v29 }
 0x2fd   :  { %v1012_v59 = vmul.f32 %v3488_v31, %v1011_v12 }
 0x2fe   :  { %v3490_v24 = vpop.eup %3489  ;;  %v994_v52 = vadd.f32 %v3486_v27, %v993_v25 }
 0x2ff   :  { %v1013_v53 = vadd.f32 %v3488_v31, %v1012_v59  ;;  %v1030_v50 = vmul.f32 %v3490_v24, %v1028_v35  ;;  %v3492_v57 = vpop.eup %3491  ;;  %vm1035_vm13 = vweird.f32 %v3490_v24  ;;  %v1040_v59 = vand.u32 2147483648, %v1028_v35 }
 0x300   :  { %v998_v30 = vsel %vm997_vm9, %v3486_v27, %v994_v52  ;;  %v1038_v27 = vand.u32 2147483647, %v1028_v35  ;;  %vm1036_vm15 = vmor %vm1034_vm14, %vm1035_vm13  ;;  %v6564_v35 = vld [vmem:[#allocation26_spill] sm:$0xff] }
 0x301   :  { %v1003_v7 = vsel %vm1000_vm11, %v1002_v34, %v998_v30  ;;  %v1017_v29 = vsel %vm1016_vm10, %v3488_v31, %v1013_v53  ;;  %v1031_v49 = vsub.f32 1.0, %v1030_v50  ;;  %v1041_v28 = vor.u32 1.1754944e-38, %v1040_v59  ;;  %v6565_v52 = vld [vmem:[#allocation30_spill] sm:$0xff]  ;;  %v6567_v53 = vld [vmem:[#allocation32_spill] sm:$0xff]  ;;  %v6568_v50 = vld [vmem:[#allocation31_spill] sm:$0xff] }
 0x302   :  { %v1022_v12 = vsel %vm1019_vm12, %v1021_v9, %v1017_v29  ;;  %v1045_v23 = vmul.f32 %v3492_v57, %v1003_v7  ;;  %vm1039_vm0 = vcmp.eq.f32.partialorder %v1038_v27, 8.507059e+37  ;;  %v6558_v7 = vld [vmem:[#allocation24_spill] sm:$0xff]  ;;  %v6566_v34 = vld [vmem:[#allocation38_spill] sm:$0xff]  ;;  %v6569_v9 = vld [vmem:[#allocation33_spill] sm:$0xff] }
 0x303   :  { %v1044_v22 = vmul.f32 %v1022_v12, %v4800_v26  ;;  %v1032_v25 = vmul.f32 %v3490_v24, %v1031_v49  ;;  %v6559_v49 = vld [vmem:[#allocation23_spill] sm:$0xff]  ;;  %v6560_v26 = vld [vmem:[#allocation22_spill] sm:$0xff]  ;;  %v6570_v30 = vld [vmem:[#allocation40_spill] sm:$0xff] }
 0x304   :  { %v6571_v57 = vld [vmem:[#allocation36_spill] sm:$0xff]  ;;  %v6572_v29 = vld [vmem:[#allocation34_spill] sm:$0xff]  ;;  %v6573_v12 = vld [vmem:[#allocation35_spill] sm:$0xff] }
 0x305   :  { %v4938_v14 = vadd.f32 %v1045_v23, %v1044_v22  ;;  %v1033_v37 = vadd.f32 %v3490_v24, %v1032_v25  ;;  %v6561_v22 = vld [vmem:[#allocation25_spill] sm:$0xff]  ;;  %v6576_v59 = vld [vmem:[#allocation44_spill] sm:$0xff] }
 0x306   :  { %v6562_v23 = vld [vmem:[#allocation37_spill] sm:$0xff] }
 0x307   :  { %3493 = vtanh.f32 %v4938_v14  ;;  %v1037_v36 = vsel %vm1036_vm15, %v3490_v24, %v1033_v37  ;;  %v6563_v24 = vld [vmem:[#allocation28_spill] sm:$0xff]  ;;  %v6574_v25 = vld [vmem:[#allocation41_spill] sm:$0xff]  ;;  %v6575_v37 = vld [vmem:[#allocation39_spill] sm:$0xff] }
 0x308   :  { %v1042_v31 = vsel %vm1039_vm0, %v1041_v28, %v1037_v36  ;;  %v6577_v27 = vld [vmem:[#allocation45_spill] sm:$0xff]  ;;  %v6579_v28 = vld [vmem:[#allocation52_spill] sm:$0xff] }
 0x309   :  { %v6578_v36 = vld [vmem:[#allocation53_spill] sm:$0xff] }
 0x30d   :  { %v3494_v40 = vpop.eup %3493 }
 0x30e   :  { %v4941_v13 = vmul.f32 %v3494_v40, %v1042_v31  ;;  %v6580_v40 = vld [vmem:[#allocation48_spill] sm:$0xff]  ;;  %v6581_v31 = vld [vmem:[#allocation49_spill] sm:$0xff] }
 0x310   :  { %6557 = vst [vmem:[#allocation19_spill] sm:$0xff] %v4941_v13  ;;  %1074 = vmatmul.f32.vlgmr.msrb.gmra.mxu0 %v4941_v13  ;;  %1094 = vmatmul.f32.vlgmr.msrb.gmra.mxu1 %v4941_v13 }
 0x311   :  { %1114 = vmatmul.f32.vlgmr.msra.gmra.mxu2 %v4941_v13  ;;  %1134 = vmatmul.f32.vlgmr.msra.gmra.mxu3 %v4941_v13  ;;  %v6582_v13 = vld [vmem:[#allocation57_spill] sm:$0xff] }
 0x312   :  { %1370 = vmatpush.msrb.mxu0 %v4655_v56  ;;  %1390 = vmatpush.msrb.mxu1 %v4658_v62 }
 0x313   :  { %1410 = vmatpush.msra.mxu2 %v4661_v41  ;;  %1430 = vmatpush.msra.mxu3 %v4664_v42 }
 0x314   :  { %1371 = vmatpush.msrb.mxu0 %v4667_v43  ;;  %1391 = vmatpush.msrb.mxu1 %v4670_v44 }
 0x315   :  { %1411 = vmatpush.msra.mxu2 %v4673_v46  ;;  %1431 = vmatpush.msra.mxu3 %v4676_v47 }
 0x316   :  { %1372 = vmatpush.msrb.mxu0 %v4679_v48  ;;  %1392 = vmatpush.msrb.mxu1 %v4682_v11 }
 0x317   :  { %1412 = vmatpush.msra.mxu2 %v4685_v60  ;;  %1432 = vmatpush.msra.mxu3 %v4688_v0 }
 0x318   :  { %1373 = vmatpush.msrb.mxu0 %v4691_v18  ;;  %1393 = vmatpush.msrb.mxu1 %v4694_v61 }
 0x319   :  { %1413 = vmatpush.msra.mxu2 %v4697_v58  ;;  %1433 = vmatpush.msra.mxu3 %v4700_v6 }
 0x31a   :  { %1374 = vmatpush.msrb.mxu0 %v4703_v10  ;;  %1394 = vmatpush.msrb.mxu1 %v4706_v5 }
 0x31b   :  { %1414 = vmatpush.msra.mxu2 %v4709_v19  ;;  %1434 = vmatpush.msra.mxu3 %v4712_v54 }
 0x31c   :  { %1375 = vmatpush.msrb.mxu0 %v4715_v51  ;;  %1395 = vmatpush.msrb.mxu1 %v4718_v2 }
 0x31d   :  { %1415 = vmatpush.msra.mxu2 %v4721_v55  ;;  %1435 = vmatpush.msra.mxu3 %v4724_v3 }
 0x31e   :  { %1376 = vmatpush.msrb.mxu0 %v4727_v1  ;;  %1396 = vmatpush.msrb.mxu1 %v6524_v63 }
 0x31f   :  { %1416 = vmatpush.msra.mxu2 %v6525_v33  ;;  %1436 = vmatpush.msra.mxu3 %v4736_v4 }
 0x320   :  { %1377 = vmatpush.msrb.mxu0 %v6526_v15  ;;  %1397 = vmatpush.msrb.mxu1 %v6527_v16 }
 0x321   :  { %1417 = vmatpush.msra.mxu2 %v4839_v17  ;;  %1437 = vmatpush.msra.mxu3 %v4746_v45 }
 0x322   :  { %1378 = vmatpush.msrb.mxu0 %v4749_v32  ;;  %1398 = vmatpush.msrb.mxu1 %v4752_v8 }
 0x323   :  { %1418 = vmatpush.msra.mxu2 %v4845_v20  ;;  %1438 = vmatpush.msra.mxu3 %v4756_v38 }
 0x324   :  { %1379 = vmatpush.msrb.mxu0 %v4759_v39  ;;  %1399 = vmatpush.msrb.mxu1 %v4850_v21 }
 0x325   :  { %1419 = vmatpush.msra.mxu2 %v6558_v7  ;;  %1439 = vmatpush.msra.mxu3 %v6559_v49 }
 0x326   :  { %1380 = vmatpush.msrb.mxu0 %v6560_v26  ;;  %1400 = vmatpush.msrb.mxu1 %v6561_v22 }
 0x327   :  { %1420 = vmatpush.msra.mxu2 %v6562_v23  ;;  %1440 = vmatpush.msra.mxu3 %v6563_v24 }
 0x328   :  { %1381 = vmatpush.msrb.mxu0 %v6564_v35  ;;  %1401 = vmatpush.msrb.mxu1 %v6565_v52 }
 0x329   :  { %1421 = vmatpush.msra.mxu2 %v6566_v34  ;;  %1441 = vmatpush.msra.mxu3 %v6567_v53  ;;  %v6589_v34 = vld [vmem:[#allocation65_spill] sm:$0xff] }
 0x32a   :  { %1382 = vmatpush.msrb.mxu0 %v6568_v50  ;;  %1402 = vmatpush.msrb.mxu1 %v6569_v9 }
 0x32b   :  { %1422 = vmatpush.msra.mxu2 %v6570_v30  ;;  %1442 = vmatpush.msra.mxu3 %v6571_v57  ;;  %v6587_v30 = vld [vmem:[#allocation55_spill] sm:$0xff] }
 0x32c   :  { %1383 = vmatpush.msrb.mxu0 %v6572_v29  ;;  %1403 = vmatpush.msrb.mxu1 %v6573_v12  ;;  %v6583_v29 = vld [vmem:[#allocation56_spill] sm:$0xff]  ;;  %v6584_v12 = vld [vmem:[#allocation62_spill] sm:$0xff] }
 0x32d   :  { %1423 = vmatpush.msra.mxu2 %v6574_v25  ;;  %1443 = vmatpush.msra.mxu3 %v6575_v37  ;;  %v6585_v25 = vld [vmem:[#allocation54_spill] sm:$0xff]  ;;  %v6586_v37 = vld [vmem:[#allocation63_spill] sm:$0xff] }
 0x32e   :  { %1384 = vmatpush.msrb.mxu0 %v6576_v59  ;;  %1404 = vmatpush.msrb.mxu1 %v6577_v27  ;;  %v198_v57 = vadd.f32 %v6585_v25, %v6584_v12  ;;  %v239_v59 = vadd.f32 %v6587_v30, %v6586_v37 }
 0x32f   :  { %1424 = vmatpush.msra.mxu2 %v6578_v36  ;;  %1444 = vmatpush.msra.mxu3 %v6579_v28 }
 0x330   :  { %1385 = vmatpush.msrb.mxu0 %v6580_v40  ;;  %1405 = vmatpush.msrb.mxu1 %v6581_v31  ;;  %v6588_v40 = vld [vmem:[#allocation72_spill] sm:$0xff] }
 0x331   :  { %1425 = vmatpush.msra.mxu2 %v6582_v13  ;;  %1445 = vmatpush.msra.mxu3 %v6583_v29  ;;  %v321_v31 = vadd.f32 %v6589_v34, %v6588_v40 }
 0x38d   :  { %v1075_v9 = vpop.f32.mrf.mxu0  ;;  %v1095_v27 = vpop.f32.mrf.mxu1 }
 0x38e   :  { %v1138_v50 = vadd.f32 %v1075_v9, %v198_v57  ;;  %v1139_v36 = vadd.f32 %v1095_v27, %v239_v59  ;;  %v6590_v57 = vld [vmem:[#allocation73_spill] sm:$0xff] }
 0x390   :  { %v3378_v53 = vmul.f32 -1.442695, %v1138_v50  ;;  %v3379_v28 = vmul.f32 -1.442695, %v1139_v36  ;;  %v6591_v50 = vld [vmem:[#allocation64_spill] sm:$0xff] }
 0x391   :  { %v280_v59 = vadd.f32 %v6591_v50, %v6590_v57 }
 0x392   :  { %3495 = vpow2.f32 %v3378_v53 }
 0x393   :  { %3497 = vpow2.f32 %v3379_v28 }
 0x394   :  { %v1135_v13 = vpop.f32.mrf.mxu3  ;;  %v1115_v30 = vpop.f32.mrf.mxu2 }
 0x395   :  { %v1141_v52 = vadd.f32 %v1135_v13, %v321_v31  ;;  %v1140_v36 = vadd.f32 %v1115_v30, %v280_v59 }
 0x397   :  { %v3380_v29 = vmul.f32 -1.442695, %v1141_v52 }
 0x398   :  { %v3496_v35 = vpop.eup %3495 }
 0x399   :  { %v3498_v24 = vpop.eup %3497  ;;  %v1145_v25 = vadd.f32 1.0, %v3496_v35  ;;  %3499 = vpow2.f32 %v3380_v29 }
 0x39a   :  { %v1164_v12 = vadd.f32 1.0, %v3498_v24 }
 0x39b   :  { %3501 = vrcp.f32 %v1145_v25  ;;  %v1157_v40 = vand.u32 2147483648, %v1145_v25  ;;  %v1155_v29 = vand.u32 2147483647, %v1145_v25  ;;  %vm1151_vm3 = vweird.f32 %v1145_v25 }
 0x39c   :  { %3503 = vrcp.f32 %v1164_v12  ;;  %v1176_v35 = vand.u32 2147483648, %v1164_v12  ;;  %v1174_v23 = vand.u32 2147483647, %v1164_v12  ;;  %vm1170_vm4 = vweird.f32 %v1164_v12 }
 0x39d   :  { %v1158_v30 = vor.u32 1.1754944e-38, %v1157_v40  ;;  %vm1156_vm7 = vcmp.eq.f32.partialorder %v1155_v29, 8.507059e+37 }
 0x39e   :  { %vm1175_vm8 = vcmp.eq.f32.partialorder %v1174_v23, 8.507059e+37 }
 0x39f   :  { %v3500_v9 = vpop.eup %3499 }
 0x3a0   :  { %v1184_v53 = vadd.f32 1.0, %v3500_v9 }
 0x3a1   :  { %v3502_v27 = vpop.eup %3501 }
 0x3a2   :  { %v3504_v34 = vpop.eup %3503  ;;  %v1147_v28 = vmul.f32 %v3502_v27, %v1145_v25  ;;  %3505 = vrcp.f32 %v1184_v53  ;;  %vm1152_vm1 = vweird.f32 %v3502_v27  ;;  %vm1190_vm10 = vweird.f32 %v1184_v53 }
 0x3a3   :  { %v1166_v13 = vmul.f32 %v3504_v34, %v1164_v12  ;;  %3507 = vtanh.f32 %v1140_v36  ;;  %vm1171_vm2 = vweird.f32 %v3504_v34  ;;  %vm1153_vm5 = vmor %vm1151_vm3, %vm1152_vm1  ;;  %v1194_v40 = vand.u32 2147483647, %v1184_v53 }
 0x3a4   :  { %v1148_v52 = vsub.f32 1.0, %v1147_v28  ;;  %vm1172_vm6 = vmor %vm1170_vm4, %vm1171_vm2  ;;  %v1177_v28 = vor.u32 1.1754944e-38, %v1176_v35 }
 0x3a5   :  { %v1167_v31 = vsub.f32 1.0, %v1166_v13  ;;  %vm1195_vm12 = vcmp.eq.f32.partialorder %v1194_v40, 8.507059e+37 }
 0x3a6   :  { %v1149_v24 = vmul.f32 %v3502_v27, %v1148_v52 }
 0x3a7   :  { %v1168_v37 = vmul.f32 %v3504_v34, %v1167_v31 }
 0x3a8   :  { %v3506_v22 = vpop.eup %3505  ;;  %v1150_v50 = vadd.f32 %v3502_v27, %v1149_v24 }
 0x3a9   :  { %v1169_v9 = vadd.f32 %v3504_v34, %v1168_v37  ;;  %v1186_v59 = vmul.f32 %v3506_v22, %v1184_v53  ;;  %v3508_v36 = vpop.eup %3507  ;;  %vm1191_vm9 = vweird.f32 %v3506_v22  ;;  %v1196_v37 = vand.u32 2147483648, %v1184_v53 }
 0x3aa   :  { %v1154_v13 = vsel %vm1153_vm5, %v3502_v27, %v1150_v50  ;;  %vm1192_vm11 = vmor %vm1190_vm10, %vm1191_vm9 }
 0x3ab   :  { %v1159_v57 = vsel %vm1156_vm7, %v1158_v30, %v1154_v13  ;;  %v1173_v52 = vsel %vm1172_vm6, %v3504_v34, %v1169_v9  ;;  %v1187_v26 = vsub.f32 1.0, %v1186_v59  ;;  %v1197_v35 = vor.u32 1.1754944e-38, %v1196_v37  ;;  %v6624_v13 = vld [vmem:[#allocation73_spill] sm:$0xff] }
 0x3ac   :  { %v1178_v31 = vsel %vm1175_vm8, %v1177_v28, %v1173_v52  ;;  %v1201_v49 = vmul.f32 %v3508_v36, %v1159_v57  ;;  %v6625_v36 = vld [vmem:[#allocation66_spill] sm:$0xff] }
 0x3ad   :  { %v1200_v7 = vmul.f32 %v1178_v31, %v4938_v14  ;;  %v1188_v24 = vmul.f32 %v3506_v22, %v1187_v26  ;;  %v6622_v14 = vld [vmem:[#allocation72_spill] sm:$0xff]  ;;  %v283_v52 = vadd.f32 %v6625_v36, %v6624_v13  ;;  %v6626_v36 = vld [vmem:[#allocation42_spill] sm:$0xff] }
 0x3af   :  { %v5020_v25 = vadd.f32 %v1201_v49, %v1200_v7  ;;  %v1189_v12 = vadd.f32 %v3506_v22, %v1188_v24  ;;  %v6623_v7 = vld [vmem:[#allocation67_spill] sm:$0xff] }
 0x3b0   :  { %v324_v49 = vadd.f32 %v6623_v7, %v6622_v14  ;;  %v1735_v7 = vld [vmem:[#allocation7 + $0x1a0] sm:$0xff] }
 0x3b1   :  { %3509 = vtanh.f32 %v5020_v25  ;;  %v1193_v27 = vsel %vm1192_vm11, %v3506_v22, %v1189_v12 }
 0x3b2   :  { %v1198_v34 = vsel %vm1195_vm12, %v1197_v35, %v1193_v27 }
 0x3b7   :  { %v3510_v23 = vpop.eup %3509 }
 0x3b8   :  { %v5023_v29 = vmul.f32 %v3510_v23, %v1198_v34 }
 0x3ba   :  { %1230 = vmatmul.f32.vlgmr.msra.gmra.mxu0 %v5023_v29  ;;  %1250 = vmatmul.f32.vlgmr.msra.gmra.mxu1 %v5023_v29 }
 0x3bb   :  { %1270 = vmatmul.f32.vlgmr.msrb.gmra.mxu2 %v5023_v29  ;;  %1290 = vmatmul.f32.vlgmr.msrb.gmra.mxu3 %v5023_v29 }
 0x3bc   :  { %1526 = vmatpush.msra.mxu0 %v4655_v56  ;;  %1546 = vmatpush.msra.mxu1 %v4658_v62  ;;  %v6592_v56 = vld [vmem:[#allocation24_spill] sm:$0xff]  ;;  %v6593_v62 = vld [vmem:[#allocation23_spill] sm:$0xff] }
 0x3bd   :  { %1566 = vmatpush.msrb.mxu2 %v4661_v41  ;;  %1586 = vmatpush.msrb.mxu3 %v4664_v42  ;;  %v6594_v41 = vld [vmem:[#allocation22_spill] sm:$0xff]  ;;  %v6595_v42 = vld [vmem:[#allocation25_spill] sm:$0xff] }
 0x3be   :  { %1527 = vmatpush.msra.mxu0 %v4667_v43  ;;  %1547 = vmatpush.msra.mxu1 %v4670_v44  ;;  %v6597_v43 = vld [vmem:[#allocation28_spill] sm:$0xff]  ;;  %v6598_v44 = vld [vmem:[#allocation26_spill] sm:$0xff] }
 0x3bf   :  { %1567 = vmatpush.msrb.mxu2 %v4673_v46  ;;  %1587 = vmatpush.msrb.mxu3 %v4676_v47  ;;  %v6599_v46 = vld [vmem:[#allocation30_spill] sm:$0xff] }
 0x3c0   :  { %1528 = vmatpush.msra.mxu0 %v4679_v48  ;;  %1548 = vmatpush.msra.mxu1 %v4682_v11  ;;  %v6600_v47 = vld [vmem:[#allocation38_spill] sm:$0xff]  ;;  %v6602_v48 = vld [vmem:[#allocation31_spill] sm:$0xff]  ;;  %v6603_v11 = vld [vmem:[#allocation33_spill] sm:$0xff] }
 0x3c1   :  { %1568 = vmatpush.msrb.mxu2 %v4685_v60  ;;  %1588 = vmatpush.msrb.mxu3 %v4688_v0  ;;  %v6604_v60 = vld [vmem:[#allocation40_spill] sm:$0xff] }
 0x3c2   :  { %1529 = vmatpush.msra.mxu0 %v4691_v18  ;;  %1549 = vmatpush.msra.mxu1 %v4694_v61  ;;  %v6605_v0 = vld [vmem:[#allocation36_spill] sm:$0xff]  ;;  %v6606_v18 = vld [vmem:[#allocation34_spill] sm:$0xff]  ;;  %v6607_v61 = vld [vmem:[#allocation35_spill] sm:$0xff] }
 0x3c3   :  { %1569 = vmatpush.msrb.mxu2 %v4697_v58  ;;  %1589 = vmatpush.msrb.mxu3 %v4700_v6  ;;  %v6608_v58 = vld [vmem:[#allocation41_spill] sm:$0xff]  ;;  %v6609_v6 = vld [vmem:[#allocation39_spill] sm:$0xff] }
 0x3c4   :  { %1530 = vmatpush.msra.mxu0 %v4703_v10  ;;  %1550 = vmatpush.msra.mxu1 %v4706_v5  ;;  %v6610_v10 = vld [vmem:[#allocation44_spill] sm:$0xff]  ;;  %v6611_v5 = vld [vmem:[#allocation45_spill] sm:$0xff] }
 0x3c5   :  { %1570 = vmatpush.msrb.mxu2 %v4709_v19  ;;  %1590 = vmatpush.msrb.mxu3 %v4712_v54  ;;  %v6612_v19 = vld [vmem:[#allocation53_spill] sm:$0xff]  ;;  %v6613_v54 = vld [vmem:[#allocation52_spill] sm:$0xff] }
 0x3c6   :  { %1531 = vmatpush.msra.mxu0 %v4715_v51  ;;  %1551 = vmatpush.msra.mxu1 %v4718_v2  ;;  %v6614_v51 = vld [vmem:[#allocation48_spill] sm:$0xff]  ;;  %v6615_v2 = vld [vmem:[#allocation49_spill] sm:$0xff] }
 0x3c7   :  { %1571 = vmatpush.msrb.mxu2 %v4721_v55  ;;  %1591 = vmatpush.msrb.mxu3 %v4724_v3  ;;  %v6616_v55 = vld [vmem:[#allocation57_spill] sm:$0xff]  ;;  %v6617_v3 = vld [vmem:[#allocation56_spill] sm:$0xff] }
 0x3c8   :  { %1532 = vmatpush.msra.mxu0 %v4727_v1  ;;  %1552 = vmatpush.msra.mxu1 %v6524_v63  ;;  %v6618_v1 = vld [vmem:[#allocation62_spill] sm:$0xff] }
 0x3c9   :  { %1572 = vmatpush.msrb.mxu2 %v6525_v33  ;;  %1592 = vmatpush.msrb.mxu3 %v4736_v4  ;;  %v6620_v4 = vld [vmem:[#allocation63_spill] sm:$0xff] }
 0x3ca   :  { %1533 = vmatpush.msra.mxu0 %v6526_v15  ;;  %1553 = vmatpush.msra.mxu1 %v6527_v16 }
 0x3cb   :  { %1573 = vmatpush.msrb.mxu2 %v4839_v17  ;;  %1593 = vmatpush.msrb.mxu3 %v4746_v45  ;;  %v6596_v45 = vld [vmem:[#allocation37_spill] sm:$0xff] }
 0x3cc   :  { %1534 = vmatpush.msra.mxu0 %v4749_v32  ;;  %1554 = vmatpush.msra.mxu1 %v4752_v8  ;;  %v6619_v32 = vld [vmem:[#allocation58_spill] sm:$0xff] }
 0x3cd   :  { %1574 = vmatpush.msrb.mxu2 %v4845_v20  ;;  %1594 = vmatpush.msrb.mxu3 %v4756_v38  ;;  %v201_v8 = vadd.f32 %v6619_v32, %v6618_v1  ;;  %v6621_v38 = vld [vmem:[#allocation59_spill] sm:$0xff] }
 0x3ce   :  { %1535 = vmatpush.msra.mxu0 %v4759_v39  ;;  %1555 = vmatpush.msra.mxu1 %v4850_v21  ;;  %v6601_v39 = vld [vmem:[#allocation32_spill] sm:$0xff]  ;;  %v242_v63 = vadd.f32 %v6621_v38, %v6620_v4 }
 0x3cf   :  { %1575 = vmatpush.msrb.mxu2 %v6592_v56  ;;  %1595 = vmatpush.msrb.mxu3 %v6593_v62 }
 0x3d0   :  { %1536 = vmatpush.msra.mxu0 %v6594_v41  ;;  %1556 = vmatpush.msra.mxu1 %v6595_v42 }
 0x3d1   :  { %1576 = vmatpush.msrb.mxu2 %v6596_v45  ;;  %1596 = vmatpush.msrb.mxu3 %v6597_v43 }
 0x3d2   :  { %1537 = vmatpush.msra.mxu0 %v6598_v44  ;;  %1557 = vmatpush.msra.mxu1 %v6599_v46 }
 0x3d3   :  { %1577 = vmatpush.msrb.mxu2 %v6600_v47  ;;  %1597 = vmatpush.msrb.mxu3 %v6601_v39 }
 0x3d4   :  { %1538 = vmatpush.msra.mxu0 %v6602_v48  ;;  %1558 = vmatpush.msra.mxu1 %v6603_v11 }
 0x3d5   :  { %1578 = vmatpush.msrb.mxu2 %v6604_v60  ;;  %1598 = vmatpush.msrb.mxu3 %v6605_v0 }
 0x3d6   :  { %1539 = vmatpush.msra.mxu0 %v6606_v18  ;;  %1559 = vmatpush.msra.mxu1 %v6607_v61 }
 0x3d7   :  { %1579 = vmatpush.msrb.mxu2 %v6608_v58  ;;  %1599 = vmatpush.msrb.mxu3 %v6609_v6 }
 0x3d8   :  { %1540 = vmatpush.msra.mxu0 %v6610_v10  ;;  %1560 = vmatpush.msra.mxu1 %v6611_v5 }
 0x3d9   :  { %1580 = vmatpush.msrb.mxu2 %v6612_v19  ;;  %1600 = vmatpush.msrb.mxu3 %v6613_v54 }
 0x3da   :  { %1541 = vmatpush.msra.mxu0 %v6614_v51  ;;  %1561 = vmatpush.msra.mxu1 %v6615_v2 }
 0x3db   :  { %1581 = vmatpush.msrb.mxu2 %v6616_v55  ;;  %1601 = vmatpush.msrb.mxu3 %v6617_v3 }
 0x437   :  { %v1231_v33 = vpop.f32.mrf.mxu0  ;;  %v1251_v15 = vpop.f32.mrf.mxu1 }
 0x438   :  { %v1294_v16 = vadd.f32 %v1231_v33, %v201_v8  ;;  %v1295_v17 = vadd.f32 %v1251_v15, %v242_v63  ;;  %v1744_v63 = vld [vmem:[#allocation7 + $0x1e8] sm:$0xff]  ;;  %v1745_v33 = vld [vmem:[#allocation7 + $0x1f0] sm:$0xff]  ;;  %v1746_v15 = vld [vmem:[#allocation7 + $0x1f8] sm:$0xff] }
 0x43a   :  { %v3381_v20 = vmul.f32 -1.442695, %v1294_v16  ;;  %v3382_v21 = vmul.f32 -1.442695, %v1295_v17  ;;  %v1739_v16 = vld [vmem:[#allocation7 + $0x1c0] sm:$0xff]  ;;  %v1740_v17 = vld [vmem:[#allocation7 + $0x1c8] sm:$0xff] }
 0x43c   :  { %3511 = vpow2.f32 %v3381_v20  ;;  %v1741_v20 = vld [vmem:[#allocation7 + $0x1d0] sm:$0xff] }
 0x43d   :  { %3513 = vpow2.f32 %v3382_v21  ;;  %v1742_v21 = vld [vmem:[#allocation7 + $0x1d8] sm:$0xff] }
 0x43e   :  { %v1291_v26 = vpop.f32.mrf.mxu3  ;;  %v1271_v59 = vpop.f32.mrf.mxu2 }
 0x43f   :  { %v1297_v22 = vadd.f32 %v1291_v26, %v324_v49  ;;  %v1296_v12 = vadd.f32 %v1271_v59, %v283_v52  ;;  %v1736_v49 = vld [vmem:[#allocation7 + $0x1a8] sm:$0xff]  ;;  %v1737_v26 = vld [vmem:[#allocation7 + $0x1b0] sm:$0xff]  ;;  %v204_v52 = vadd.f32 %v6626_v36, %v6618_v1 }
 0x440   :  { %v1728_v59 = vld [vmem:[#allocation7 + $0x168] sm:$0xff] }
 0x441   :  { %v3383_v57 = vmul.f32 -1.442695, %v1297_v22  ;;  %v1738_v22 = vld [vmem:[#allocation7 + $0x1b8] sm:$0xff] }
 0x442   :  { %v3512_v53 = vpop.eup %3511 }
 0x443   :  { %v3514_v50 = vpop.eup %3513  ;;  %v1301_v30 = vadd.f32 1.0, %v3512_v53  ;;  %3515 = vpow2.f32 %v3383_v57  ;;  %v1731_v57 = vld [vmem:[#allocation7 + $0x180] sm:$0xff]  ;;  %v1732_v53 = vld [vmem:[#allocation7 + $0x188] sm:$0xff] }
 0x444   :  { %v1320_v9 = vadd.f32 1.0, %v3514_v50  ;;  %v1733_v50 = vld [vmem:[#allocation7 + $0x190] sm:$0xff] }
 0x445   :  { %3517 = vrcp.f32 %v1301_v30  ;;  %v1313_v34 = vand.u32 2147483648, %v1301_v30  ;;  %v1311_v41 = vand.u32 2147483647, %v1301_v30  ;;  %vm1307_vm15 = vweird.f32 %v1301_v30 }
 0x446   :  { %3519 = vrcp.f32 %v1320_v9  ;;  %v1332_v56 = vand.u32 2147483648, %v1320_v9  ;;  %v1330_v45 = vand.u32 2147483647, %v1320_v9  ;;  %vm1326_vm0 = vweird.f32 %v1320_v9 }
 0x447   :  { %v1314_v46 = vor.u32 1.1754944e-38, %v1313_v34  ;;  %vm1312_vm3 = vcmp.eq.f32.partialorder %v1311_v41, 8.507059e+37  ;;  %v1719_v41 = vld [vmem:[#allocation7 + $0x120] sm:$0xff] }
 0x448   :  { %v1333_v48 = vor.u32 1.1754944e-38, %v1332_v56  ;;  %vm1331_vm4 = vcmp.eq.f32.partialorder %v1330_v45, 8.507059e+37  ;;  %v1721_v45 = vld [vmem:[#allocation7 + $0x130] sm:$0xff] }
 0x449   :  { %v3516_v28 = vpop.eup %3515 }
 0x44a   :  { %v1340_v31 = vadd.f32 1.0, %v3516_v28  ;;  %v1729_v28 = vld [vmem:[#allocation7 + $0x170] sm:$0xff] }
 0x44b   :  { %v3518_v24 = vpop.eup %3517 }
 0x44c   :  { %v3520_v37 = vpop.eup %3519  ;;  %v1303_v40 = vmul.f32 %v3518_v24, %v1301_v30  ;;  %3521 = vrcp.f32 %v1340_v31  ;;  %vm1308_vm13 = vweird.f32 %v3518_v24  ;;  %v1352_v51 = vand.u32 2147483648, %v1340_v31  ;;  %v1734_v30 = vld [vmem:[#allocation7 + $0x198] sm:$0xff] }
 0x44d   :  { %v1322_v27 = vmul.f32 %v3520_v37, %v1320_v9  ;;  %3523 = vtanh.f32 %v1296_v12  ;;  %vm1327_vm14 = vweird.f32 %v3520_v37  ;;  %vm1309_vm1 = vmor %vm1307_vm15, %vm1308_vm13  ;;  %vm1346_vm6 = vweird.f32 %v1340_v31  ;;  %v1727_v9 = vld [vmem:[#allocation7 + $0x160] sm:$0xff]  ;;  %v1730_v12 = vld [vmem:[#allocation7 + $0x178] sm:$0xff] }
 0x44e   :  { %v1304_v35 = vsub.f32 1.0, %v1303_v40  ;;  %vm1328_vm2 = vmor %vm1326_vm0, %vm1327_vm14  ;;  %v1350_v2 = vand.u32 2147483647, %v1340_v31  ;;  %v1353_v3 = vor.u32 1.1754944e-38, %v1352_v51  ;;  %v1708_v51 = vld [vmem:[#allocation7 + $0xc8] sm:$0xff] }
 0x44f   :  { %v1323_v23 = vsub.f32 1.0, %v1322_v27  ;;  %v1723_v27 = vld [vmem:[#allocation7 + $0x140] sm:$0xff] }
 0x450   :  { %v1305_v62 = vmul.f32 %v3518_v24, %v1304_v35  ;;  %vm1351_vm8 = vcmp.eq.f32.partialorder %v1350_v2, 8.507059e+37  ;;  %v1724_v35 = vld [vmem:[#allocation7 + $0x148] sm:$0xff]  ;;  %v1709_v2 = vld [vmem:[#allocation7 + $0xd0] sm:$0xff] }
 0x451   :  { %v1324_v42 = vmul.f32 %v3520_v37, %v1323_v23  ;;  %v1725_v23 = vld [vmem:[#allocation7 + $0x150] sm:$0xff] }
 0x452   :  { %v3522_v43 = vpop.eup %3521  ;;  %v1306_v44 = vadd.f32 %v3518_v24, %v1305_v62  ;;  %v1726_v62 = vld [vmem:[#allocation7 + $0x158] sm:$0xff] }
 0x453   :  { %v1325_v47 = vadd.f32 %v3520_v37, %v1324_v42  ;;  %v1342_v39 = vmul.f32 %v3522_v43, %v1340_v31  ;;  %v3524_v60 = vpop.eup %3523  ;;  %vm1347_vm5 = vweird.f32 %v3522_v43  ;;  %v6627_v31 = vld [vmem:[#allocation43_spill] sm:$0xff]  ;;  %v1720_v42 = vld [vmem:[#allocation7 + $0x128] sm:$0xff] }
 0x454   :  { %v1310_v11 = vsel %vm1309_vm1, %v3518_v24, %v1306_v44  ;;  %vm1348_vm7 = vmor %vm1346_vm6, %vm1347_vm5  ;;  %v245_v24 = vadd.f32 %v6627_v31, %v6620_v4  ;;  %v1689_v31 = vld [vmem:[#allocation7 + $0x30] sm:$0xff] }
 0x455   :  { %v1315_v0 = vsel %vm1312_vm3, %v1314_v46, %v1310_v11  ;;  %v1329_v18 = vsel %vm1328_vm2, %v3520_v37, %v1325_v47  ;;  %v1343_v61 = vsub.f32 1.0, %v1342_v39  ;;  %v1722_v46 = vld [vmem:[#allocation7 + $0x138] sm:$0xff]  ;;  %v1715_v47 = vld [vmem:[#allocation7 + $0x100] sm:$0xff]  ;;  %v1716_v39 = vld [vmem:[#allocation7 + $0x108] sm:$0xff] }
 0x456   :  { %v1334_v58 = vsel %vm1331_vm4, %v1333_v48, %v1329_v18  ;;  %v1357_v6 = vmul.f32 %v3524_v60, %v1315_v0  ;;  %v1717_v48 = vld [vmem:[#allocation7 + $0x110] sm:$0xff]  ;;  %v1718_v11 = vld [vmem:[#allocation7 + $0x118] sm:$0xff]  ;;  %v6628_v60 = vld [vmem:[#allocation69_spill] sm:$0xff] }
 0x457   :  { %v1356_v10 = vmul.f32 %v1334_v58, %v5020_v25  ;;  %v1344_v5 = vmul.f32 %v3522_v43, %v1343_v61  ;;  %v1743_v25 = vld [vmem:[#allocation7 + $0x1e0] sm:$0xff]  ;;  %v327_v0 = vadd.f32 %v6628_v60, %v6622_v14  ;;  %v1712_v61 = vld [vmem:[#allocation7 + $0xe8] sm:$0xff]  ;;  %v1713_v58 = vld [vmem:[#allocation7 + $0xf0] sm:$0xff] }
 0x458   :  { %v1711_v18 = vld [vmem:[#allocation7 + $0xe0] sm:$0xff] }
 0x459   :  { %v5102_v19 = vadd.f32 %v1357_v6, %v1356_v10  ;;  %v1345_v54 = vadd.f32 %v3522_v43, %v1344_v5  ;;  %v1714_v10 = vld [vmem:[#allocation7 + $0xf8] sm:$0xff] }
 0x45b   :  { %3525 = vtanh.f32 %v5102_v19  ;;  %v1349_v55 = vsel %vm1348_vm7, %v3522_v43, %v1345_v54  ;;  %v1707_v54 = vld [vmem:[#allocation7 + $0xc0] sm:$0xff] }
 0x45c   :  { %v1354_v8 = vsel %vm1351_vm8, %v1353_v3, %v1349_v55  ;;  %v1710_v55 = vld [vmem:[#allocation7 + $0xd8] sm:$0xff] }
 0x461   :  { %v3526_v32 = vpop.eup %3525 }
 0x462   :  { %v5105_v38 = vmul.f32 %v3526_v32, %v1354_v8  ;;  %v1703_v32 = vld [vmem:[#allocation7 + $0xa0] sm:$0xff]  ;;  %v1704_v8 = vld [vmem:[#allocation7 + $0xa8] sm:$0xff] }
 0x464   :  { %1386 = vmatmul.f32.vlgmr.msrb.gmra.mxu0 %v5105_v38  ;;  %1406 = vmatmul.f32.vlgmr.msrb.gmra.mxu1 %v5105_v38 }
 0x465   :  { %1426 = vmatmul.f32.vlgmr.msra.gmra.mxu2 %v5105_v38  ;;  %1446 = vmatmul.f32.vlgmr.msra.gmra.mxu3 %v5105_v38 }
 0x466   :  { %1757 = vmatpush.msrb.mxu0 %v1743_v25  ;;  %1798 = vmatpush.msrb.mxu1 %v1744_v63  ;;  %v1705_v25 = vld [vmem:[#allocation7 + $0xb0] sm:$0xff] }
 0x467   :  { %1839 = vmatpush.msra.mxu2 %v1745_v33  ;;  %1880 = vmatpush.msra.mxu3 %v1746_v15  ;;  %v1706_v33 = vld [vmem:[#allocation7 + $0xb8] sm:$0xff]  ;;  %v1699_v15 = vld [vmem:[#allocation7 + $0x80] sm:$0xff] }
 0x468   :  { %1758 = vmatpush.msrb.mxu0 %v1739_v16  ;;  %1799 = vmatpush.msrb.mxu1 %v1740_v17  ;;  %v1700_v16 = vld [vmem:[#allocation7 + $0x88] sm:$0xff] }
 0x469   :  { %1840 = vmatpush.msra.mxu2 %v1741_v20  ;;  %1881 = vmatpush.msra.mxu3 %v1742_v21  ;;  %v1701_v21 = vld [vmem:[#allocation7 + $0x90] sm:$0xff] }
 0x46a   :  { %1759 = vmatpush.msrb.mxu0 %v1735_v7  ;;  %1800 = vmatpush.msrb.mxu1 %v1736_v49  ;;  %v1702_v7 = vld [vmem:[#allocation7 + $0x98] sm:$0xff] }
 0x46b   :  { %1841 = vmatpush.msra.mxu2 %v1737_v26  ;;  %1882 = vmatpush.msra.mxu3 %v1738_v22  ;;  %v1695_v26 = vld [vmem:[#allocation7 + $0x60] sm:$0xff]  ;;  %v1696_v22 = vld [vmem:[#allocation7 + $0x68] sm:$0xff] }
 0x46c   :  { %1760 = vmatpush.msrb.mxu0 %v1731_v57  ;;  %1801 = vmatpush.msrb.mxu1 %v1732_v53  ;;  %v1697_v57 = vld [vmem:[#allocation7 + $0x70] sm:$0xff]  ;;  %v1698_v53 = vld [vmem:[#allocation7 + $0x78] sm:$0xff] }
 0x46d   :  { %1842 = vmatpush.msra.mxu2 %v1733_v50  ;;  %1883 = vmatpush.msra.mxu3 %v1734_v30  ;;  %v1691_v50 = vld [vmem:[#allocation7 + $0x40] sm:$0xff]  ;;  %v1692_v30 = vld [vmem:[#allocation7 + $0x48] sm:$0xff] }
 0x46e   :  { %1761 = vmatpush.msrb.mxu0 %v1727_v9  ;;  %1802 = vmatpush.msrb.mxu1 %v1728_v59  ;;  %v1693_v9 = vld [vmem:[#allocation7 + $0x50] sm:$0xff]  ;;  %v1694_v59 = vld [vmem:[#allocation7 + $0x58] sm:$0xff] }
 0x46f   :  { %1843 = vmatpush.msra.mxu2 %v1729_v28  ;;  %1884 = vmatpush.msra.mxu3 %v1730_v12  ;;  %v1687_v28 = vld [vmem:[#allocation7 + $0x20] sm:$0xff] }
 0x470   :  { %1762 = vmatpush.msrb.mxu0 %v1723_v27  ;;  %1803 = vmatpush.msrb.mxu1 %v1724_v35  ;;  %v1683_v27 = vld [vmem:[#allocation7] sm:$0xff]  ;;  %v1684_v35 = vld [vmem:[#allocation7 + $0x8] sm:$0xff] }
 0x471   :  { %1844 = vmatpush.msra.mxu2 %v1725_v23  ;;  %1885 = vmatpush.msra.mxu3 %v1726_v62 }
 0x472   :  { %1763 = vmatpush.msrb.mxu0 %v1719_v41  ;;  %1804 = vmatpush.msrb.mxu1 %v1720_v42 }
 0x473   :  { %1845 = vmatpush.msra.mxu2 %v1721_v45  ;;  %1886 = vmatpush.msra.mxu3 %v1722_v46 }
 0x474   :  { %1764 = vmatpush.msrb.mxu0 %v1715_v47  ;;  %1805 = vmatpush.msrb.mxu1 %v1716_v39 }
 0x475   :  { %1846 = vmatpush.msra.mxu2 %v1717_v48  ;;  %1887 = vmatpush.msra.mxu3 %v1718_v11 }
 0x476   :  { %1765 = vmatpush.msrb.mxu0 %v1711_v18  ;;  %1806 = vmatpush.msrb.mxu1 %v1712_v61 }
 0x477   :  { %1847 = vmatpush.msra.mxu2 %v1713_v58  ;;  %1888 = vmatpush.msra.mxu3 %v1714_v10 }
 0x478   :  { %1766 = vmatpush.msrb.mxu0 %v1707_v54  ;;  %1807 = vmatpush.msrb.mxu1 %v1708_v51 }
 0x479   :  { %1848 = vmatpush.msra.mxu2 %v1709_v2  ;;  %1889 = vmatpush.msra.mxu3 %v1710_v55 }
 0x47a   :  { %1767 = vmatpush.msrb.mxu0 %v1703_v32  ;;  %1808 = vmatpush.msrb.mxu1 %v1704_v8 }
 0x47b   :  { %1849 = vmatpush.msra.mxu2 %v1705_v25  ;;  %1890 = vmatpush.msra.mxu3 %v1706_v33 }
 0x47c   :  { %1768 = vmatpush.msrb.mxu0 %v1699_v15  ;;  %1809 = vmatpush.msrb.mxu1 %v1700_v16 }
 0x47d   :  { %1850 = vmatpush.msra.mxu2 %v1701_v21  ;;  %1891 = vmatpush.msra.mxu3 %v1702_v7 }
 0x47e   :  { %1769 = vmatpush.msrb.mxu0 %v1695_v26  ;;  %1810 = vmatpush.msrb.mxu1 %v1696_v22  ;;  %v6631_v22 = vld [vmem:[#allocation18_spill] sm:$0xff] }
 0x47f   :  { %1851 = vmatpush.msra.mxu2 %v1697_v57  ;;  %1892 = vmatpush.msra.mxu3 %v1698_v53  ;;  %v6632_v57 = vld [vmem:[#allocation29_spill] sm:$0xff] }
 0x480   :  { %1770 = vmatpush.msrb.mxu0 %v1691_v50  ;;  %1811 = vmatpush.msrb.mxu1 %v1692_v30  ;;  %v5149_v53 = vld [vmem:[#allocation9 + $0x1e0] sm:$0xff]  ;;  %v5151_v50 = vld [vmem:[#allocation9 + $0x1e8] sm:$0xff] }
 0x481   :  { %1852 = vmatpush.msra.mxu2 %v1693_v9  ;;  %1893 = vmatpush.msra.mxu3 %v1694_v59  ;;  %6633 = vst [vmem:[#allocation27_spill] sm:$0xff] %v5149_v53  ;;  %v5153_v30 = vld [vmem:[#allocation9 + $0x1c0] sm:$0xff]  ;;  %v5157_v9 = vld [vmem:[#allocation9 + $0x1c8] sm:$0xff]  ;;  %v5159_v59 = vld [vmem:[#allocation9 + $0x1f8] sm:$0xff] }
 0x482   :  { %1771 = vmatpush.msrb.mxu0 %v1687_v28  ;;  %6634 = vst [vmem:[#allocation21_spill] sm:$0xff] %v5157_v9  ;;  %v5162_v28 = vld [vmem:[#allocation9 + $0x1a0] sm:$0xff] }
 0x483   :  { %1853 = vmatpush.msra.mxu2 %v1689_v31  ;;  %v6637_v31 = vld [vmem:[#allocation19_spill] sm:$0xff] }
 0x484   :  { %1772 = vmatpush.msrb.mxu0 %v1683_v27  ;;  %v5197_v27 = vld [vmem:[#allocation9 + $0x188] sm:$0xff] }
 0x4e1   :  { %v1387_v37 = vpop.f32.mrf.mxu0  ;;  %v1407_v40 = vpop.f32.mrf.mxu1 }
 0x4e2   :  { %v1450_v34 = vadd.f32 %v1387_v37, %v204_v52  ;;  %v1451_v56 = vadd.f32 %v1407_v40, %v245_v24  ;;  %v1688_v52 = vld [vmem:[#allocation7 + $0x28] sm:$0xff]  ;;  %v1690_v24 = vld [vmem:[#allocation7 + $0x38] sm:$0xff] }
 0x4e3   :  { %v6629_v37 = vld [vmem:[#allocation68_spill] sm:$0xff]  ;;  %1812 = vmatpush.msrb.mxu1 %v1688_v52  ;;  %1894 = vmatpush.msra.mxu3 %v1690_v24  ;;  %v5185_v24 = vld [vmem:[#allocation9 + $0x1f0] sm:$0xff] }
 0x4e4   :  { %v3384_v43 = vmul.f32 -1.442695, %v1450_v34  ;;  %v3385_v44 = vmul.f32 -1.442695, %v1451_v56  ;;  %v286_v40 = vadd.f32 %v6629_v37, %v6624_v13  ;;  %v1685_v34 = vld [vmem:[#allocation7 + $0x10] sm:$0xff]  ;;  %v1686_v56 = vld [vmem:[#allocation7 + $0x18] sm:$0xff] }
 0x4e5   :  { %1813 = vmatpush.msrb.mxu1 %v1684_v35  ;;  %1854 = vmatpush.msra.mxu2 %v1685_v34  ;;  %v5166_v52 = vld [vmem:[#allocation9 + $0x1d8] sm:$0xff]  ;;  %v5193_v37 = vld [vmem:[#allocation9 + $0x1b0] sm:$0xff]  ;;  %v5205_v35 = vld [vmem:[#allocation9 + $0x168] sm:$0xff] }
 0x4e6   :  { %3527 = vpow2.f32 %v3384_v43  ;;  %1895 = vmatpush.msra.mxu3 %v1686_v56  ;;  %6636 = vst [vmem:[#allocation50_spill] sm:$0xff] %v5166_v52  ;;  %v5209_v34 = vld [vmem:[#allocation9 + $0x190] sm:$0xff]  ;;  %v5215_v56 = vld [vmem:[#allocation9 + $0x178] sm:$0xff] }
 0x4e7   :  { %3529 = vpow2.f32 %v3385_v44 }
 0x4e8   :  { %v1447_v6 = vpop.f32.mrf.mxu3  ;;  %v1427_v36 = vpop.f32.mrf.mxu2 }
 0x4e9   :  { %v1453_v5 = vadd.f32 %v1447_v6, %v327_v0  ;;  %v1452_v41 = vadd.f32 %v1427_v36, %v286_v40  ;;  %v5164_v36 = vld [vmem:[#allocation9 + $0x1a8] sm:$0xff]  ;;  %v5195_v40 = vld [vmem:[#allocation9 + $0x180] sm:$0xff] }
 0x4ea   :  { %6635 = vst [vmem:[#allocation20_spill] sm:$0xff] %v5164_v36 }
 0x4eb   :  { %v3386_v3 = vmul.f32 -1.442695, %v1453_v5  ;;  %6639 = vst [vmem:[#allocation61_spill] sm:$0xff] %v5195_v40 }
 0x4ec   :  { %v3528_v63 = vpop.eup %3527 }
 0x4ed   :  { %v3530_v17 = vpop.eup %3529  ;;  %v5117_v20 = vadd.f32 1.0, %v3528_v63  ;;  %3531 = vpow2.f32 %v3386_v3 }
 0x4ee   :  { %v5119_v49 = vadd.f32 1.0, %v3530_v17 }
 0x4ef   :  { %3533 = vrcp.f32 %v5117_v20  ;;  %v1469_v47 = vand.u32 2147483648, %v5117_v20  ;;  %v1467_v11 = vand.u32 2147483647, %v5117_v20  ;;  %vm1463_vm11 = vweird.f32 %v5117_v20 }
 0x4f0   :  { %3535 = vrcp.f32 %v5119_v49  ;;  %v1488_v39 = vand.u32 2147483648, %v5119_v49  ;;  %v1486_v0 = vand.u32 2147483647, %v5119_v49  ;;  %vm1482_vm12 = vweird.f32 %v5119_v49 }
 0x4f1   :  { %v1470_v58 = vor.u32 1.1754944e-38, %v1469_v47  ;;  %vm1468_vm15 = vcmp.eq.f32.partialorder %v1467_v11, 8.507059e+37  ;;  %v5229_v47 = vld [vmem:[#allocation9 + $0x158] sm:$0xff]  ;;  %v5233_v11 = vld [vmem:[#allocation9 + $0x150] sm:$0xff] }
 0x4f2   :  { %v1489_v5 = vor.u32 1.1754944e-38, %v1488_v39  ;;  %vm1487_vm0 = vcmp.eq.f32.partialorder %v1486_v0, 8.507059e+37 }
 0x4f3   :  { %v3532_v12 = vpop.eup %3531 }
 0x4f4   :  { %v1496_v23 = vadd.f32 1.0, %v3532_v12  ;;  %v5188_v12 = vld [vmem:[#allocation9 + $0x1d0] sm:$0xff] }
 0x4f5   :  { %v3534_v62 = vpop.eup %3533 }
 0x4f6   :  { %v3536_v42 = vpop.eup %3535  ;;  %v1459_v45 = vmul.f32 %v3534_v62, %v5117_v20  ;;  %3537 = vrcp.f32 %v1496_v23  ;;  %vm1464_vm9 = vweird.f32 %v3534_v62  ;;  %v1508_v16 = vand.u32 2147483648, %v1496_v23 }
 0x4f7   :  { %v1478_v43 = vmul.f32 %v3536_v42, %v5119_v49  ;;  %3539 = vtanh.f32 %v1452_v41  ;;  %vm1483_vm10 = vweird.f32 %v3536_v42  ;;  %vm1465_vm13 = vmor %vm1463_vm11, %vm1464_vm9  ;;  %vm1502_vm2 = vweird.f32 %v1496_v23  ;;  %v6640_v41 = vld [vmem:[#allocation46_spill] sm:$0xff] }
 0x4f8   :  { %v1460_v44 = vsub.f32 1.0, %v1459_v45  ;;  %vm1484_vm14 = vmor %vm1482_vm12, %vm1483_vm10  ;;  %v1506_v17 = vand.u32 2147483647, %v1496_v23  ;;  %v1509_v21 = vor.u32 1.1754944e-38, %v1508_v16  ;;  %v6641_v45 = vld [vmem:[#allocation47_spill] sm:$0xff]  ;;  %v5275_v16 = vld [vmem:[#allocation9 + $0xa0] sm:$0xff] }
 0x4f9   :  { %v1479_v46 = vsub.f32 1.0, %v1478_v43  ;;  %v248_v43 = vadd.f32 %v6641_v45, %v6620_v4  ;;  %v5240_v4 = vld [vmem:[#allocation9 + $0x138] sm:$0xff]  ;;  %6644 = vst [vmem:[#allocation54_spill] sm:$0xff] %v5275_v16 }
 0x4fa   :  { %v1461_v48 = vmul.f32 %v3534_v62, %v1460_v44  ;;  %vm1507_vm4 = vcmp.eq.f32.partialorder %v1506_v17, 8.507059e+37  ;;  %v5225_v44 = vld [vmem:[#allocation9 + $0x140] sm:$0xff]  ;;  %v5277_v17 = vld [vmem:[#allocation9 + $0xa8] sm:$0xff] }
 0x4fb   :  { %v1480_v60 = vmul.f32 %v3536_v42, %v1479_v46  ;;  %v5227_v46 = vld [vmem:[#allocation9 + $0x148] sm:$0xff]  ;;  %6645 = vst [vmem:[#allocation55_spill] sm:$0xff] %v5277_v17 }
 0x4fc   :  { %v3538_v18 = vpop.eup %3537  ;;  %v1462_v61 = vadd.f32 %v3534_v62, %v1461_v48 }
 0x4fd   :  { %v1481_v6 = vadd.f32 %v3536_v42, %v1480_v60  ;;  %v1498_v10 = vmul.f32 %v3538_v18, %v1496_v23  ;;  %v3540_v51 = vpop.eup %3539  ;;  %vm1503_vm1 = vweird.f32 %v3538_v18  ;;  %v5207_v23 = vld [vmem:[#allocation9 + $0x198] sm:$0xff] }
 0x4fe   :  { %v1466_v54 = vsel %vm1465_vm13, %v3534_v62, %v1462_v61  ;;  %vm1504_vm3 = vmor %vm1502_vm2, %vm1503_vm1  ;;  %v5217_v62 = vld [vmem:[#allocation9 + $0x170] sm:$0xff] }
 0x4ff   :  { %v1471_v2 = vsel %vm1468_vm15, %v1470_v58, %v1466_v54  ;;  %v1485_v55 = vsel %vm1484_vm14, %v3536_v42, %v1481_v6  ;;  %v1499_v3 = vsub.f32 1.0, %v1498_v10  ;;  %v207_v42 = vadd.f32 %v6640_v41, %v6618_v1  ;;  %v5235_v1 = vld [vmem:[#allocation9 + $0x120] sm:$0xff]  ;;  %v5245_v61 = vld [vmem:[#allocation9 + $0x130] sm:$0xff] }
 0x500   :  { %v1490_v32 = vsel %vm1487_vm0, %v1489_v5, %v1485_v55  ;;  %v1513_v8 = vmul.f32 %v3540_v51, %v1471_v2  ;;  %v5247_v10 = vld [vmem:[#allocation9 + $0x100] sm:$0xff]  ;;  %v5249_v5 = vld [vmem:[#allocation9 + $0x108] sm:$0xff]  ;;  %v5259_v2 = vld [vmem:[#allocation9 + $0x118] sm:$0xff] }
 0x501   :  { %v1512_v25 = vmul.f32 %v1490_v32, %v5102_v19  ;;  %v1500_v63 = vmul.f32 %v3538_v18, %v1499_v3  ;;  %v6630_v19 = vld [vmem:[#allocation74_spill] sm:$0xff]  ;;  %v5255_v54 = vld [vmem:[#allocation9 + $0xe0] sm:$0xff]  ;;  %v5266_v32 = vld [vmem:[#allocation9 + $0xf8] sm:$0xff] }
 0x502   :  { %v5257_v51 = vld [vmem:[#allocation9 + $0xe8] sm:$0xff]  ;;  %v5262_v55 = vld [vmem:[#allocation9 + $0xc0] sm:$0xff] }
 0x503   :  { %v5134_v33 = vadd.f32 %v1513_v8, %v1512_v25  ;;  %v1501_v15 = vadd.f32 %v3538_v18, %v1500_v63  ;;  %v5264_v3 = vld [vmem:[#allocation9 + $0xc8] sm:$0xff]  ;;  %v6642_v8 = vld [vmem:[#allocation71_spill] sm:$0xff]  ;;  %v5272_v63 = vld [vmem:[#allocation9 + $0xd8] sm:$0xff] }
 0x504   :  { %v330_v25 = vadd.f32 %v6642_v8, %v6622_v14  ;;  %6643 = vst [vmem:[#allocation60_spill] sm:$0xff] %v5272_v63  ;;  %v5283_v14 = vld [vmem:[#allocation9 + $0xb8] sm:$0xff]  ;;  %v5301_v41 = vld [vmem:[#allocation9 + $0x60] sm:$0xff] }
 0x505   :  { %3541 = vtanh.f32 %v5134_v33  ;;  %v1505_v20 = vsel %vm1504_vm3, %v3538_v18, %v1501_v15  ;;  %v5237_v18 = vld [vmem:[#allocation9 + $0x128] sm:$0xff]  ;;  %6646 = vst [vmem:[#allocation65_spill] sm:$0xff] %v5283_v14  ;;  %v5329_v8 = vld [vmem:[#allocation9 + $0x20] sm:$0xff] }
 0x506   :  { %v1510_v49 = vsel %vm1507_vm4, %v1509_v21, %v1505_v20  ;;  %v5279_v20 = vld [vmem:[#allocation9 + $0x110] sm:$0xff]  ;;  %6651 = vst [vmem:[#allocation25_spill] sm:$0xff] %v5301_v41 }
 0x507   :  { %6658 = vst [vmem:[#allocation31_spill] sm:$0xff] %v5329_v8 }
 0x50b   :  { %v3542_v7 = vpop.eup %3541 }
 0x50c   :  { %v1516_v26 = vmul.f32 %v3542_v7, %v1510_v49  ;;  %v5285_v7 = vld [vmem:[#allocation9 + $0xf0] sm:$0xff]  ;;  %v5289_v49 = vld [vmem:[#allocation9 + $0x80] sm:$0xff] }
 0x50d   :  { %6647 = vst [vmem:[#allocation64_spill] sm:$0xff] %v5289_v49 }
 0x50e   :  { %1542 = vmatmul.f32.vlgmr.msra.gmra.mxu0 %v1516_v26  ;;  %1562 = vmatmul.f32.vlgmr.msra.gmra.mxu1 %v1516_v26 }
 0x50f   :  { %1582 = vmatmul.f32.vlgmr.msrb.gmra.mxu2 %v1516_v26  ;;  %1602 = vmatmul.f32.vlgmr.msrb.gmra.mxu3 %v1516_v26 }
 0x510   :  { %2021 = vmatpush.msra.mxu0 %v5149_v53  ;;  %2041 = vmatpush.msra.mxu1 %v5151_v50 }
 0x511   :  { %2081 = vmatpush.msrb.mxu3 %v5159_v59  ;;  %2061 = vmatpush.msrb.mxu2 %v5185_v24 }
 0x512   :  { %2022 = vmatpush.msra.mxu0 %v5153_v30  ;;  %2042 = vmatpush.msra.mxu1 %v5157_v9 }
 0x513   :  { %2082 = vmatpush.msrb.mxu3 %v5166_v52  ;;  %2062 = vmatpush.msrb.mxu2 %v5188_v12 }
 0x514   :  { %2023 = vmatpush.msra.mxu0 %v5162_v28  ;;  %2043 = vmatpush.msra.mxu1 %v5164_v36 }
 0x515   :  { %2063 = vmatpush.msrb.mxu2 %v5193_v37 }
 0x516   :  { %1773 = vmatmul.f32.vlgmr.msrb.gmra.mxu0 %v6630_v19  ;;  %1814 = vmatmul.f32.vlgmr.msrb.gmra.mxu1 %v6630_v19 }
 0x517   :  { %1855 = vmatmul.f32.vlgmr.msra.gmra.mxu2 %v6630_v19  ;;  %1896 = vmatmul.f32.vlgmr.msra.gmra.mxu3 %v6630_v19 }
 0x518   :  { %2024 = vmatpush.msra.mxu0 %v5195_v40  ;;  %2044 = vmatpush.msra.mxu1 %v5197_v27 }
 0x519   :  { %2064 = vmatpush.msrb.mxu2 %v5209_v34 }
 0x51a   :  { %2045 = vmatpush.msra.mxu1 %v5205_v35 }
 0x51b   :  { %2065 = vmatpush.msrb.mxu2 %v5217_v62 }
 0x51c   :  { %2046 = vmatpush.msra.mxu1 %v5227_v46 }
 0x51d   :  { %2066 = vmatpush.msrb.mxu2 %v5233_v11 }
 0x51e   :  { %1776 = vmatmul.f32.gmra.mxu0 %v6631_v22  ;;  %1817 = vmatmul.f32.gmra.mxu1 %v6631_v22 }
 0x51f   :  { %1858 = vmatmul.f32.gmra.mxu2 %v6631_v22  ;;  %1899 = vmatmul.f32.gmra.mxu3 %v6631_v22  ;;  %v5295_v22 = vld [vmem:[#allocation9 + $0x98] sm:$0xff] }
 0x520   :  { %2047 = vmatpush.msra.mxu1 %v5237_v18  ;;  %2067 = vmatpush.msrb.mxu2 %v5245_v61  ;;  %6649 = vst [vmem:[#allocation23_spill] sm:$0xff] %v5295_v22 }
 0x522   :  { %2048 = vmatpush.msra.mxu1 %v5249_v5  ;;  %2068 = vmatpush.msrb.mxu2 %v5279_v20 }
 0x524   :  { %2049 = vmatpush.msra.mxu1 %v5257_v51  ;;  %2069 = vmatpush.msrb.mxu2 %v5285_v7 }
 0x526   :  { %1779 = vmatmul.f32.gmra.mxu0 %v6632_v57  ;;  %1820 = vmatmul.f32.gmra.mxu1 %v6632_v57 }
 0x527   :  { %1861 = vmatmul.f32.gmra.mxu2 %v6632_v57  ;;  %1902 = vmatmul.f32.gmra.mxu3 %v6632_v57  ;;  %v5297_v57 = vld [vmem:[#allocation9 + $0xd0] sm:$0xff] }
 0x528   :  { %2050 = vmatpush.msra.mxu1 %v5264_v3  ;;  %6650 = vst [vmem:[#allocation22_spill] sm:$0xff] %v5297_v57  ;;  %2070 = vmatpush.msrb.mxu2 %v5297_v57 }
 0x52a   :  { %2051 = vmatpush.msra.mxu1 %v5277_v17 }
 0x52e   :  { %1782 = vmatmul.f32.gmra.mxu0 %v6637_v31  ;;  %1823 = vmatmul.f32.gmra.mxu1 %v6637_v31 }
 0x52f   :  { %1864 = vmatmul.f32.gmra.mxu2 %v6637_v31  ;;  %1905 = vmatmul.f32.gmra.mxu3 %v6637_v31 }
 0x536   :  { %1785 = vmatmul.f32.gmra.mxu0 %v5023_v29  ;;  %1826 = vmatmul.f32.gmra.mxu1 %v5023_v29 }
 0x537   :  { %1867 = vmatmul.f32.gmra.mxu2 %v5023_v29  ;;  %1908 = vmatmul.f32.gmra.mxu3 %v5023_v29  ;;  %v5191_v29 = vld [vmem:[#allocation9 + $0x1b8] sm:$0xff] }
 0x538   :  { %6638 = vst [vmem:[#allocation51_spill] sm:$0xff] %v5191_v29  ;;  %2083 = vmatpush.msrb.mxu3 %v5191_v29 }
 0x53a   :  { %2084 = vmatpush.msrb.mxu3 %v5207_v23 }
 0x53c   :  { %2085 = vmatpush.msrb.mxu3 %v5215_v56 }
 0x53e   :  { %1788 = vmatmul.f32.gmra.mxu0 %v5105_v38  ;;  %1829 = vmatmul.f32.gmra.mxu1 %v5105_v38 }
 0x53f   :  { %1870 = vmatmul.f32.gmra.mxu2 %v5105_v38  ;;  %1911 = vmatmul.f32.gmra.mxu3 %v5105_v38  ;;  %v5200_v38 = vld [vmem:[#allocation9 + $0x160] sm:$0xff] }
 0x540   :  { %2025 = vmatpush.msra.mxu0 %v5200_v38  ;;  %2086 = vmatpush.msrb.mxu3 %v5229_v47 }
 0x542   :  { %2026 = vmatpush.msra.mxu0 %v5225_v44  ;;  %2087 = vmatpush.msrb.mxu3 %v5240_v4 }
 0x544   :  { %2027 = vmatpush.msra.mxu0 %v5235_v1  ;;  %2088 = vmatpush.msrb.mxu3 %v5259_v2 }
 0x546   :  { %1791 = vmatmul.f32.gmra.mxu0 %v1516_v26  ;;  %1832 = vmatmul.f32.gmra.mxu1 %v1516_v26 }
 0x547   :  { %1873 = vmatmul.f32.gmra.mxu2 %v1516_v26  ;;  %1914 = vmatmul.f32.gmra.mxu3 %v1516_v26  ;;  %v5291_v26 = vld [vmem:[#allocation9 + $0x88] sm:$0xff] }
 0x548   :  { %2028 = vmatpush.msra.mxu0 %v5247_v10  ;;  %2089 = vmatpush.msrb.mxu3 %v5266_v32  ;;  %6648 = vst [vmem:[#allocation24_spill] sm:$0xff] %v5291_v26 }
 0x549   :  { %2052 = vmatpush.msra.mxu1 %v5291_v26 }
 0x54a   :  { %2029 = vmatpush.msra.mxu0 %v5255_v54  ;;  %2090 = vmatpush.msrb.mxu3 %v5272_v63 }
 0x54c   :  { %2030 = vmatpush.msra.mxu0 %v5262_v55  ;;  %2091 = vmatpush.msrb.mxu3 %v5283_v14 }
 0x54e   :  { %2031 = vmatpush.msra.mxu0 %v5275_v16  ;;  %2092 = vmatpush.msrb.mxu3 %v5295_v22  ;;  %v5353_v22 = vld [vmem:[#allocation9 + $0x18] sm:$0xff] }
 0x54f   :  { %6667 = vst [vmem:[#allocation44_spill] sm:$0xff] %v5353_v22 }
 0x550   :  { %2032 = vmatpush.msra.mxu0 %v5289_v49 }
 0x552   :  { %2033 = vmatpush.msra.mxu0 %v5301_v41 }
 0x58b   :  { %v1543_v39 = vpop.f32.mrf.mxu0  ;;  %v1563_v48 = vpop.f32.mrf.mxu1 }
 0x58c   :  { %v1606_v60 = vadd.f32 %v1543_v39, %v207_v42  ;;  %v1607_v0 = vadd.f32 %v1563_v48, %v248_v43  ;;  %v5303_v42 = vld [vmem:[#allocation9 + $0x68] sm:$0xff]  ;;  %v5309_v39 = vld [vmem:[#allocation9 + $0xb0] sm:$0xff]  ;;  %v5311_v48 = vld [vmem:[#allocation9 + $0x78] sm:$0xff] }
 0x58d   :  { %6652 = vst [vmem:[#allocation37_spill] sm:$0xff] %v5303_v42  ;;  %2053 = vmatpush.msra.mxu1 %v5303_v42  ;;  %2071 = vmatpush.msrb.mxu2 %v5309_v39  ;;  %v6664_v42 = vld [vmem:[#allocation70_spill] sm:$0xff] }
 0x58e   :  { %v3387_v58 = vmul.f32 -1.442695, %v1606_v60  ;;  %v3388_v6 = vmul.f32 -1.442695, %v1607_v0  ;;  %6653 = vst [vmem:[#allocation28_spill] sm:$0xff] %v5309_v39  ;;  %v5317_v0 = vld [vmem:[#allocation9 + $0x40] sm:$0xff]  ;;  %2093 = vmatpush.msrb.mxu3 %v5311_v48  ;;  %v289_v41 = vadd.f32 %v6664_v42, %v6624_v13 }
 0x58f   :  { %6654 = vst [vmem:[#allocation26_spill] sm:$0xff] %v5311_v48  ;;  %2034 = vmatpush.msra.mxu0 %v5317_v0  ;;  %v5361_v13 = vld [vmem:[#allocation9 + $0x30] sm:$0xff] }
 0x590   :  { %3543 = vpow2.f32 %v3387_v58  ;;  %6655 = vst [vmem:[#allocation30_spill] sm:$0xff] %v5317_v0  ;;  %v5319_v58 = vld [vmem:[#allocation9 + $0x48] sm:$0xff]  ;;  %v5351_v0 = vld [vmem:[#allocation9 + $0x38] sm:$0xff] }
 0x591   :  { %3545 = vpow2.f32 %v3388_v6  ;;  %6656 = vst [vmem:[#allocation38_spill] sm:$0xff] %v5319_v58  ;;  %v5324_v6 = vld [vmem:[#allocation9 + $0x90] sm:$0xff]  ;;  %2054 = vmatpush.msra.mxu1 %v5319_v58  ;;  %2035 = vmatpush.msra.mxu0 %v5329_v8 }
 0x592   :  { %v1603_v15 = vpop.f32.mrf.mxu3  ;;  %6657 = vst [vmem:[#allocation32_spill] sm:$0xff] %v5324_v6  ;;  %2072 = vmatpush.msrb.mxu2 %v5324_v6  ;;  %v5349_v58 = vld [vmem:[#allocation9 + $0x50] sm:$0xff] }
 0x593   :  { %v1609_v21 = vadd.f32 %v1603_v15, %v330_v25  ;;  %v5331_v25 = vld [vmem:[#allocation9 + $0x28] sm:$0xff]  ;;  %v5333_v15 = vld [vmem:[#allocation9 + $0x58] sm:$0xff]  ;;  %6665 = vst [vmem:[#allocation41_spill] sm:$0xff] %v5349_v58 }
 0x594   :  { %6659 = vst [vmem:[#allocation33_spill] sm:$0xff] %v5331_v25  ;;  %2094 = vmatpush.msrb.mxu3 %v5333_v15  ;;  %2055 = vmatpush.msra.mxu1 %v5331_v25 }
 0x595   :  { %v3389_v19 = vmul.f32 -1.442695, %v1609_v21  ;;  %6660 = vst [vmem:[#allocation40_spill] sm:$0xff] %v5333_v15  ;;  %v5337_v21 = vld [vmem:[#allocation9 + $0x70] sm:$0xff] }
 0x596   :  { %v3544_v31 = vpop.eup %3543  ;;  %6661 = vst [vmem:[#allocation36_spill] sm:$0xff] %v5337_v21  ;;  %2073 = vmatpush.msrb.mxu2 %v5337_v21  ;;  %2095 = vmatpush.msrb.mxu3 %v5351_v0 }
 0x597   :  { %v3546_v45 = vpop.eup %3545  ;;  %v5305_v43 = vadd.f32 1.0, %v3544_v31  ;;  %3547 = vpow2.f32 %v3389_v19  ;;  %v1583_v19 = vpop.f32.mrf.mxu2  ;;  %v5341_v31 = vld [vmem:[#allocation9] sm:$0xff]  ;;  %6666 = vst [vmem:[#allocation39_spill] sm:$0xff] %v5351_v0  ;;  %v5368_v0 = vld [vmem:[#allocation9 + $0x10] sm:$0xff] }
 0x598   :  { %v5313_v60 = vadd.f32 1.0, %v3546_v45  ;;  %6662 = vst [vmem:[#allocation34_spill] sm:$0xff] %v5341_v31  ;;  %v5343_v45 = vld [vmem:[#allocation9 + $0x8] sm:$0xff]  ;;  %v1608_v26 = vadd.f32 %v1583_v19, %v289_v41  ;;  %2036 = vmatpush.msra.mxu0 %v5341_v31  ;;  %2074 = vmatpush.msrb.mxu2 %v5349_v58 }
 0x599   :  { %3549 = vrcp.f32 %v5305_v43  ;;  %6663 = vst [vmem:[#allocation35_spill] sm:$0xff] %v5343_v45  ;;  %2056 = vmatpush.msra.mxu1 %v5343_v45  ;;  %2096 = vmatpush.msrb.mxu3 %v5353_v22  ;;  %v1625_v45 = vand.u32 2147483648, %v5305_v43  ;;  %vm1619_vm7 = vweird.f32 %v5305_v43 }
 0x59a   :  { %3551 = vrcp.f32 %v5313_v60  ;;  %6668 = vst [vmem:[#allocation45_spill] sm:$0xff] %v5361_v13  ;;  %2172 = vmatpush.msrb.mxu0 %v5149_v53  ;;  %2075 = vmatpush.msrb.mxu2 %v5361_v13  ;;  %v1644_v22 = vand.u32 2147483648, %v5313_v60  ;;  %v1623_v53 = vand.u32 2147483647, %v5305_v43  ;;  %vm1638_vm8 = vweird.f32 %v5313_v60 }
 0x59b   :  { %6669 = vst [vmem:[#allocation53_spill] sm:$0xff] %v5368_v0  ;;  %2192 = vmatpush.msrb.mxu1 %v5151_v50  ;;  %2232 = vmatpush.msra.mxu3 %v5159_v59 }
 0x59c   :  { %2173 = vmatpush.msrb.mxu0 %v5153_v30  ;;  %2076 = vmatpush.msrb.mxu2 %v5368_v0  ;;  %vm1624_vm11 = vcmp.eq.f32.partialorder %v1623_v53, 8.507059e+37 }
 0x59d   :  { %v3548_v48 = vpop.eup %3547  ;;  %2193 = vmatpush.msrb.mxu1 %v5157_v9  ;;  %2233 = vmatpush.msra.mxu3 %v5166_v52 }
 0x59e   :  { %v5355_v6 = vadd.f32 1.0, %v3548_v48  ;;  %2212 = vmatpush.msra.mxu2 %v5185_v24  ;;  %2174 = vmatpush.msrb.mxu0 %v5162_v28 }
 0x59f   :  { %v3550_v15 = vpop.eup %3549  ;;  %2194 = vmatpush.msrb.mxu1 %v5164_v36  ;;  %2234 = vmatpush.msra.mxu3 %v5191_v29 }
 0x5a0   :  { %v3552_v42 = vpop.eup %3551  ;;  %v1615_v25 = vmul.f32 %v3550_v15, %v5305_v43  ;;  %3553 = vrcp.f32 %v5355_v6  ;;  %vm1620_vm5 = vweird.f32 %v3550_v15  ;;  %2213 = vmatpush.msra.mxu2 %v5188_v12  ;;  %2175 = vmatpush.msrb.mxu0 %v5195_v40  ;;  %v1645_v43 = vor.u32 1.1754944e-38, %v1644_v22 }
 0x5a1   :  { %v1634_v48 = vmul.f32 %v3552_v42, %v5313_v60  ;;  %3555 = vtanh.f32 %v1608_v26  ;;  %vm1639_vm6 = vweird.f32 %v3552_v42  ;;  %vm1621_vm9 = vmor %vm1619_vm7, %vm1620_vm5  ;;  %2195 = vmatpush.msrb.mxu1 %v5197_v27  ;;  %2235 = vmatpush.msra.mxu3 %v5207_v23  ;;  %vm1658_vm14 = vweird.f32 %v5355_v6 }
 0x5a2   :  { %v1616_v41 = vsub.f32 1.0, %v1615_v25  ;;  %vm1640_vm10 = vmor %vm1638_vm8, %vm1639_vm6  ;;  %2214 = vmatpush.msra.mxu2 %v5193_v37  ;;  %2176 = vmatpush.msrb.mxu0 %v5200_v38 }
 0x5a3   :  { %v1635_v19 = vsub.f32 1.0, %v1634_v48  ;;  %v1642_v48 = vand.u32 2147483647, %v5313_v60  ;;  %2196 = vmatpush.msrb.mxu1 %v5205_v35  ;;  %2236 = vmatpush.msra.mxu3 %v5215_v56 }
 0x5a4   :  { %v1617_v31 = vmul.f32 %v3550_v15, %v1616_v41  ;;  %v1626_v41 = vor.u32 1.1754944e-38, %v1625_v45  ;;  %2215 = vmatpush.msra.mxu2 %v5209_v34  ;;  %2177 = vmatpush.msrb.mxu0 %v5225_v44 }
 0x5a5   :  { %v1636_v25 = vmul.f32 %v3552_v42, %v1635_v19  ;;  %vm1643_vm12 = vcmp.eq.f32.partialorder %v1642_v48, 8.507059e+37  ;;  %2197 = vmatpush.msrb.mxu1 %v5227_v46  ;;  %2237 = vmatpush.msra.mxu3 %v5229_v47  ;;  %v6670_v48 = vld [vmem:[#allocation24_spill] sm:$0xff] }
 0x5a6   :  { %v5384_v26 = vpop.eup %3553  ;;  %v1618_v9 = vadd.f32 %v3550_v15, %v1617_v31  ;;  %2216 = vmatpush.msra.mxu2 %v5217_v62  ;;  %2178 = vmatpush.msrb.mxu0 %v5235_v1 }
 0x5a7   :  { %v1637_v19 = vadd.f32 %v3552_v42, %v1636_v25  ;;  %v1654_v52 = vmul.f32 %v5384_v26, %v5355_v6  ;;  %v3556_v60 = vpop.eup %3555  ;;  %vm1659_vm13 = vweird.f32 %v5384_v26  ;;  %2198 = vmatpush.msrb.mxu1 %v5237_v18  ;;  %2238 = vmatpush.msra.mxu3 %v5240_v4 }
 0x5a8   :  { %v1622_v31 = vsel %vm1621_vm9, %v3550_v15, %v1618_v9  ;;  %2217 = vmatpush.msra.mxu2 %v5233_v11  ;;  %2179 = vmatpush.msrb.mxu0 %v5247_v10  ;;  %vm1660_vm15 = vmor %vm1658_vm14, %vm1659_vm13 }
 0x5a9   :  { %v1627_v29 = vsel %vm1624_vm11, %v1626_v41, %v1622_v31  ;;  %v1641_v45 = vsel %vm1640_vm10, %v3552_v42, %v1637_v19  ;;  %v1655_v25 = vsub.f32 1.0, %v1654_v52  ;;  %2199 = vmatpush.msrb.mxu1 %v5249_v5  ;;  %2239 = vmatpush.msra.mxu3 %v5259_v2  ;;  %v6672_v41 = vld [vmem:[#allocation32_spill] sm:$0xff]  ;;  %v6673_v19 = vld [vmem:[#allocation25_spill] sm:$0xff]  ;;  %v6675_v31 = vld [vmem:[#allocation26_spill] sm:$0xff] }
 0x5aa   :  { %v1646_v36 = vsel %vm1643_vm12, %v1645_v43, %v1641_v45  ;;  %v1669_v40 = vmul.f32 %v3556_v60, %v1627_v29  ;;  %2218 = vmatpush.msra.mxu2 %v5245_v61  ;;  %2180 = vmatpush.msrb.mxu0 %v5255_v54  ;;  %v6674_v43 = vld [vmem:[#allocation37_spill] sm:$0xff]  ;;  %v6676_v60 = vld [vmem:[#allocation30_spill] sm:$0xff] }
 0x5ab   :  { %v1668_v53 = vmul.f32 %v1646_v36, %v5134_v33  ;;  %v1656_v9 = vmul.f32 %v5384_v26, %v1655_v25  ;;  %v1664_v33 = vand.u32 2147483648, %v5355_v6  ;;  %v1662_v36 = vand.u32 2147483647, %v5355_v6  ;;  %2200 = vmatpush.msrb.mxu1 %v5257_v51  ;;  %2240 = vmatpush.msra.mxu3 %v5266_v32  ;;  %v6677_v45 = vld [vmem:[#allocation38_spill] sm:$0xff]  ;;  %v6678_v25 = vld [vmem:[#allocation40_spill] sm:$0xff] }
 0x5ac   :  { %2219 = vmatpush.msra.mxu2 %v5279_v20  ;;  %2181 = vmatpush.msrb.mxu0 %v5262_v55 }
 0x5ad   :  { %v1670_v52 = vadd.f32 %v1669_v40, %v1668_v53  ;;  %v1657_v29 = vadd.f32 %v5384_v26, %v1656_v9  ;;  %v1665_v22 = vor.u32 1.1754944e-38, %v1664_v33  ;;  %vm1663_vm0 = vcmp.eq.f32.partialorder %v1662_v36, 8.507059e+37  ;;  %2201 = vmatpush.msrb.mxu1 %v5264_v3  ;;  %2241 = vmatpush.msra.mxu3 %v5272_v63  ;;  %v6680_v9 = vld [vmem:[#allocation33_spill] sm:$0xff]  ;;  %v6683_v33 = vld [vmem:[#allocation35_spill] sm:$0xff]  ;;  %v6684_v36 = vld [vmem:[#allocation44_spill] sm:$0xff] }
 0x5ae   :  { %2220 = vmatpush.msra.mxu2 %v5285_v7  ;;  %2182 = vmatpush.msrb.mxu0 %v5275_v16  ;;  %v6679_v53 = vmov 0.0  }
 0x5af   :  { %3557 = vtanh.f32 %v1670_v52  ;;  %v1661_v40 = vsel %vm1660_vm15, %v5384_v26, %v1657_v29  ;;  %2202 = vmatpush.msrb.mxu1 %v5277_v17  ;;  %2242 = vmatpush.msra.mxu3 %v5283_v14  ;;  %v6671_v26 = vld [vmem:[#allocation23_spill] sm:$0xff]  ;;  %v6682_v29 = vld [vmem:[#allocation34_spill] sm:$0xff] }
 0x5b0   :  { %v1666_v15 = vsel %vm1663_vm0, %v1665_v22, %v1661_v40  ;;  %2221 = vmatpush.msra.mxu2 %v5297_v57  ;;  %2183 = vmatpush.msrb.mxu0 %v5289_v49  ;;  %v6681_v52 = vld [vmem:[#allocation39_spill] sm:$0xff]  ;;  %v6686_v22 = vld [vmem:[#allocation21_spill] sm:$0xff] }
 0x5b1   :  { %2203 = vmatpush.msrb.mxu1 %v6670_v48  ;;  %2243 = vmatpush.msra.mxu3 %v6671_v26  ;;  %v6685_v40 = vld [vmem:[#allocation27_spill] sm:$0xff] }
 0x5b2   :  { %2222 = vmatpush.msra.mxu2 %v5309_v39  ;;  %2184 = vmatpush.msrb.mxu0 %v6673_v19 }
 0x5b3   :  { %2204 = vmatpush.msrb.mxu1 %v6674_v43  ;;  %2244 = vmatpush.msra.mxu3 %v6675_v31 }
 0x5b4   :  { %2223 = vmatpush.msra.mxu2 %v6672_v41  ;;  %2185 = vmatpush.msrb.mxu0 %v6676_v60 }
 0x5b5   :  { %v3558_v6 = vpop.eup %3557  ;;  %2205 = vmatpush.msrb.mxu1 %v6677_v45  ;;  %2245 = vmatpush.msra.mxu3 %v6678_v25 }
 0x5b6   :  { %v1672_v42 = vmul.f32 %v3558_v6, %v1666_v15  ;;  %2224 = vmatpush.msra.mxu2 %v5337_v21  ;;  %2186 = vmatpush.msrb.mxu0 %v5329_v8  ;;  %v6687_v6 = vld [vmem:[#allocation50_spill] sm:$0xff]  ;;  %v6688_v15 = vld [vmem:[#allocation20_spill] sm:$0xff] }
 0x5b7   :  { %2206 = vmatpush.msrb.mxu1 %v6680_v9  ;;  %2246 = vmatpush.msra.mxu3 %v6681_v52 }
 0x5b8   :  { %1794 = vmatmul.f32.gmra.mxu0 %v1672_v42  ;;  %1835 = vmatmul.f32.gmra.mxu1 %v1672_v42 }
 0x5b9   :  { %1876 = vmatmul.f32.gmra.mxu2 %v1672_v42  ;;  %1917 = vmatmul.f32.gmra.mxu3 %v1672_v42  ;;  %v6689_v42 = vld [vmem:[#allocation51_spill] sm:$0xff] }
 0x5ba   :  { %2225 = vmatpush.msra.mxu2 %v5349_v58  ;;  %2187 = vmatpush.msrb.mxu0 %v6682_v29 }
 0x5bb   :  { %2207 = vmatpush.msrb.mxu1 %v6683_v33  ;;  %2247 = vmatpush.msra.mxu3 %v6684_v36 }
 0x5bc   :  { %2226 = vmatpush.msra.mxu2 %v5361_v13 }
 0x5be   :  { %2227 = vmatpush.msra.mxu2 %v5368_v0 }
 0x5c0   :  { %2037 = vmatmul.f32.vlgmr.msra.gmra.mxu0 %v6679_v53  ;;  %2057 = vmatmul.f32.vlgmr.msra.gmra.mxu1 %v6679_v53 }
 0x5c1   :  { %2077 = vmatmul.f32.vlgmr.msrb.gmra.mxu2 %v6679_v53  ;;  %2097 = vmatmul.f32.vlgmr.msrb.gmra.mxu3 %v6679_v53  ;;  %v6690_v53 = vld [vmem:[#allocation61_spill] sm:$0xff] }
 0x5c2   :  { %2323 = vmatpush.msra.mxu0 %v6685_v40  ;;  %2343 = vmatpush.msra.mxu1 %v5151_v50 }
 0x5c3   :  { %2363 = vmatpush.msrb.mxu2 %v5185_v24  ;;  %2383 = vmatpush.msrb.mxu3 %v5159_v59 }
 0x5c4   :  { %2324 = vmatpush.msra.mxu0 %v5153_v30  ;;  %2344 = vmatpush.msra.mxu1 %v6686_v22 }
 0x5c5   :  { %2364 = vmatpush.msrb.mxu2 %v5188_v12  ;;  %2384 = vmatpush.msrb.mxu3 %v6687_v6 }
 0x5c6   :  { %2325 = vmatpush.msra.mxu0 %v5162_v28  ;;  %2345 = vmatpush.msra.mxu1 %v6688_v15 }
 0x5c7   :  { %2365 = vmatpush.msrb.mxu2 %v5193_v37  ;;  %2385 = vmatpush.msrb.mxu3 %v6689_v42 }
 0x5c8   :  { %2326 = vmatpush.msra.mxu0 %v6690_v53  ;;  %2346 = vmatpush.msra.mxu1 %v5197_v27 }
 0x5c9   :  { %2366 = vmatpush.msrb.mxu2 %v5209_v34  ;;  %2386 = vmatpush.msrb.mxu3 %v5207_v23 }
 0x5ca   :  { %2327 = vmatpush.msra.mxu0 %v5200_v38  ;;  %2347 = vmatpush.msra.mxu1 %v5205_v35 }
 0x5cb   :  { %2367 = vmatpush.msrb.mxu2 %v5217_v62  ;;  %2387 = vmatpush.msrb.mxu3 %v5215_v56 }
 0x5cc   :  { %2328 = vmatpush.msra.mxu0 %v5225_v44  ;;  %2348 = vmatpush.msra.mxu1 %v5227_v46 }
 0x5cd   :  { %2368 = vmatpush.msrb.mxu2 %v5233_v11  ;;  %2388 = vmatpush.msrb.mxu3 %v5229_v47 }
 0x5ce   :  { %2329 = vmatpush.msra.mxu0 %v5235_v1  ;;  %2349 = vmatpush.msra.mxu1 %v5237_v18 }
 0x5cf   :  { %2369 = vmatpush.msrb.mxu2 %v5245_v61  ;;  %2389 = vmatpush.msrb.mxu3 %v5240_v4 }
 0x5d0   :  { %2330 = vmatpush.msra.mxu0 %v5247_v10  ;;  %2350 = vmatpush.msra.mxu1 %v5249_v5 }
 0x5d1   :  { %2370 = vmatpush.msrb.mxu2 %v5279_v20  ;;  %2390 = vmatpush.msrb.mxu3 %v5259_v2 }
 0x5d2   :  { %2331 = vmatpush.msra.mxu0 %v5255_v54  ;;  %2351 = vmatpush.msra.mxu1 %v5257_v51 }
 0x5d3   :  { %2371 = vmatpush.msrb.mxu2 %v5285_v7  ;;  %2391 = vmatpush.msrb.mxu3 %v5266_v32 }
 0x5d4   :  { %2332 = vmatpush.msra.mxu0 %v5262_v55  ;;  %2352 = vmatpush.msra.mxu1 %v5264_v3 }
 0x5d5   :  { %2372 = vmatpush.msrb.mxu2 %v5297_v57  ;;  %2392 = vmatpush.msrb.mxu3 %v5272_v63 }
 0x5d6   :  { %2333 = vmatpush.msra.mxu0 %v5275_v16  ;;  %2353 = vmatpush.msra.mxu1 %v5277_v17 }
 0x5d7   :  { %2373 = vmatpush.msrb.mxu2 %v5309_v39  ;;  %2393 = vmatpush.msrb.mxu3 %v5283_v14 }
 0x5d8   :  { %2334 = vmatpush.msra.mxu0 %v5289_v49  ;;  %2354 = vmatpush.msra.mxu1 %v6670_v48 }
 0x5d9   :  { %2374 = vmatpush.msrb.mxu2 %v6672_v41  ;;  %2394 = vmatpush.msrb.mxu3 %v6671_v26 }
 0x5da   :  { %2335 = vmatpush.msra.mxu0 %v6673_v19  ;;  %2355 = vmatpush.msra.mxu1 %v6674_v43 }
 0x5db   :  { %2375 = vmatpush.msrb.mxu2 %v5337_v21  ;;  %2395 = vmatpush.msrb.mxu3 %v6675_v31 }
 0x5dc   :  { %2336 = vmatpush.msra.mxu0 %v6676_v60  ;;  %2356 = vmatpush.msra.mxu1 %v6677_v45  ;;  %v1774_v45 = vpop.f32.mrf.mxu0  ;;  %v1897_v60 = vpop.f32.mrf.mxu3 }
 0x5dd   :  { %2376 = vmatpush.msrb.mxu2 %v5349_v58  ;;  %2396 = vmatpush.msrb.mxu3 %v6678_v25  ;;  %v1815_v58 = vpop.f32.mrf.mxu1 }
 0x5de   :  { %2337 = vmatpush.msra.mxu0 %v5329_v8  ;;  %2357 = vmatpush.msra.mxu1 %v6680_v9  ;;  %v1856_v9 = vpop.f32.mrf.mxu2 }
 0x5df   :  { %2377 = vmatpush.msrb.mxu2 %v5361_v13  ;;  %2397 = vmatpush.msrb.mxu3 %v6681_v52 }
 0x5e0   :  { %2338 = vmatpush.msra.mxu0 %v6682_v29  ;;  %2358 = vmatpush.msra.mxu1 %v6683_v33 }
 0x5e1   :  { %2378 = vmatpush.msrb.mxu2 %v5368_v0  ;;  %2398 = vmatpush.msrb.mxu3 %v6684_v36 }
 0x5e4   :  { %v5524_v25 = vpop.f32.mrf.mxu0  ;;  %v5528_v31 = vpop.f32.mrf.mxu3 }
 0x5e5   :  { %6691 = vst [vmem:[#allocation52_spill] sm:$0xff] %v5524_v25  ;;  %v5526_v8 = vpop.f32.mrf.mxu1 }
 0x5e6   :  { %6692 = vst [vmem:[#allocation48_spill] sm:$0xff] %v5526_v8  ;;  %v5534_v29 = vpop.f32.mrf.mxu2 }
 0x5e7   :  { %6693 = vst [vmem:[#allocation49_spill] sm:$0xff] %v5528_v31 }
 0x5e8   :  { %6696 = vst [vmem:[#allocation62_spill] sm:$0xff] %v5534_v29 }
 0x5ec   :  { %v5530_v13 = vpop.f32.mrf.mxu0  ;;  %v5536_v33 = vpop.f32.mrf.mxu3 }
 0x5ed   :  { %6694 = vst [vmem:[#allocation57_spill] sm:$0xff] %v5530_v13  ;;  %v5532_v52 = vpop.f32.mrf.mxu1 }
 0x5ee   :  { %6695 = vst [vmem:[#allocation56_spill] sm:$0xff] %v5532_v52  ;;  %v5542_v21 = vpop.f32.mrf.mxu2 }
 0x5ef   :  { %6697 = vst [vmem:[#allocation58_spill] sm:$0xff] %v5536_v33 }
 0x5f0   :  { %6700 = vst [vmem:[#allocation72_spill] sm:$0xff] %v5542_v21 }
 0x5f4   :  { %v5538_v0 = vpop.f32.mrf.mxu0  ;;  %v5544_v25 = vpop.f32.mrf.mxu3 }
 0x5f5   :  { %6698 = vst [vmem:[#allocation63_spill] sm:$0xff] %v5538_v0  ;;  %v5540_v36 = vpop.f32.mrf.mxu1 }
 0x5f6   :  { %6699 = vst [vmem:[#allocation59_spill] sm:$0xff] %v5540_v36  ;;  %v5550_v31 = vpop.f32.mrf.mxu2 }
 0x5f7   :  { %6701 = vst [vmem:[#allocation67_spill] sm:$0xff] %v5544_v25 }
 0x5f8   :  { %6704 = vst [vmem:[#allocation42_spill] sm:$0xff] %v5550_v31 }
 0x5fc   :  { %v5546_v8 = vpop.f32.mrf.mxu0  ;;  %v5552_v13 = vpop.f32.mrf.mxu3 }
 0x5fd   :  { %6702 = vst [vmem:[#allocation73_spill] sm:$0xff] %v5546_v8  ;;  %v5548_v43 = vpop.f32.mrf.mxu1 }
 0x5fe   :  { %6703 = vst [vmem:[#allocation66_spill] sm:$0xff] %v5548_v43  ;;  %v5558_v33 = vpop.f32.mrf.mxu2 }
 0x5ff   :  { %6705 = vst [vmem:[#allocation43_spill] sm:$0xff] %v5552_v13  ;;  %v1747_v13 = vld [vmem:[%s6149_s6] sm:$0xf] }
 0x600   :  { %6708 = vst [vmem:[#allocation74_spill] sm:$0xff] %v5558_v33  ;;  %v5579_v33 = vperm.slane %v1747_v13, 1  ;;  %v5587_v41 = vperm.slane %v1747_v13, 3 }
 0x602   :  { %6717 = vst [vmem:[#allocation21_spill] sm:$0xff] %v5579_v33  ;;  %v1898_v48 = vadd.f32 %v1897_v60, %v5587_v41 }
 0x603   :  { %6720 = vst [vmem:[#allocation51_spill] sm:$0xff] %v5587_v41 }
 0x604   :  { %v5554_v52 = vpop.f32.mrf.mxu0  ;;  %v5560_v0 = vpop.f32.mrf.mxu3 }
 0x605   :  { %6706 = vst [vmem:[#allocation69_spill] sm:$0xff] %v5554_v52  ;;  %v5556_v29 = vpop.f32.mrf.mxu1 }
 0x606   :  { %6707 = vst [vmem:[#allocation68_spill] sm:$0xff] %v5556_v29  ;;  %v5566_v25 = vpop.f32.mrf.mxu2  ;;  %v5577_v29 = vperm.slane %v1747_v13, 0 }
 0x607   :  { %6709 = vst [vmem:[#allocation18_spill] sm:$0xff] %v5560_v0 }
 0x608   :  { %6712 = vst [vmem:[#allocation46_spill] sm:$0xff] %v5566_v25 }
 0x609   :  { %6716 = vst [vmem:[#allocation27_spill] sm:$0xff] %v5577_v29 }
 0x60c   :  { %v5562_v36 = vpop.f32.mrf.mxu0  ;;  %v5568_v8 = vpop.f32.mrf.mxu3 }
 0x60d   :  { %6710 = vst [vmem:[#allocation29_spill] sm:$0xff] %v5562_v36  ;;  %v5564_v21 = vpop.f32.mrf.mxu1  ;;  %v1775_v36 = vadd.f32 %v1774_v45, %v5577_v29 }
 0x60e   :  { %6711 = vst [vmem:[#allocation19_spill] sm:$0xff] %v5564_v21  ;;  %v1816_v21 = vadd.f32 %v1815_v58, %v5579_v33  ;;  %v5583_v0 = vpop.f32.mrf.mxu2 }
 0x60f   :  { %6713 = vst [vmem:[#allocation47_spill] sm:$0xff] %v5568_v8 }
 0x610   :  { %6718 = vst [vmem:[#allocation50_spill] sm:$0xff] %v5583_v0 }
 0x635   :  { %v5573_v43 = vpop.f32.mrf.mxu0  ;;  %v5575_v52 = vpop.f32.mrf.mxu1 }
 0x636   :  { %6714 = vst [vmem:[#allocation71_spill] sm:$0xff] %v5573_v43 }
 0x637   :  { %6715 = vst [vmem:[#allocation70_spill] sm:$0xff] %v5575_v52 }
 0x63c   :  { %v5585_v25 = vpop.f32.mrf.mxu3  ;;  %v5590_v49 = vpop.f32.mrf.mxu2 }
 0x63d   :  { %6719 = vst [vmem:[#allocation20_spill] sm:$0xff] %v5585_v25  ;;  %v2038_v8 = vpop.f32.mrf.mxu0  ;;  %v2058_v31 = vpop.f32.mrf.mxu1 }
 0x63e   :  { %v2101_v19 = vadd.f32 %v2038_v8, %v1775_v36  ;;  %v2102_v26 = vadd.f32 %v2058_v31, %v1816_v21  ;;  %6721 = vst [vmem:[#allocation61_spill] sm:$0xff] %v5590_v49  ;;  %v5592_v8 = vperm.slane %v1747_v13, 2 }
 0x640   :  { %v3390_v43 = vmul.f32 -1.442695, %v2101_v19  ;;  %v3391_v52 = vmul.f32 -1.442695, %v2102_v26  ;;  %6722 = vst [vmem:[#allocation75_spill] sm:$0xff] %v5592_v8  ;;  %v1857_v19 = vadd.f32 %v1856_v9, %v5592_v8 }
 0x642   :  { %3559 = vpow2.f32 %v3390_v43 }
 0x643   :  { %3561 = vpow2.f32 %v3391_v52 }
 0x644   :  { %v2098_v45 = vpop.f32.mrf.mxu3  ;;  %v2078_v21 = vpop.f32.mrf.mxu2 }
 0x645   :  { %v2104_v58 = vadd.f32 %v2098_v45, %v1898_v48  ;;  %v2103_v60 = vadd.f32 %v2078_v21, %v1857_v19 }
 0x647   :  { %v3392_v33 = vmul.f32 -1.442695, %v2104_v58 }
 0x648   :  { %v3560_v0 = vpop.eup %3559 }
 0x649   :  { %v3562_v29 = vpop.eup %3561  ;;  %v2108_v25 = vadd.f32 1.0, %v3560_v0  ;;  %3563 = vpow2.f32 %v3392_v33 }
 0x64a   :  { %v2127_v14 = vadd.f32 1.0, %v3562_v29 }
 0x64b   :  { %3565 = vrcp.f32 %v2108_v25  ;;  %v2120_v0 = vand.u32 2147483648, %v2108_v25  ;;  %v2118_v33 = vand.u32 2147483647, %v2108_v25  ;;  %vm2114_vm3 = vweird.f32 %v2108_v25 }
 0x64c   :  { %3567 = vrcp.f32 %v2127_v14  ;;  %v2139_v29 = vand.u32 2147483648, %v2127_v14  ;;  %v2137_v41 = vand.u32 2147483647, %v2127_v14  ;;  %vm2133_vm4 = vweird.f32 %v2127_v14 }
 0x64d   :  { %v2121_v21 = vor.u32 1.1754944e-38, %v2120_v0  ;;  %vm2119_vm6 = vcmp.eq.f32.partialorder %v2118_v33, 8.507059e+37 }
 0x64e   :  { %v2140_v8 = vor.u32 1.1754944e-38, %v2139_v29  ;;  %vm2138_vm8 = vcmp.eq.f32.partialorder %v2137_v41, 8.507059e+37 }
 0x64f   :  { %v3564_v26 = vpop.eup %3563 }
 0x650   :  { %v2147_v43 = vadd.f32 1.0, %v3564_v26 }
 0x651   :  { %v3566_v31 = vpop.eup %3565 }
 0x652   :  { %v3568_v52 = vpop.eup %3567  ;;  %v2110_v36 = vmul.f32 %v3566_v31, %v2108_v25  ;;  %3569 = vrcp.f32 %v2147_v43  ;;  %vm2115_vm1 = vweird.f32 %v3566_v31  ;;  %vm2153_vm10 = vweird.f32 %v2147_v43 }
 0x653   :  { %v2129_v48 = vmul.f32 %v3568_v52, %v2127_v14  ;;  %3571 = vtanh.f32 %v2103_v60  ;;  %vm2134_vm2 = vweird.f32 %v3568_v52  ;;  %vm2116_vm5 = vmor %vm2114_vm3, %vm2115_vm1  ;;  %v2157_v25 = vand.u32 2147483647, %v2147_v43 }
 0x654   :  { %v2111_v45 = vsub.f32 1.0, %v2110_v36  ;;  %vm2135_vm7 = vmor %vm2133_vm4, %vm2134_vm2 }
 0x655   :  { %v2130_v58 = vsub.f32 1.0, %v2129_v48  ;;  %vm2158_vm12 = vcmp.eq.f32.partialorder %v2157_v25, 8.507059e+37 }
 0x656   :  { %v2112_v13 = vmul.f32 %v3566_v31, %v2111_v45 }
 0x657   :  { %v2131_v49 = vmul.f32 %v3568_v52, %v2130_v58 }
 0x658   :  { %v3570_v39 = vpop.eup %3569  ;;  %v2113_v9 = vadd.f32 %v3566_v31, %v2112_v13 }
 0x659   :  { %v2132_v26 = vadd.f32 %v3568_v52, %v2131_v49  ;;  %v2149_v19 = vmul.f32 %v3570_v39, %v2147_v43  ;;  %v3572_v60 = vpop.eup %3571  ;;  %vm2154_vm9 = vweird.f32 %v3570_v39  ;;  %v2159_v49 = vand.u32 2147483648, %v2147_v43 }
 0x65a   :  { %v2117_v36 = vsel %vm2116_vm5, %v3566_v31, %v2113_v9  ;;  %vm2155_vm11 = vmor %vm2153_vm10, %vm2154_vm9 }
 0x65b   :  { %v2122_v48 = vsel %vm2119_vm6, %v2121_v21, %v2117_v36  ;;  %v2136_v45 = vsel %vm2135_vm7, %v3568_v52, %v2132_v26  ;;  %v2150_v17 = vsub.f32 1.0, %v2149_v19  ;;  %v2160_v0 = vor.u32 1.1754944e-38, %v2159_v49  ;;  %v6755_v36 = vld [vmem:[#allocation75_spill] sm:$0xff] }
 0x65c   :  { %v2141_v58 = vsel %vm2138_vm8, %v2140_v8, %v2136_v45  ;;  %v2164_v16 = vmul.f32 %v3572_v60, %v2122_v48  ;;  %v6756_v60 = vld [vmem:[#allocation62_spill] sm:$0xff] }
 0x65d   :  { %v2163_v63 = vmul.f32 0.0, %v2141_v58  ;;  %v2151_v57 = vmul.f32 %v3570_v39, %v2150_v17  ;;  %v1860_v48 = vadd.f32 %v6756_v60, %v6755_v36  ;;  %v5731_v60 = vld [vmem:[#allocation9 + $0x178] sm:$0xff] }
 0x65f   :  { %v5595_v13 = vadd.f32 %v2164_v16, %v2163_v63  ;;  %v2152_v14 = vadd.f32 %v3570_v39, %v2151_v57  ;;  %v6752_v63 = vld [vmem:[#allocation48_spill] sm:$0xff] }
 0x661   :  { %3573 = vtanh.f32 %v5595_v13  ;;  %v2156_v31 = vsel %vm2155_vm11, %v3570_v39, %v2152_v14 }
 0x662   :  { %v2161_v41 = vsel %vm2158_vm12, %v2160_v0, %v2156_v31 }
 0x667   :  { %v3574_v52 = vpop.eup %3573 }
 0x668   :  { %v2167_v29 = vmul.f32 %v3574_v52, %v2161_v41 }
 0x66a   :  { %2188 = vmatmul.f32.vlgmr.msrb.gmra.mxu0 %v2167_v29  ;;  %2208 = vmatmul.f32.vlgmr.msrb.gmra.mxu1 %v2167_v29 }
 0x66b   :  { %2228 = vmatmul.f32.vlgmr.msra.gmra.mxu2 %v2167_v29  ;;  %2248 = vmatmul.f32.vlgmr.msra.gmra.mxu3 %v2167_v29 }
 0x66c   :  { %2474 = vmatpush.msrb.mxu0 %v6685_v40  ;;  %2494 = vmatpush.msrb.mxu1 %v5151_v50  ;;  %v6723_v50 = vld [vmem:[#allocation22_spill] sm:$0xff] }
 0x66d   :  { %2514 = vmatpush.msra.mxu2 %v5185_v24  ;;  %2534 = vmatpush.msra.mxu3 %v5159_v59  ;;  %v6725_v59 = vld [vmem:[#allocation54_spill] sm:$0xff]  ;;  %v6727_v24 = vld [vmem:[#allocation28_spill] sm:$0xff] }
 0x66e   :  { %2475 = vmatpush.msrb.mxu0 %v5153_v30  ;;  %2495 = vmatpush.msrb.mxu1 %v6686_v22  ;;  %v6724_v30 = vld [vmem:[#allocation60_spill] sm:$0xff]  ;;  %v6753_v22 = vld [vmem:[#allocation51_spill] sm:$0xff] }
 0x66f   :  { %2515 = vmatpush.msra.mxu2 %v5188_v12  ;;  %2535 = vmatpush.msra.mxu3 %v6687_v6  ;;  %v6728_v12 = vld [vmem:[#allocation65_spill] sm:$0xff] }
 0x670   :  { %2476 = vmatpush.msrb.mxu0 %v5162_v28  ;;  %2496 = vmatpush.msrb.mxu1 %v6688_v15  ;;  %v6726_v28 = vld [vmem:[#allocation55_spill] sm:$0xff]  ;;  %v6754_v6 = vld [vmem:[#allocation49_spill] sm:$0xff] }
 0x671   :  { %2516 = vmatpush.msra.mxu2 %v5193_v37  ;;  %2536 = vmatpush.msra.mxu3 %v6689_v42  ;;  %v6729_v37 = vld [vmem:[#allocation64_spill] sm:$0xff]  ;;  %v1901_v15 = vadd.f32 %v6754_v6, %v6753_v22  ;;  %v5698_v6 = vld [vmem:[#allocation9 + $0x1a0] sm:$0xff] }
 0x672   :  { %2477 = vmatpush.msrb.mxu0 %v6690_v53  ;;  %2497 = vmatpush.msrb.mxu1 %v5197_v27  ;;  %v6730_v27 = vld [vmem:[#allocation24_spill] sm:$0xff] }
 0x673   :  { %2517 = vmatpush.msra.mxu2 %v5209_v34  ;;  %2537 = vmatpush.msra.mxu3 %v5207_v23  ;;  %v6733_v23 = vld [vmem:[#allocation25_spill] sm:$0xff] }
 0x674   :  { %2478 = vmatpush.msrb.mxu0 %v5200_v38  ;;  %2498 = vmatpush.msrb.mxu1 %v5205_v35  ;;  %v6731_v38 = vld [vmem:[#allocation32_spill] sm:$0xff]  ;;  %v6732_v35 = vld [vmem:[#allocation23_spill] sm:$0xff]  ;;  %v6734_v34 = vld [vmem:[#allocation37_spill] sm:$0xff] }
 0x675   :  { %2518 = vmatpush.msra.mxu2 %v5217_v62  ;;  %2538 = vmatpush.msra.mxu3 %v5215_v56  ;;  %v6735_v56 = vld [vmem:[#allocation36_spill] sm:$0xff]  ;;  %v6736_v62 = vld [vmem:[#allocation26_spill] sm:$0xff] }
 0x676   :  { %2479 = vmatpush.msrb.mxu0 %v5225_v44  ;;  %2499 = vmatpush.msrb.mxu1 %v5227_v46  ;;  %v6737_v44 = vld [vmem:[#allocation30_spill] sm:$0xff] }
 0x677   :  { %2519 = vmatpush.msra.mxu2 %v5233_v11  ;;  %2539 = vmatpush.msra.mxu3 %v5229_v47  ;;  %v6738_v46 = vld [vmem:[#allocation38_spill] sm:$0xff]  ;;  %v6739_v47 = vld [vmem:[#allocation41_spill] sm:$0xff]  ;;  %v6740_v11 = vld [vmem:[#allocation40_spill] sm:$0xff] }
 0x678   :  { %2480 = vmatpush.msrb.mxu0 %v5235_v1  ;;  %2500 = vmatpush.msrb.mxu1 %v5237_v18  ;;  %v6741_v1 = vld [vmem:[#allocation31_spill] sm:$0xff]  ;;  %v6742_v18 = vld [vmem:[#allocation33_spill] sm:$0xff] }
 0x679   :  { %2520 = vmatpush.msra.mxu2 %v5245_v61  ;;  %2540 = vmatpush.msra.mxu3 %v5240_v4  ;;  %v6743_v4 = vld [vmem:[#allocation45_spill] sm:$0xff]  ;;  %v6744_v61 = vld [vmem:[#allocation39_spill] sm:$0xff] }
 0x67a   :  { %2481 = vmatpush.msrb.mxu0 %v5247_v10  ;;  %2501 = vmatpush.msrb.mxu1 %v5249_v5  ;;  %v6745_v10 = vld [vmem:[#allocation34_spill] sm:$0xff]  ;;  %v6746_v5 = vld [vmem:[#allocation35_spill] sm:$0xff] }
 0x67b   :  { %2521 = vmatpush.msra.mxu2 %v5279_v20  ;;  %2541 = vmatpush.msra.mxu3 %v5259_v2  ;;  %v6749_v2 = vld [vmem:[#allocation27_spill] sm:$0xff] }
 0x67c   :  { %2482 = vmatpush.msrb.mxu0 %v5255_v54  ;;  %2502 = vmatpush.msrb.mxu1 %v5257_v51  ;;  %v6747_v54 = vld [vmem:[#allocation53_spill] sm:$0xff]  ;;  %v6748_v51 = vld [vmem:[#allocation44_spill] sm:$0xff] }
 0x67d   :  { %2522 = vmatpush.msra.mxu2 %v5285_v7  ;;  %2542 = vmatpush.msra.mxu3 %v5266_v32  ;;  %v6751_v32 = vld [vmem:[#allocation21_spill] sm:$0xff] }
 0x67e   :  { %2483 = vmatpush.msrb.mxu0 %v5262_v55  ;;  %2503 = vmatpush.msrb.mxu1 %v5264_v3  ;;  %v6750_v55 = vld [vmem:[#allocation52_spill] sm:$0xff]  ;;  %v1819_v16 = vadd.f32 %v6752_v63, %v6751_v32 }
 0x67f   :  { %2523 = vmatpush.msra.mxu2 %v6723_v50  ;;  %2543 = vmatpush.msra.mxu3 %v6724_v30  ;;  %v1778_v3 = vadd.f32 %v6750_v55, %v6749_v2 }
 0x680   :  { %2484 = vmatpush.msrb.mxu0 %v6725_v59  ;;  %2504 = vmatpush.msrb.mxu1 %v6726_v28 }
 0x681   :  { %2524 = vmatpush.msra.mxu2 %v6727_v24  ;;  %2544 = vmatpush.msra.mxu3 %v6728_v12 }
 0x682   :  { %2485 = vmatpush.msrb.mxu0 %v6729_v37  ;;  %2505 = vmatpush.msrb.mxu1 %v6730_v27 }
 0x683   :  { %2525 = vmatpush.msra.mxu2 %v6731_v38  ;;  %2545 = vmatpush.msra.mxu3 %v6732_v35 }
 0x684   :  { %2486 = vmatpush.msrb.mxu0 %v6733_v23  ;;  %2506 = vmatpush.msrb.mxu1 %v6734_v34 }
 0x685   :  { %2526 = vmatpush.msra.mxu2 %v6735_v56  ;;  %2546 = vmatpush.msra.mxu3 %v6736_v62 }
 0x686   :  { %2487 = vmatpush.msrb.mxu0 %v6737_v44  ;;  %2507 = vmatpush.msrb.mxu1 %v6738_v46 }
 0x687   :  { %2527 = vmatpush.msra.mxu2 %v6739_v47  ;;  %2547 = vmatpush.msra.mxu3 %v6740_v11 }
 0x688   :  { %2488 = vmatpush.msrb.mxu0 %v6741_v1  ;;  %2508 = vmatpush.msrb.mxu1 %v6742_v18 }
 0x689   :  { %2528 = vmatpush.msra.mxu2 %v6743_v4  ;;  %2548 = vmatpush.msra.mxu3 %v6744_v61 }
 0x68a   :  { %2489 = vmatpush.msrb.mxu0 %v6745_v10  ;;  %2509 = vmatpush.msrb.mxu1 %v6746_v5 }
 0x68b   :  { %2529 = vmatpush.msra.mxu2 %v6747_v54  ;;  %2549 = vmatpush.msra.mxu3 %v6748_v51 }
 0x6e7   :  { %v2189_v17 = vpop.f32.mrf.mxu0  ;;  %v2209_v20 = vpop.f32.mrf.mxu1 }
 0x6e8   :  { %v2252_v7 = vadd.f32 %v2189_v17, %v1778_v3  ;;  %v2253_v57 = vadd.f32 %v2209_v20, %v1819_v16  ;;  %v5677_v16 = vld [vmem:[#allocation9 + $0x1e8] sm:$0xff]  ;;  %v5680_v17 = vld [vmem:[#allocation9 + $0x1f0] sm:$0xff]  ;;  %v5683_v20 = vld [vmem:[#allocation9 + $0x1f8] sm:$0xff] }
 0x6ea   :  { %v3393_v39 = vmul.f32 -1.442695, %v2252_v7  ;;  %v3394_v40 = vmul.f32 -1.442695, %v2253_v57  ;;  %v5686_v7 = vld [vmem:[#allocation9 + $0x1c0] sm:$0xff]  ;;  %v5689_v57 = vld [vmem:[#allocation9 + $0x1c8] sm:$0xff] }
 0x6ec   :  { %3575 = vpow2.f32 %v3393_v39  ;;  %v5692_v39 = vld [vmem:[#allocation9 + $0x1d0] sm:$0xff] }
 0x6ed   :  { %3577 = vpow2.f32 %v3394_v40  ;;  %v5695_v40 = vld [vmem:[#allocation9 + $0x1d8] sm:$0xff] }
 0x6ee   :  { %v2249_v42 = vpop.f32.mrf.mxu3  ;;  %v2229_v26 = vpop.f32.mrf.mxu2 }
 0x6ef   :  { %v2255_v53 = vadd.f32 %v2249_v42, %v1901_v15  ;;  %v2254_v14 = vadd.f32 %v2229_v26, %v1860_v48  ;;  %v5701_v15 = vld [vmem:[#allocation9 + $0x1a8] sm:$0xff]  ;;  %v5704_v42 = vld [vmem:[#allocation9 + $0x1b0] sm:$0xff]  ;;  %v5734_v48 = vld [vmem:[#allocation9 + $0x140] sm:$0xff] }
 0x6f0   :  { %v5725_v26 = vld [vmem:[#allocation9 + $0x168] sm:$0xff] }
 0x6f1   :  { %v3395_v8 = vmul.f32 -1.442695, %v2255_v53  ;;  %v5707_v53 = vld [vmem:[#allocation9 + $0x1b8] sm:$0xff] }
 0x6f2   :  { %v3576_v43 = vpop.eup %3575 }
 0x6f3   :  { %v3578_v33 = vpop.eup %3577  ;;  %v2259_v9 = vadd.f32 1.0, %v3576_v43  ;;  %3579 = vpow2.f32 %v3395_v8  ;;  %v5710_v8 = vld [vmem:[#allocation9 + $0x180] sm:$0xff]  ;;  %v5713_v43 = vld [vmem:[#allocation9 + $0x188] sm:$0xff] }
 0x6f4   :  { %v2278_v21 = vadd.f32 1.0, %v3578_v33  ;;  %v5716_v33 = vld [vmem:[#allocation9 + $0x190] sm:$0xff] }
 0x6f5   :  { %3581 = vrcp.f32 %v2259_v9  ;;  %v2271_v41 = vand.u32 2147483648, %v2259_v9  ;;  %v2269_v30 = vand.u32 2147483647, %v2259_v9  ;;  %vm2265_vm15 = vweird.f32 %v2259_v9 }
 0x6f6   :  { %3583 = vrcp.f32 %v2278_v21  ;;  %v2290_v29 = vand.u32 2147483648, %v2278_v21  ;;  %v2288_v28 = vand.u32 2147483647, %v2278_v21  ;;  %vm2284_vm0 = vweird.f32 %v2278_v21 }
 0x6f7   :  { %v2272_v37 = vor.u32 1.1754944e-38, %v2271_v41  ;;  %vm2270_vm3 = vcmp.eq.f32.partialorder %v2269_v30, 8.507059e+37  ;;  %v5761_v41 = vld [vmem:[#allocation9 + $0x108] sm:$0xff]  ;;  %v5770_v30 = vld [vmem:[#allocation9 + $0xe0] sm:$0xff] }
 0x6f8   :  { %v2291_v35 = vor.u32 1.1754944e-38, %v2290_v29  ;;  %vm2289_vm4 = vcmp.eq.f32.partialorder %v2288_v28, 8.507059e+37  ;;  %v5764_v29 = vld [vmem:[#allocation9 + $0x110] sm:$0xff] }
 0x6f9   :  { %v3580_v19 = vpop.eup %3579  ;;  %v5776_v28 = vld [vmem:[#allocation9 + $0xf0] sm:$0xff] }
 0x6fa   :  { %v2298_v45 = vadd.f32 1.0, %v3580_v19  ;;  %v5728_v19 = vld [vmem:[#allocation9 + $0x170] sm:$0xff] }
 0x6fb   :  { %v3582_v58 = vpop.eup %3581 }
 0x6fc   :  { %v3584_v49 = vpop.eup %3583  ;;  %v2261_v25 = vmul.f32 %v3582_v58, %v2259_v9  ;;  %3585 = vrcp.f32 %v2298_v45  ;;  %vm2266_vm13 = vweird.f32 %v3582_v58  ;;  %v2310_v61 = vand.u32 2147483648, %v2298_v45  ;;  %v5719_v9 = vld [vmem:[#allocation9 + $0x198] sm:$0xff] }
 0x6fd   :  { %v2280_v31 = vmul.f32 %v3584_v49, %v2278_v21  ;;  %3587 = vtanh.f32 %v2254_v14  ;;  %vm2285_vm14 = vweird.f32 %v3584_v49  ;;  %vm2267_vm1 = vmor %vm2265_vm15, %vm2266_vm13  ;;  %vm2304_vm6 = vweird.f32 %v2298_v45  ;;  %v5722_v21 = vld [vmem:[#allocation9 + $0x160] sm:$0xff]  ;;  %v5743_v14 = vld [vmem:[#allocation9 + $0x158] sm:$0xff] }
 0x6fe   :  { %v2262_v0 = vsub.f32 1.0, %v2261_v25  ;;  %vm2286_vm2 = vmor %vm2284_vm0, %vm2285_vm14  ;;  %v2308_v10 = vand.u32 2147483647, %v2298_v45  ;;  %v2311_v51 = vor.u32 1.1754944e-38, %v2310_v61  ;;  %v5749_v25 = vld [vmem:[#allocation9 + $0x128] sm:$0xff]  ;;  %v5827_v61 = vld [vmem:[#allocation9 + $0x78] sm:$0xff] }
 0x6ff   :  { %v2281_v52 = vsub.f32 1.0, %v2280_v31  ;;  %v5752_v31 = vld [vmem:[#allocation9 + $0x130] sm:$0xff]  ;;  %6770 = vst [vmem:[#allocation26_spill] sm:$0xff] %v5827_v61 }
 0x700   :  { %v2263_v50 = vmul.f32 %v3582_v58, %v2262_v0  ;;  %vm2309_vm8 = vcmp.eq.f32.partialorder %v2308_v10, 8.507059e+37  ;;  %v5755_v0 = vld [vmem:[#allocation9 + $0x138] sm:$0xff]  ;;  %v5830_v10 = vld [vmem:[#allocation9 + $0x40] sm:$0xff] }
 0x701   :  { %v2282_v59 = vmul.f32 %v3584_v49, %v2281_v52  ;;  %v5758_v52 = vld [vmem:[#allocation9 + $0x100] sm:$0xff]  ;;  %6771 = vst [vmem:[#allocation30_spill] sm:$0xff] %v5830_v10 }
 0x702   :  { %v3586_v24 = vpop.eup %3585  ;;  %v2264_v12 = vadd.f32 %v3582_v58, %v2263_v50  ;;  %v5767_v50 = vld [vmem:[#allocation9 + $0x118] sm:$0xff] }
 0x703   :  { %v2283_v27 = vadd.f32 %v3584_v49, %v2282_v59  ;;  %v2300_v38 = vmul.f32 %v3586_v24, %v2298_v45  ;;  %v3588_v34 = vpop.eup %3587  ;;  %vm2305_vm5 = vweird.f32 %v3586_v24  ;;  %v5737_v45 = vld [vmem:[#allocation9 + $0x148] sm:$0xff] }
 0x704   :  { %v2268_v23 = vsel %vm2267_vm1, %v3582_v58, %v2264_v12  ;;  %vm2306_vm7 = vmor %vm2304_vm6, %vm2305_vm5  ;;  %v5740_v58 = vld [vmem:[#allocation9 + $0x150] sm:$0xff]  ;;  %v5773_v59 = vld [vmem:[#allocation9 + $0xe8] sm:$0xff] }
 0x705   :  { %v2273_v56 = vsel %vm2270_vm3, %v2272_v37, %v2268_v23  ;;  %v2287_v62 = vsel %vm2286_vm2, %v3584_v49, %v2283_v27  ;;  %v2301_v44 = vsub.f32 1.0, %v2300_v38  ;;  %v5746_v49 = vld [vmem:[#allocation9 + $0x120] sm:$0xff]  ;;  %v5785_v37 = vld [vmem:[#allocation9 + $0xc8] sm:$0xff]  ;;  %v5788_v27 = vld [vmem:[#allocation9 + $0xd0] sm:$0xff] }
 0x706   :  { %v2292_v46 = vsel %vm2289_vm4, %v2291_v35, %v2287_v62  ;;  %v2315_v47 = vmul.f32 %v3588_v34, %v2273_v56  ;;  %v5782_v12 = vld [vmem:[#allocation9 + $0xc0] sm:$0xff]  ;;  %6757 = vst [vmem:[#allocation22_spill] sm:$0xff] %v5788_v27  ;;  %v5791_v38 = vld [vmem:[#allocation9 + $0xd8] sm:$0xff]  ;;  %v5797_v23 = vld [vmem:[#allocation9 + $0xa8] sm:$0xff] }
 0x707   :  { %v2314_v11 = vmul.f32 %v2292_v46, %v5595_v13  ;;  %v2302_v1 = vmul.f32 %v3586_v24, %v2301_v44  ;;  %v5674_v13 = vld [vmem:[#allocation9 + $0x1e0] sm:$0xff]  ;;  %6758 = vst [vmem:[#allocation60_spill] sm:$0xff] %v5791_v38  ;;  %v5800_v34 = vld [vmem:[#allocation9 + $0xb0] sm:$0xff]  ;;  %v5803_v56 = vld [vmem:[#allocation9 + $0xb8] sm:$0xff] }
 0x708   :  { %v5794_v35 = vld [vmem:[#allocation9 + $0xa0] sm:$0xff]  ;;  %6760 = vst [vmem:[#allocation55_spill] sm:$0xff] %v5797_v23  ;;  %v5809_v44 = vld [vmem:[#allocation9 + $0x88] sm:$0xff]  ;;  %v5812_v46 = vld [vmem:[#allocation9 + $0x90] sm:$0xff] }
 0x709   :  { %v5671_v18 = vadd.f32 %v2315_v47, %v2314_v11  ;;  %v2303_v4 = vadd.f32 %v3586_v24, %v2302_v1  ;;  %6759 = vst [vmem:[#allocation54_spill] sm:$0xff] %v5794_v35  ;;  %v5806_v62 = vld [vmem:[#allocation9 + $0x80] sm:$0xff]  ;;  %v5815_v47 = vld [vmem:[#allocation9 + $0x98] sm:$0xff]  ;;  %v5821_v1 = vld [vmem:[#allocation9 + $0x68] sm:$0xff] }
 0x70a   :  { %6761 = vst [vmem:[#allocation28_spill] sm:$0xff] %v5800_v34  ;;  %v5818_v11 = vld [vmem:[#allocation9 + $0x60] sm:$0xff] }
 0x70b   :  { %3589 = vtanh.f32 %v5671_v18  ;;  %v2307_v5 = vsel %vm2306_vm7, %v3586_v24, %v2303_v4  ;;  %v5779_v24 = vld [vmem:[#allocation9 + $0xf8] sm:$0xff]  ;;  %6762 = vst [vmem:[#allocation65_spill] sm:$0xff] %v5803_v56  ;;  %v5824_v4 = vld [vmem:[#allocation9 + $0x70] sm:$0xff] }
 0x70c   :  { %v2312_v3 = vsel %vm2309_vm8, %v2311_v51, %v2307_v5  ;;  %6763 = vst [vmem:[#allocation64_spill] sm:$0xff] %v5806_v62  ;;  %v5833_v5 = vld [vmem:[#allocation9 + $0x48] sm:$0xff]  ;;  %v5836_v51 = vld [vmem:[#allocation9 + $0x50] sm:$0xff] }
 0x70d   :  { %6764 = vst [vmem:[#allocation24_spill] sm:$0xff] %v5809_v44 }
 0x70e   :  { %6765 = vst [vmem:[#allocation32_spill] sm:$0xff] %v5812_v46 }
 0x70f   :  { %6766 = vst [vmem:[#allocation23_spill] sm:$0xff] %v5815_v47 }
 0x710   :  { %6767 = vst [vmem:[#allocation25_spill] sm:$0xff] %v5818_v11 }
 0x711   :  { %v3590_v55 = vpop.eup %3589  ;;  %6768 = vst [vmem:[#allocation37_spill] sm:$0xff] %v5821_v1 }
 0x712   :  { %v2318_v63 = vmul.f32 %v3590_v55, %v2312_v3  ;;  %6769 = vst [vmem:[#allocation36_spill] sm:$0xff] %v5824_v4  ;;  %v5839_v55 = vld [vmem:[#allocation9 + $0x58] sm:$0xff]  ;;  %v5842_v3 = vld [vmem:[#allocation9 + $0x20] sm:$0xff] }
 0x713   :  { %6772 = vst [vmem:[#allocation38_spill] sm:$0xff] %v5833_v5 }
 0x714   :  { %2339 = vmatmul.f32.vlgmr.msra.gmra.mxu0 %v2318_v63  ;;  %2359 = vmatmul.f32.vlgmr.msra.gmra.mxu1 %v2318_v63  ;;  %6773 = vst [vmem:[#allocation41_spill] sm:$0xff] %v5836_v51 }
 0x715   :  { %2379 = vmatmul.f32.vlgmr.msrb.gmra.mxu2 %v2318_v63  ;;  %2399 = vmatmul.f32.vlgmr.msrb.gmra.mxu3 %v2318_v63  ;;  %6774 = vst [vmem:[#allocation40_spill] sm:$0xff] %v5839_v55  ;;  %v5845_v63 = vld [vmem:[#allocation9 + $0x28] sm:$0xff] }
 0x716   :  { %2625 = vmatpush.msra.mxu0 %v5674_v13  ;;  %2645 = vmatpush.msra.mxu1 %v5677_v16  ;;  %6775 = vst [vmem:[#allocation31_spill] sm:$0xff] %v5842_v3 }
 0x717   :  { %2665 = vmatpush.msrb.mxu2 %v5680_v17  ;;  %2685 = vmatpush.msrb.mxu3 %v5683_v20  ;;  %6776 = vst [vmem:[#allocation33_spill] sm:$0xff] %v5845_v63 }
 0x718   :  { %2626 = vmatpush.msra.mxu0 %v5686_v7  ;;  %2646 = vmatpush.msra.mxu1 %v5689_v57 }
 0x719   :  { %2666 = vmatpush.msrb.mxu2 %v5692_v39  ;;  %2686 = vmatpush.msrb.mxu3 %v5695_v40 }
 0x71a   :  { %2627 = vmatpush.msra.mxu0 %v5698_v6  ;;  %2647 = vmatpush.msra.mxu1 %v5701_v15 }
 0x71b   :  { %2667 = vmatpush.msrb.mxu2 %v5704_v42  ;;  %2687 = vmatpush.msrb.mxu3 %v5707_v53 }
 0x71c   :  { %2628 = vmatpush.msra.mxu0 %v5710_v8  ;;  %2648 = vmatpush.msra.mxu1 %v5713_v43 }
 0x71d   :  { %2668 = vmatpush.msrb.mxu2 %v5716_v33  ;;  %2688 = vmatpush.msrb.mxu3 %v5719_v9 }
 0x71e   :  { %2629 = vmatpush.msra.mxu0 %v5722_v21  ;;  %2649 = vmatpush.msra.mxu1 %v5725_v26 }
 0x71f   :  { %2669 = vmatpush.msrb.mxu2 %v5728_v19  ;;  %2689 = vmatpush.msrb.mxu3 %v5731_v60 }
 0x720   :  { %2630 = vmatpush.msra.mxu0 %v5734_v48  ;;  %2650 = vmatpush.msra.mxu1 %v5737_v45 }
 0x721   :  { %2670 = vmatpush.msrb.mxu2 %v5740_v58  ;;  %2690 = vmatpush.msrb.mxu3 %v5743_v14 }
 0x722   :  { %2631 = vmatpush.msra.mxu0 %v5746_v49  ;;  %2651 = vmatpush.msra.mxu1 %v5749_v25 }
 0x723   :  { %2671 = vmatpush.msrb.mxu2 %v5752_v31  ;;  %2691 = vmatpush.msrb.mxu3 %v5755_v0 }
 0x724   :  { %2632 = vmatpush.msra.mxu0 %v5758_v52  ;;  %2652 = vmatpush.msra.mxu1 %v5761_v41 }
 0x725   :  { %2672 = vmatpush.msrb.mxu2 %v5764_v29  ;;  %2692 = vmatpush.msrb.mxu3 %v5767_v50 }
 0x726   :  { %2633 = vmatpush.msra.mxu0 %v5770_v30  ;;  %2653 = vmatpush.msra.mxu1 %v5773_v59 }
 0x727   :  { %2673 = vmatpush.msrb.mxu2 %v5776_v28  ;;  %2693 = vmatpush.msrb.mxu3 %v5779_v24 }
 0x728   :  { %2634 = vmatpush.msra.mxu0 %v5782_v12  ;;  %2654 = vmatpush.msra.mxu1 %v5785_v37 }
 0x729   :  { %2674 = vmatpush.msrb.mxu2 %v5788_v27  ;;  %2694 = vmatpush.msrb.mxu3 %v5791_v38 }
 0x72a   :  { %2635 = vmatpush.msra.mxu0 %v5794_v35  ;;  %2655 = vmatpush.msra.mxu1 %v5797_v23 }
 0x72b   :  { %2675 = vmatpush.msrb.mxu2 %v5800_v34  ;;  %2695 = vmatpush.msrb.mxu3 %v5803_v56 }
 0x72c   :  { %2636 = vmatpush.msra.mxu0 %v5806_v62  ;;  %2656 = vmatpush.msra.mxu1 %v5809_v44 }
 0x72d   :  { %2676 = vmatpush.msrb.mxu2 %v5812_v46  ;;  %2696 = vmatpush.msrb.mxu3 %v5815_v47 }
 0x72e   :  { %2637 = vmatpush.msra.mxu0 %v5818_v11  ;;  %2657 = vmatpush.msra.mxu1 %v5821_v1 }
 0x72f   :  { %2677 = vmatpush.msrb.mxu2 %v5824_v4  ;;  %2697 = vmatpush.msrb.mxu3 %v5827_v61  ;;  %v6783_v61 = vld [vmem:[#allocation56_spill] sm:$0xff] }
 0x730   :  { %2638 = vmatpush.msra.mxu0 %v5830_v10  ;;  %2658 = vmatpush.msra.mxu1 %v5833_v5  ;;  %v5848_v10 = vld [vmem:[#allocation9 + $0x30] sm:$0xff]  ;;  %v5851_v5 = vld [vmem:[#allocation9 + $0x38] sm:$0xff] }
 0x731   :  { %2678 = vmatpush.msrb.mxu2 %v5836_v51  ;;  %2698 = vmatpush.msrb.mxu3 %v5839_v55  ;;  %6777 = vst [vmem:[#allocation45_spill] sm:$0xff] %v5848_v10  ;;  %v5854_v51 = vld [vmem:[#allocation9] sm:$0xff]  ;;  %v5857_v55 = vld [vmem:[#allocation9 + $0x8] sm:$0xff] }
 0x732   :  { %2639 = vmatpush.msra.mxu0 %v5842_v3  ;;  %2659 = vmatpush.msra.mxu1 %v5845_v63  ;;  %6778 = vst [vmem:[#allocation39_spill] sm:$0xff] %v5851_v5  ;;  %v5861_v3 = vld [vmem:[#allocation9 + $0x18] sm:$0xff] }
 0x733   :  { %2679 = vmatpush.msrb.mxu2 %v5848_v10  ;;  %2699 = vmatpush.msrb.mxu3 %v5851_v5  ;;  %6779 = vst [vmem:[#allocation34_spill] sm:$0xff] %v5854_v51  ;;  %v6782_v10 = vld [vmem:[#allocation57_spill] sm:$0xff]  ;;  %v1822_v5 = vadd.f32 %v6783_v61, %v6751_v32 }
 0x734   :  { %2640 = vmatpush.msra.mxu0 %v5854_v51  ;;  %6780 = vst [vmem:[#allocation35_spill] sm:$0xff] %v5857_v55  ;;  %2660 = vmatpush.msra.mxu1 %v5857_v55  ;;  %v1781_v63 = vadd.f32 %v6782_v10, %v6749_v2  ;;  %v6784_v55 = vld [vmem:[#allocation58_spill] sm:$0xff] }
 0x735   :  { %2680 = vmatpush.msrb.mxu2 %v6747_v54  ;;  %6781 = vst [vmem:[#allocation53_spill] sm:$0xff] %v5861_v3  ;;  %2700 = vmatpush.msrb.mxu3 %v5861_v3  ;;  %v1904_v54 = vadd.f32 %v6784_v55, %v6753_v22 }
 0x791   :  { %v2340_v4 = vpop.f32.mrf.mxu0  ;;  %v2360_v1 = vpop.f32.mrf.mxu1 }
 0x792   :  { %v2403_v11 = vadd.f32 %v2340_v4, %v1781_v63  ;;  %v2404_v51 = vadd.f32 %v2360_v1, %v1822_v5 }
 0x794   :  { %v3396_v47 = vmul.f32 -1.442695, %v2403_v11  ;;  %v3397_v46 = vmul.f32 -1.442695, %v2404_v51  ;;  %v6785_v11 = vld [vmem:[#allocation72_spill] sm:$0xff] }
 0x795   :  { %v1863_v1 = vadd.f32 %v6785_v11, %v6755_v36 }
 0x796   :  { %3591 = vpow2.f32 %v3396_v47 }
 0x797   :  { %3593 = vpow2.f32 %v3397_v46 }
 0x798   :  { %v2400_v44 = vpop.f32.mrf.mxu3  ;;  %v2380_v61 = vpop.f32.mrf.mxu2 }
 0x799   :  { %v2406_v62 = vadd.f32 %v2400_v44, %v1904_v54  ;;  %v2405_v51 = vadd.f32 %v2380_v61, %v1863_v1 }
 0x79b   :  { %v3398_v3 = vmul.f32 -1.442695, %v2406_v62 }
 0x79c   :  { %v3592_v56 = vpop.eup %3591 }
 0x79d   :  { %v3594_v34 = vpop.eup %3593  ;;  %v2410_v10 = vadd.f32 1.0, %v3592_v56  ;;  %3595 = vpow2.f32 %v3398_v3 }
 0x79e   :  { %v2429_v2 = vadd.f32 1.0, %v3594_v34 }
 0x79f   :  { %3597 = vrcp.f32 %v2410_v10  ;;  %v2422_v54 = vand.u32 2147483648, %v2410_v10  ;;  %v2420_v3 = vand.u32 2147483647, %v2410_v10  ;;  %vm2416_vm11 = vweird.f32 %v2410_v10 }
 0x7a0   :  { %3599 = vrcp.f32 %v2429_v2  ;;  %v2441_v56 = vand.u32 2147483648, %v2429_v2  ;;  %v2439_v32 = vand.u32 2147483647, %v2429_v2  ;;  %vm2435_vm12 = vweird.f32 %v2429_v2 }
 0x7a1   :  { %v2423_v61 = vor.u32 1.1754944e-38, %v2422_v54  ;;  %vm2421_vm15 = vcmp.eq.f32.partialorder %v2420_v3, 8.507059e+37 }
 0x7a2   :  { %vm2440_vm0 = vcmp.eq.f32.partialorder %v2439_v32, 8.507059e+37 }
 0x7a3   :  { %v3596_v4 = vpop.eup %3595 }
 0x7a4   :  { %v2449_v47 = vadd.f32 1.0, %v3596_v4 }
 0x7a5   :  { %v3598_v5 = vpop.eup %3597 }
 0x7a6   :  { %v3600_v55 = vpop.eup %3599  ;;  %v2412_v46 = vmul.f32 %v3598_v5, %v2410_v10  ;;  %3601 = vrcp.f32 %v2449_v47  ;;  %vm2417_vm9 = vweird.f32 %v3598_v5  ;;  %vm2455_vm2 = vweird.f32 %v2449_v47 }
 0x7a7   :  { %v2431_v44 = vmul.f32 %v3600_v55, %v2429_v2  ;;  %3603 = vtanh.f32 %v2405_v51  ;;  %vm2436_vm10 = vweird.f32 %v3600_v55  ;;  %vm2418_vm13 = vmor %vm2416_vm11, %vm2417_vm9 }
 0x7a8   :  { %v2413_v62 = vsub.f32 1.0, %v2412_v46  ;;  %vm2437_vm14 = vmor %vm2435_vm12, %vm2436_vm10  ;;  %v2442_v46 = vor.u32 1.1754944e-38, %v2441_v56 }
 0x7a9   :  { %v2432_v63 = vsub.f32 1.0, %v2431_v44 }
 0x7aa   :  { %v2414_v34 = vmul.f32 %v3598_v5, %v2413_v62 }
 0x7ab   :  { %v2433_v22 = vmul.f32 %v3600_v55, %v2432_v63 }
 0x7ac   :  { %v3602_v23 = vpop.eup %3601  ;;  %v2415_v11 = vadd.f32 %v3598_v5, %v2414_v34 }
 0x7ad   :  { %v2434_v4 = vadd.f32 %v3600_v55, %v2433_v22  ;;  %v2451_v1 = vmul.f32 %v3602_v23, %v2449_v47  ;;  %v3604_v51 = vpop.eup %3603  ;;  %vm2456_vm1 = vweird.f32 %v3602_v23  ;;  %v2461_v22 = vand.u32 2147483648, %v2449_v47 }
 0x7ae   :  { %v2419_v44 = vsel %vm2418_vm13, %v3598_v5, %v2415_v11  ;;  %v2459_v5 = vand.u32 2147483647, %v2449_v47  ;;  %vm2457_vm3 = vmor %vm2455_vm2, %vm2456_vm1  ;;  %v6792_v47 = vld [vmem:[#allocation64_spill] sm:$0xff] }
 0x7af   :  { %v2424_v36 = vsel %vm2421_vm15, %v2423_v61, %v2419_v44  ;;  %v2438_v62 = vsel %vm2437_vm14, %v3600_v55, %v2434_v4  ;;  %v2452_v35 = vsub.f32 1.0, %v2451_v1  ;;  %v2462_v56 = vor.u32 1.1754944e-38, %v2461_v22  ;;  %v6793_v11 = vld [vmem:[#allocation24_spill] sm:$0xff]  ;;  %v6795_v4 = vld [vmem:[#allocation23_spill] sm:$0xff]  ;;  %v6796_v1 = vld [vmem:[#allocation25_spill] sm:$0xff] }
 0x7b0   :  { %v2443_v63 = vsel %vm2440_vm0, %v2442_v46, %v2438_v62  ;;  %v2466_v38 = vmul.f32 %v3604_v51, %v2424_v36  ;;  %vm2460_vm4 = vcmp.eq.f32.partialorder %v2459_v5, 8.507059e+37  ;;  %v6786_v36 = vld [vmem:[#allocation22_spill] sm:$0xff]  ;;  %v6794_v61 = vld [vmem:[#allocation32_spill] sm:$0xff]  ;;  %v6797_v46 = vld [vmem:[#allocation37_spill] sm:$0xff] }
 0x7b1   :  { %v2465_v27 = vmul.f32 %v2443_v63, %v5671_v18  ;;  %v2453_v34 = vmul.f32 %v3602_v23, %v2452_v35  ;;  %v6787_v18 = vld [vmem:[#allocation60_spill] sm:$0xff]  ;;  %v6799_v51 = vld [vmem:[#allocation26_spill] sm:$0xff]  ;;  %v6804_v22 = vld [vmem:[#allocation31_spill] sm:$0xff] }
 0x7b2   :  { %v6790_v35 = vld [vmem:[#allocation28_spill] sm:$0xff]  ;;  %v6800_v62 = vld [vmem:[#allocation30_spill] sm:$0xff]  ;;  %v6805_v5 = vld [vmem:[#allocation33_spill] sm:$0xff] }
 0x7b3   :  { %v5873_v10 = vadd.f32 %v2466_v38, %v2465_v27  ;;  %v2454_v2 = vadd.f32 %v3602_v23, %v2453_v34  ;;  %v6788_v27 = vld [vmem:[#allocation54_spill] sm:$0xff]  ;;  %v6789_v38 = vld [vmem:[#allocation55_spill] sm:$0xff]  ;;  %v6798_v44 = vld [vmem:[#allocation36_spill] sm:$0xff] }
 0x7b4   :  { %v6801_v63 = vld [vmem:[#allocation38_spill] sm:$0xff]  ;;  %v6802_v34 = vld [vmem:[#allocation41_spill] sm:$0xff] }
 0x7b5   :  { %3605 = vtanh.f32 %v5873_v10  ;;  %v2458_v54 = vsel %vm2457_vm3, %v3602_v23, %v2454_v2  ;;  %v6791_v23 = vld [vmem:[#allocation65_spill] sm:$0xff]  ;;  %v6803_v2 = vld [vmem:[#allocation40_spill] sm:$0xff] }
 0x7b6   :  { %v2463_v55 = vsel %vm2460_vm4, %v2462_v56, %v2458_v54  ;;  %v6806_v54 = vld [vmem:[#allocation45_spill] sm:$0xff]  ;;  %v6807_v56 = vld [vmem:[#allocation39_spill] sm:$0xff] }
 0x7bb   :  { %v3606_v32 = vpop.eup %3605 }
 0x7bc   :  { %v2469_v3 = vmul.f32 %v3606_v32, %v2463_v55  ;;  %v6808_v32 = vld [vmem:[#allocation34_spill] sm:$0xff]  ;;  %v6809_v55 = vld [vmem:[#allocation35_spill] sm:$0xff] }
 0x7be   :  { %2490 = vmatmul.f32.vlgmr.msrb.gmra.mxu0 %v2469_v3  ;;  %2510 = vmatmul.f32.vlgmr.msrb.gmra.mxu1 %v2469_v3 }
 0x7bf   :  { %2530 = vmatmul.f32.vlgmr.msra.gmra.mxu2 %v2469_v3  ;;  %2550 = vmatmul.f32.vlgmr.msra.gmra.mxu3 %v2469_v3  ;;  %v5938_v3 = vld [vmem:[#allocation9 + $0x10] sm:$0xff] }
 0x7c0   :  { %2776 = vmatpush.msrb.mxu0 %v5674_v13  ;;  %2796 = vmatpush.msrb.mxu1 %v5677_v16  ;;  %6810 = vst [vmem:[#allocation44_spill] sm:$0xff] %v5938_v3 }
 0x7c1   :  { %2816 = vmatpush.msra.mxu2 %v5680_v17  ;;  %2836 = vmatpush.msra.mxu3 %v5683_v20 }
 0x7c2   :  { %2777 = vmatpush.msrb.mxu0 %v5686_v7  ;;  %2797 = vmatpush.msrb.mxu1 %v5689_v57 }
 0x7c3   :  { %2817 = vmatpush.msra.mxu2 %v5692_v39  ;;  %2837 = vmatpush.msra.mxu3 %v5695_v40 }
 0x7c4   :  { %2778 = vmatpush.msrb.mxu0 %v5698_v6  ;;  %2798 = vmatpush.msrb.mxu1 %v5701_v15 }
 0x7c5   :  { %2818 = vmatpush.msra.mxu2 %v5704_v42  ;;  %2838 = vmatpush.msra.mxu3 %v5707_v53 }
 0x7c6   :  { %2779 = vmatpush.msrb.mxu0 %v5710_v8  ;;  %2799 = vmatpush.msrb.mxu1 %v5713_v43 }
 0x7c7   :  { %2819 = vmatpush.msra.mxu2 %v5716_v33  ;;  %2839 = vmatpush.msra.mxu3 %v5719_v9 }
 0x7c8   :  { %2780 = vmatpush.msrb.mxu0 %v5722_v21  ;;  %2800 = vmatpush.msrb.mxu1 %v5725_v26 }
 0x7c9   :  { %2820 = vmatpush.msra.mxu2 %v5728_v19  ;;  %2840 = vmatpush.msra.mxu3 %v5731_v60 }
 0x7ca   :  { %2781 = vmatpush.msrb.mxu0 %v5734_v48  ;;  %2801 = vmatpush.msrb.mxu1 %v5737_v45 }
 0x7cb   :  { %2821 = vmatpush.msra.mxu2 %v5740_v58  ;;  %2841 = vmatpush.msra.mxu3 %v5743_v14 }
 0x7cc   :  { %2782 = vmatpush.msrb.mxu0 %v5746_v49  ;;  %2802 = vmatpush.msrb.mxu1 %v5749_v25 }
 0x7cd   :  { %2822 = vmatpush.msra.mxu2 %v5752_v31  ;;  %2842 = vmatpush.msra.mxu3 %v5755_v0 }
 0x7ce   :  { %2783 = vmatpush.msrb.mxu0 %v5758_v52  ;;  %2803 = vmatpush.msrb.mxu1 %v5761_v41 }
 0x7cf   :  { %2823 = vmatpush.msra.mxu2 %v5764_v29  ;;  %2843 = vmatpush.msra.mxu3 %v5767_v50 }
 0x7d0   :  { %2784 = vmatpush.msrb.mxu0 %v5770_v30  ;;  %2804 = vmatpush.msrb.mxu1 %v5773_v59 }
 0x7d1   :  { %2824 = vmatpush.msra.mxu2 %v5776_v28  ;;  %2844 = vmatpush.msra.mxu3 %v5779_v24 }
 0x7d2   :  { %2785 = vmatpush.msrb.mxu0 %v5782_v12  ;;  %2805 = vmatpush.msrb.mxu1 %v5785_v37 }
 0x7d3   :  { %2825 = vmatpush.msra.mxu2 %v6786_v36  ;;  %2845 = vmatpush.msra.mxu3 %v6787_v18 }
 0x7d4   :  { %2786 = vmatpush.msrb.mxu0 %v6788_v27  ;;  %2806 = vmatpush.msrb.mxu1 %v6789_v38 }
 0x7d5   :  { %2826 = vmatpush.msra.mxu2 %v6790_v35  ;;  %2846 = vmatpush.msra.mxu3 %v6791_v23 }
 0x7d6   :  { %2787 = vmatpush.msrb.mxu0 %v6792_v47  ;;  %2807 = vmatpush.msrb.mxu1 %v6793_v11 }
 0x7d7   :  { %2827 = vmatpush.msra.mxu2 %v6794_v61  ;;  %2847 = vmatpush.msra.mxu3 %v6795_v4  ;;  %v6817_v4 = vld [vmem:[#allocation67_spill] sm:$0xff] }
 0x7d8   :  { %2788 = vmatpush.msrb.mxu0 %v6796_v1  ;;  %2808 = vmatpush.msrb.mxu1 %v6797_v46 }
 0x7d9   :  { %2828 = vmatpush.msra.mxu2 %v6798_v44  ;;  %2848 = vmatpush.msra.mxu3 %v6799_v51  ;;  %v6815_v51 = vld [vmem:[#allocation59_spill] sm:$0xff] }
 0x7da   :  { %2789 = vmatpush.msrb.mxu0 %v6800_v62  ;;  %2809 = vmatpush.msrb.mxu1 %v6801_v63  ;;  %v6811_v63 = vld [vmem:[#allocation53_spill] sm:$0xff] }
 0x7db   :  { %2829 = vmatpush.msra.mxu2 %v6802_v34  ;;  %2849 = vmatpush.msra.mxu3 %v6803_v2  ;;  %v6812_v34 = vld [vmem:[#allocation27_spill] sm:$0xff] }
 0x7dc   :  { %2790 = vmatpush.msrb.mxu0 %v6804_v22  ;;  %2810 = vmatpush.msrb.mxu1 %v6805_v5  ;;  %v6813_v2 = vld [vmem:[#allocation63_spill] sm:$0xff]  ;;  %v6814_v22 = vld [vmem:[#allocation21_spill] sm:$0xff] }
 0x7dd   :  { %2830 = vmatpush.msra.mxu2 %v6806_v54  ;;  %2850 = vmatpush.msra.mxu3 %v6807_v56  ;;  %v1784_v62 = vadd.f32 %v6813_v2, %v6812_v34  ;;  %v1825_v5 = vadd.f32 %v6815_v51, %v6814_v22 }
 0x7de   :  { %2791 = vmatpush.msrb.mxu0 %v6808_v32  ;;  %2811 = vmatpush.msrb.mxu1 %v6809_v55  ;;  %v6816_v55 = vld [vmem:[#allocation51_spill] sm:$0xff] }
 0x7df   :  { %2831 = vmatpush.msra.mxu2 %v5938_v3  ;;  %2851 = vmatpush.msra.mxu3 %v6811_v63  ;;  %v1907_v61 = vadd.f32 %v6817_v4, %v6816_v55 }
 0x83b   :  { %v2491_v44 = vpop.f32.mrf.mxu0  ;;  %v2511_v54 = vpop.f32.mrf.mxu1 }
 0x83c   :  { %v2554_v46 = vadd.f32 %v2491_v44, %v1784_v62  ;;  %v2555_v56 = vadd.f32 %v2511_v54, %v1825_v5  ;;  %v6818_v62 = vld [vmem:[#allocation75_spill] sm:$0xff] }
 0x83e   :  { %v3399_v1 = vmul.f32 -1.442695, %v2554_v46  ;;  %v3400_v32 = vmul.f32 -1.442695, %v2555_v56  ;;  %v6819_v46 = vld [vmem:[#allocation42_spill] sm:$0xff] }
 0x83f   :  { %v1866_v5 = vadd.f32 %v6819_v46, %v6818_v62 }
 0x840   :  { %3607 = vpow2.f32 %v3399_v1 }
 0x841   :  { %3609 = vpow2.f32 %v3400_v32 }
 0x842   :  { %v2551_v3 = vpop.f32.mrf.mxu3  ;;  %v2531_v51 = vpop.f32.mrf.mxu2 }
 0x843   :  { %v2557_v11 = vadd.f32 %v2551_v3, %v1907_v61  ;;  %v2556_v56 = vadd.f32 %v2531_v51, %v1866_v5 }
 0x845   :  { %v3401_v63 = vmul.f32 -1.442695, %v2557_v11 }
 0x846   :  { %v3608_v47 = vpop.eup %3607 }
 0x847   :  { %v3610_v23 = vpop.eup %3609  ;;  %v2561_v2 = vadd.f32 1.0, %v3608_v47  ;;  %3611 = vpow2.f32 %v3401_v63 }
 0x848   :  { %v2580_v34 = vadd.f32 1.0, %v3610_v23 }
 0x849   :  { %3613 = vrcp.f32 %v2561_v2  ;;  %v2573_v55 = vand.u32 2147483648, %v2561_v2  ;;  %v2571_v63 = vand.u32 2147483647, %v2561_v2  ;;  %vm2567_vm7 = vweird.f32 %v2561_v2 }
 0x84a   :  { %3615 = vrcp.f32 %v2580_v34  ;;  %v2592_v47 = vand.u32 2147483648, %v2580_v34  ;;  %v2590_v35 = vand.u32 2147483647, %v2580_v34  ;;  %vm2586_vm8 = vweird.f32 %v2580_v34 }
 0x84b   :  { %v2574_v51 = vor.u32 1.1754944e-38, %v2573_v55  ;;  %vm2572_vm11 = vcmp.eq.f32.partialorder %v2571_v63, 8.507059e+37 }
 0x84c   :  { %vm2591_vm12 = vcmp.eq.f32.partialorder %v2590_v35, 8.507059e+37 }
 0x84d   :  { %v3612_v44 = vpop.eup %3611 }
 0x84e   :  { %v2600_v1 = vadd.f32 1.0, %v3612_v44 }
 0x84f   :  { %v3614_v54 = vpop.eup %3613 }
 0x850   :  { %v3616_v4 = vpop.eup %3615  ;;  %v2563_v32 = vmul.f32 %v3614_v54, %v2561_v2  ;;  %3617 = vrcp.f32 %v2600_v1  ;;  %vm2568_vm5 = vweird.f32 %v3614_v54  ;;  %vm2606_vm14 = vweird.f32 %v2600_v1 }
 0x851   :  { %v2582_v61 = vmul.f32 %v3616_v4, %v2580_v34  ;;  %3619 = vtanh.f32 %v2556_v56  ;;  %vm2587_vm6 = vweird.f32 %v3616_v4  ;;  %vm2569_vm9 = vmor %vm2567_vm7, %vm2568_vm5  ;;  %v2610_v55 = vand.u32 2147483647, %v2600_v1 }
 0x852   :  { %v2564_v11 = vsub.f32 1.0, %v2563_v32  ;;  %vm2588_vm10 = vmor %vm2586_vm8, %vm2587_vm6  ;;  %v2593_v32 = vor.u32 1.1754944e-38, %v2592_v47 }
 0x853   :  { %v2583_v3 = vsub.f32 1.0, %v2582_v61  ;;  %vm2611_vm0 = vcmp.eq.f32.partialorder %v2610_v55, 8.507059e+37  ;;  %v6839_v55 = vld [vmem:[#allocation33_spill] sm:$0xff] }
 0x854   :  { %v2565_v23 = vmul.f32 %v3614_v54, %v2564_v11 }
 0x855   :  { %v2584_v22 = vmul.f32 %v3616_v4, %v2583_v3 }
 0x856   :  { %v3618_v38 = vpop.eup %3617  ;;  %v2566_v46 = vadd.f32 %v3614_v54, %v2565_v23 }
 0x857   :  { %v2585_v44 = vadd.f32 %v3616_v4, %v2584_v22  ;;  %v2602_v5 = vmul.f32 %v3618_v38, %v2600_v1  ;;  %v3620_v56 = vpop.eup %3619  ;;  %vm2607_vm13 = vweird.f32 %v3618_v38  ;;  %v2612_v22 = vand.u32 2147483648, %v2600_v1  ;;  %v6826_v1 = vld [vmem:[#allocation64_spill] sm:$0xff] }
 0x858   :  { %v2570_v61 = vsel %vm2569_vm9, %v3614_v54, %v2566_v46  ;;  %vm2608_vm15 = vmor %vm2606_vm14, %vm2607_vm13  ;;  %v6827_v46 = vld [vmem:[#allocation24_spill] sm:$0xff] }
 0x859   :  { %v2575_v62 = vsel %vm2572_vm11, %v2574_v51, %v2570_v61  ;;  %v2589_v11 = vsel %vm2588_vm10, %v3616_v4, %v2585_v44  ;;  %v2603_v27 = vsub.f32 1.0, %v2602_v5  ;;  %v2613_v47 = vor.u32 1.1754944e-38, %v2612_v22  ;;  %v6828_v51 = vld [vmem:[#allocation32_spill] sm:$0xff]  ;;  %v6829_v44 = vld [vmem:[#allocation23_spill] sm:$0xff]  ;;  %v6830_v5 = vld [vmem:[#allocation25_spill] sm:$0xff] }
 0x85a   :  { %v2594_v3 = vsel %vm2591_vm12, %v2593_v32, %v2589_v11  ;;  %v2617_v18 = vmul.f32 %v3620_v56, %v2575_v62  ;;  %v6825_v62 = vld [vmem:[#allocation65_spill] sm:$0xff]  ;;  %v6832_v61 = vld [vmem:[#allocation36_spill] sm:$0xff]  ;;  %v6833_v56 = vld [vmem:[#allocation26_spill] sm:$0xff] }
 0x85b   :  { %v2616_v36 = vmul.f32 %v2594_v3, %v5873_v10  ;;  %v2604_v23 = vmul.f32 %v3618_v38, %v2603_v27  ;;  %v6820_v10 = vld [vmem:[#allocation22_spill] sm:$0xff]  ;;  %v6823_v27 = vld [vmem:[#allocation55_spill] sm:$0xff]  ;;  %v6831_v32 = vld [vmem:[#allocation37_spill] sm:$0xff] }
 0x85c   :  { %v6834_v11 = vld [vmem:[#allocation30_spill] sm:$0xff]  ;;  %v6838_v22 = vld [vmem:[#allocation31_spill] sm:$0xff] }
 0x85d   :  { %v5951_v2 = vadd.f32 %v2617_v18, %v2616_v36  ;;  %v2605_v34 = vadd.f32 %v3618_v38, %v2604_v23  ;;  %v6821_v36 = vld [vmem:[#allocation60_spill] sm:$0xff]  ;;  %v6822_v18 = vld [vmem:[#allocation54_spill] sm:$0xff]  ;;  %v6836_v23 = vld [vmem:[#allocation41_spill] sm:$0xff] }
 0x85e   :  { %v6835_v3 = vld [vmem:[#allocation38_spill] sm:$0xff] }
 0x85f   :  { %3621 = vtanh.f32 %v5951_v2  ;;  %v2609_v54 = vsel %vm2608_vm15, %v3618_v38, %v2605_v34  ;;  %v6824_v38 = vld [vmem:[#allocation28_spill] sm:$0xff] }
 0x860   :  { %v2614_v4 = vsel %vm2611_vm0, %v2613_v47, %v2609_v54  ;;  %v6837_v34 = vld [vmem:[#allocation40_spill] sm:$0xff]  ;;  %v6840_v54 = vld [vmem:[#allocation45_spill] sm:$0xff]  ;;  %v6841_v47 = vld [vmem:[#allocation39_spill] sm:$0xff] }
 0x865   :  { %v3622_v35 = vpop.eup %3621 }
 0x866   :  { %v2620_v63 = vmul.f32 %v3622_v35, %v2614_v4  ;;  %v6842_v35 = vld [vmem:[#allocation34_spill] sm:$0xff]  ;;  %v6843_v4 = vld [vmem:[#allocation35_spill] sm:$0xff] }
 0x868   :  { %2641 = vmatmul.f32.vlgmr.msra.gmra.mxu0 %v2620_v63  ;;  %2661 = vmatmul.f32.vlgmr.msra.gmra.mxu1 %v2620_v63 }
 0x869   :  { %2681 = vmatmul.f32.vlgmr.msrb.gmra.mxu2 %v2620_v63  ;;  %2701 = vmatmul.f32.vlgmr.msrb.gmra.mxu3 %v2620_v63  ;;  %v6844_v63 = vld [vmem:[#allocation44_spill] sm:$0xff] }
 0x86a   :  { %2927 = vmatpush.msra.mxu0 %v5674_v13  ;;  %2947 = vmatpush.msra.mxu1 %v5677_v16 }
 0x86b   :  { %2967 = vmatpush.msrb.mxu2 %v5680_v17  ;;  %2987 = vmatpush.msrb.mxu3 %v5683_v20 }
 0x86c   :  { %2928 = vmatpush.msra.mxu0 %v5686_v7  ;;  %2948 = vmatpush.msra.mxu1 %v5689_v57 }
 0x86d   :  { %2968 = vmatpush.msrb.mxu2 %v5692_v39  ;;  %2988 = vmatpush.msrb.mxu3 %v5695_v40 }
 0x86e   :  { %2929 = vmatpush.msra.mxu0 %v5698_v6  ;;  %2949 = vmatpush.msra.mxu1 %v5701_v15 }
 0x86f   :  { %2969 = vmatpush.msrb.mxu2 %v5704_v42  ;;  %2989 = vmatpush.msrb.mxu3 %v5707_v53 }
 0x870   :  { %2930 = vmatpush.msra.mxu0 %v5710_v8  ;;  %2950 = vmatpush.msra.mxu1 %v5713_v43 }
 0x871   :  { %2970 = vmatpush.msrb.mxu2 %v5716_v33  ;;  %2990 = vmatpush.msrb.mxu3 %v5719_v9 }
 0x872   :  { %2931 = vmatpush.msra.mxu0 %v5722_v21  ;;  %2951 = vmatpush.msra.mxu1 %v5725_v26 }
 0x873   :  { %2971 = vmatpush.msrb.mxu2 %v5728_v19  ;;  %2991 = vmatpush.msrb.mxu3 %v5731_v60 }
 0x874   :  { %2932 = vmatpush.msra.mxu0 %v5734_v48  ;;  %2952 = vmatpush.msra.mxu1 %v5737_v45 }
 0x875   :  { %2972 = vmatpush.msrb.mxu2 %v5740_v58  ;;  %2992 = vmatpush.msrb.mxu3 %v5743_v14 }
 0x876   :  { %2933 = vmatpush.msra.mxu0 %v5746_v49  ;;  %2953 = vmatpush.msra.mxu1 %v5749_v25 }
 0x877   :  { %2973 = vmatpush.msrb.mxu2 %v5752_v31  ;;  %2993 = vmatpush.msrb.mxu3 %v5755_v0 }
 0x878   :  { %2934 = vmatpush.msra.mxu0 %v5758_v52  ;;  %2954 = vmatpush.msra.mxu1 %v5761_v41 }
 0x879   :  { %2974 = vmatpush.msrb.mxu2 %v5764_v29  ;;  %2994 = vmatpush.msrb.mxu3 %v5767_v50 }
 0x87a   :  { %2935 = vmatpush.msra.mxu0 %v5770_v30  ;;  %2955 = vmatpush.msra.mxu1 %v5773_v59 }
 0x87b   :  { %2975 = vmatpush.msrb.mxu2 %v5776_v28  ;;  %2995 = vmatpush.msrb.mxu3 %v5779_v24 }
 0x87c   :  { %2936 = vmatpush.msra.mxu0 %v5782_v12  ;;  %2956 = vmatpush.msra.mxu1 %v5785_v37 }
 0x87d   :  { %2976 = vmatpush.msrb.mxu2 %v6820_v10  ;;  %2996 = vmatpush.msrb.mxu3 %v6821_v36 }
 0x87e   :  { %2937 = vmatpush.msra.mxu0 %v6822_v18  ;;  %2957 = vmatpush.msra.mxu1 %v6823_v27 }
 0x87f   :  { %2977 = vmatpush.msrb.mxu2 %v6824_v38  ;;  %2997 = vmatpush.msrb.mxu3 %v6825_v62 }
 0x880   :  { %2938 = vmatpush.msra.mxu0 %v6826_v1  ;;  %2958 = vmatpush.msra.mxu1 %v6827_v46 }
 0x881   :  { %2978 = vmatpush.msrb.mxu2 %v6828_v51  ;;  %2998 = vmatpush.msrb.mxu3 %v6829_v44  ;;  %v6851_v51 = vld [vmem:[#allocation43_spill] sm:$0xff] }
 0x882   :  { %2939 = vmatpush.msra.mxu0 %v6830_v5  ;;  %2959 = vmatpush.msra.mxu1 %v6831_v32 }
 0x883   :  { %2979 = vmatpush.msrb.mxu2 %v6832_v61  ;;  %2999 = vmatpush.msrb.mxu3 %v6833_v56  ;;  %v6849_v61 = vld [vmem:[#allocation66_spill] sm:$0xff] }
 0x884   :  { %2940 = vmatpush.msra.mxu0 %v6834_v11  ;;  %2960 = vmatpush.msra.mxu1 %v6835_v3  ;;  %v6845_v11 = vld [vmem:[#allocation53_spill] sm:$0xff]  ;;  %v6846_v3 = vld [vmem:[#allocation27_spill] sm:$0xff] }
 0x885   :  { %2980 = vmatpush.msrb.mxu2 %v6836_v23  ;;  %3000 = vmatpush.msrb.mxu3 %v6837_v34  ;;  %v6847_v23 = vld [vmem:[#allocation73_spill] sm:$0xff] }
 0x886   :  { %2941 = vmatpush.msra.mxu0 %v6838_v22  ;;  %2961 = vmatpush.msra.mxu1 %v6839_v55  ;;  %v1787_v56 = vadd.f32 %v6847_v23, %v6846_v3  ;;  %v6848_v34 = vld [vmem:[#allocation21_spill] sm:$0xff] }
 0x887   :  { %2981 = vmatpush.msrb.mxu2 %v6840_v54  ;;  %3001 = vmatpush.msrb.mxu3 %v6841_v47  ;;  %v1828_v22 = vadd.f32 %v6849_v61, %v6848_v34 }
 0x888   :  { %2942 = vmatpush.msra.mxu0 %v6842_v35  ;;  %2962 = vmatpush.msra.mxu1 %v6843_v4  ;;  %v6850_v35 = vld [vmem:[#allocation51_spill] sm:$0xff] }
 0x889   :  { %2982 = vmatpush.msrb.mxu2 %v6844_v63  ;;  %3002 = vmatpush.msrb.mxu3 %v6845_v11  ;;  %v1910_v4 = vadd.f32 %v6851_v51, %v6850_v35 }
 0x8e5   :  { %v2642_v32 = vpop.f32.mrf.mxu0  ;;  %v2662_v55 = vpop.f32.mrf.mxu1 }
 0x8e6   :  { %v2705_v5 = vadd.f32 %v2642_v32, %v1787_v56  ;;  %v2706_v54 = vadd.f32 %v2662_v55, %v1828_v22  ;;  %v6852_v56 = vld [vmem:[#allocation75_spill] sm:$0xff] }
 0x8e8   :  { %v3402_v44 = vmul.f32 -1.442695, %v2705_v5  ;;  %v3403_v47 = vmul.f32 -1.442695, %v2706_v54  ;;  %v6853_v5 = vld [vmem:[#allocation74_spill] sm:$0xff] }
 0x8e9   :  { %v1869_v22 = vadd.f32 %v6853_v5, %v6852_v56 }
 0x8ea   :  { %3623 = vpow2.f32 %v3402_v44 }
 0x8eb   :  { %3625 = vpow2.f32 %v3403_v47 }
 0x8ec   :  { %v2702_v63 = vpop.f32.mrf.mxu3  ;;  %v2682_v61 = vpop.f32.mrf.mxu2 }
 0x8ed   :  { %v2708_v46 = vadd.f32 %v2702_v63, %v1910_v4  ;;  %v2707_v54 = vadd.f32 %v2682_v61, %v1869_v22 }
 0x8ef   :  { %v3404_v11 = vmul.f32 -1.442695, %v2708_v46 }
 0x8f0   :  { %v3624_v1 = vpop.eup %3623 }
 0x8f1   :  { %v3626_v62 = vpop.eup %3625  ;;  %v2712_v23 = vadd.f32 1.0, %v3624_v1  ;;  %3627 = vpow2.f32 %v3404_v11 }
 0x8f2   :  { %v2731_v3 = vadd.f32 1.0, %v3626_v62 }
 0x8f3   :  { %3629 = vrcp.f32 %v2712_v23  ;;  %v2724_v35 = vand.u32 2147483648, %v2712_v23  ;;  %v2722_v11 = vand.u32 2147483647, %v2712_v23  ;;  %vm2718_vm3 = vweird.f32 %v2712_v23 }
 0x8f4   :  { %3631 = vrcp.f32 %v2731_v3  ;;  %v2743_v1 = vand.u32 2147483648, %v2731_v3  ;;  %v2741_v38 = vand.u32 2147483647, %v2731_v3  ;;  %vm2737_vm4 = vweird.f32 %v2731_v3 }
 0x8f5   :  { %v2725_v61 = vor.u32 1.1754944e-38, %v2724_v35  ;;  %vm2723_vm7 = vcmp.eq.f32.partialorder %v2722_v11, 8.507059e+37 }
 0x8f6   :  { %vm2742_vm8 = vcmp.eq.f32.partialorder %v2741_v38, 8.507059e+37 }
 0x8f7   :  { %v3628_v32 = vpop.eup %3627 }
 0x8f8   :  { %v2751_v44 = vadd.f32 1.0, %v3628_v32 }
 0x8f9   :  { %v3630_v55 = vpop.eup %3629 }
 0x8fa   :  { %v3632_v51 = vpop.eup %3631  ;;  %v2714_v47 = vmul.f32 %v3630_v55, %v2712_v23  ;;  %3633 = vrcp.f32 %v2751_v44  ;;  %vm2719_vm1 = vweird.f32 %v3630_v55  ;;  %vm2757_vm10 = vweird.f32 %v2751_v44 }
 0x8fb   :  { %v2733_v4 = vmul.f32 %v3632_v51, %v2731_v3  ;;  %3635 = vtanh.f32 %v2707_v54  ;;  %vm2738_vm2 = vweird.f32 %v3632_v51  ;;  %vm2720_vm5 = vmor %vm2718_vm3, %vm2719_vm1  ;;  %v2761_v35 = vand.u32 2147483647, %v2751_v44 }
 0x8fc   :  { %v2715_v46 = vsub.f32 1.0, %v2714_v47  ;;  %vm2739_vm6 = vmor %vm2737_vm4, %vm2738_vm2  ;;  %v2744_v47 = vor.u32 1.1754944e-38, %v2743_v1 }
 0x8fd   :  { %v2734_v63 = vsub.f32 1.0, %v2733_v4  ;;  %vm2762_vm12 = vcmp.eq.f32.partialorder %v2761_v35, 8.507059e+37 }
 0x8fe   :  { %v2716_v62 = vmul.f32 %v3630_v55, %v2715_v46 }
 0x8ff   :  { %v2735_v34 = vmul.f32 %v3632_v51, %v2734_v63 }
 0x900   :  { %v3634_v27 = vpop.eup %3633  ;;  %v2717_v5 = vadd.f32 %v3630_v55, %v2716_v62 }
 0x901   :  { %v2736_v32 = vadd.f32 %v3632_v51, %v2735_v34  ;;  %v2753_v22 = vmul.f32 %v3634_v27, %v2751_v44  ;;  %v3636_v54 = vpop.eup %3635  ;;  %vm2758_vm9 = vweird.f32 %v3634_v27  ;;  %v2763_v34 = vand.u32 2147483648, %v2751_v44 }
 0x902   :  { %v2721_v4 = vsel %vm2720_vm5, %v3630_v55, %v2717_v5  ;;  %vm2759_vm11 = vmor %vm2757_vm10, %vm2758_vm9 }
 0x903   :  { %v2726_v56 = vsel %vm2723_vm7, %v2725_v61, %v2721_v4  ;;  %v2740_v46 = vsel %vm2739_vm6, %v3632_v51, %v2736_v32  ;;  %v2754_v18 = vsub.f32 1.0, %v2753_v22  ;;  %v2764_v1 = vor.u32 1.1754944e-38, %v2763_v34  ;;  %v6886_v4 = vld [vmem:[#allocation75_spill] sm:$0xff] }
 0x904   :  { %v2745_v63 = vsel %vm2742_vm8, %v2744_v47, %v2740_v46  ;;  %v2768_v36 = vmul.f32 %v3636_v54, %v2726_v56  ;;  %v6887_v54 = vld [vmem:[#allocation46_spill] sm:$0xff] }
 0x905   :  { %v2767_v10 = vmul.f32 %v2745_v63, %v5951_v2  ;;  %v2755_v62 = vmul.f32 %v3634_v27, %v2754_v18  ;;  %v6884_v2 = vld [vmem:[#allocation51_spill] sm:$0xff]  ;;  %v1872_v46 = vadd.f32 %v6887_v54, %v6886_v4 }
 0x907   :  { %v6027_v23 = vadd.f32 %v2768_v36, %v2767_v10  ;;  %v2756_v3 = vadd.f32 %v3634_v27, %v2755_v62  ;;  %v6885_v10 = vld [vmem:[#allocation18_spill] sm:$0xff] }
 0x908   :  { %v1913_v36 = vadd.f32 %v6885_v10, %v6884_v2 }
 0x909   :  { %3637 = vtanh.f32 %v6027_v23  ;;  %v2760_v55 = vsel %vm2759_vm11, %v3634_v27, %v2756_v3 }
 0x90a   :  { %v2765_v51 = vsel %vm2762_vm12, %v2764_v1, %v2760_v55 }
 0x90f   :  { %v3638_v38 = vpop.eup %3637 }
 0x910   :  { %v2771_v11 = vmul.f32 %v3638_v38, %v2765_v51 }
 0x912   :  { %2792 = vmatmul.f32.vlgmr.msrb.gmra.mxu0 %v2771_v11  ;;  %2812 = vmatmul.f32.vlgmr.msrb.gmra.mxu1 %v2771_v11 }
 0x913   :  { %2832 = vmatmul.f32.vlgmr.msra.gmra.mxu2 %v2771_v11  ;;  %2852 = vmatmul.f32.vlgmr.msra.gmra.mxu3 %v2771_v11 }
 0x914   :  { %3078 = vmatpush.msrb.mxu0 %v5674_v13  ;;  %3098 = vmatpush.msrb.mxu1 %v5677_v16  ;;  %v6854_v13 = vld [vmem:[#allocation22_spill] sm:$0xff]  ;;  %v6855_v16 = vld [vmem:[#allocation60_spill] sm:$0xff] }
 0x915   :  { %3118 = vmatpush.msra.mxu2 %v5680_v17  ;;  %3138 = vmatpush.msra.mxu3 %v5683_v20  ;;  %v6856_v17 = vld [vmem:[#allocation54_spill] sm:$0xff]  ;;  %v6857_v20 = vld [vmem:[#allocation55_spill] sm:$0xff] }
 0x916   :  { %3079 = vmatpush.msrb.mxu0 %v5686_v7  ;;  %3099 = vmatpush.msrb.mxu1 %v5689_v57  ;;  %v6858_v7 = vld [vmem:[#allocation28_spill] sm:$0xff]  ;;  %v6859_v57 = vld [vmem:[#allocation65_spill] sm:$0xff] }
 0x917   :  { %3119 = vmatpush.msra.mxu2 %v5692_v39  ;;  %3139 = vmatpush.msra.mxu3 %v5695_v40  ;;  %v6860_v39 = vld [vmem:[#allocation64_spill] sm:$0xff] }
 0x918   :  { %3080 = vmatpush.msrb.mxu0 %v5698_v6  ;;  %3100 = vmatpush.msrb.mxu1 %v5701_v15  ;;  %v6861_v40 = vld [vmem:[#allocation24_spill] sm:$0xff]  ;;  %v6863_v15 = vld [vmem:[#allocation23_spill] sm:$0xff] }
 0x919   :  { %3120 = vmatpush.msra.mxu2 %v5704_v42  ;;  %3140 = vmatpush.msra.mxu3 %v5707_v53  ;;  %v6862_v6 = vld [vmem:[#allocation32_spill] sm:$0xff]  ;;  %v6864_v42 = vld [vmem:[#allocation25_spill] sm:$0xff] }
 0x91a   :  { %3081 = vmatpush.msrb.mxu0 %v5710_v8  ;;  %3101 = vmatpush.msrb.mxu1 %v5713_v43  ;;  %v6865_v53 = vld [vmem:[#allocation37_spill] sm:$0xff]  ;;  %v6866_v8 = vld [vmem:[#allocation36_spill] sm:$0xff]  ;;  %v6867_v43 = vld [vmem:[#allocation26_spill] sm:$0xff] }
 0x91b   :  { %3121 = vmatpush.msra.mxu2 %v5716_v33  ;;  %3141 = vmatpush.msra.mxu3 %v5719_v9  ;;  %v6868_v33 = vld [vmem:[#allocation30_spill] sm:$0xff] }
 0x91c   :  { %3082 = vmatpush.msrb.mxu0 %v5722_v21  ;;  %3102 = vmatpush.msrb.mxu1 %v5725_v26  ;;  %v6869_v9 = vld [vmem:[#allocation38_spill] sm:$0xff]  ;;  %v6870_v21 = vld [vmem:[#allocation41_spill] sm:$0xff]  ;;  %v6871_v26 = vld [vmem:[#allocation40_spill] sm:$0xff] }
 0x91d   :  { %3122 = vmatpush.msra.mxu2 %v5728_v19  ;;  %3142 = vmatpush.msra.mxu3 %v5731_v60  ;;  %v6872_v19 = vld [vmem:[#allocation31_spill] sm:$0xff]  ;;  %v6873_v60 = vld [vmem:[#allocation33_spill] sm:$0xff] }
 0x91e   :  { %3083 = vmatpush.msrb.mxu0 %v5734_v48  ;;  %3103 = vmatpush.msrb.mxu1 %v5737_v45  ;;  %v6874_v48 = vld [vmem:[#allocation45_spill] sm:$0xff]  ;;  %v6875_v45 = vld [vmem:[#allocation39_spill] sm:$0xff] }
 0x91f   :  { %3123 = vmatpush.msra.mxu2 %v5740_v58  ;;  %3143 = vmatpush.msra.mxu3 %v5743_v14  ;;  %v6876_v58 = vld [vmem:[#allocation34_spill] sm:$0xff]  ;;  %v6877_v14 = vld [vmem:[#allocation35_spill] sm:$0xff] }
 0x920   :  { %3084 = vmatpush.msrb.mxu0 %v5746_v49  ;;  %3104 = vmatpush.msrb.mxu1 %v5749_v25  ;;  %v6878_v49 = vld [vmem:[#allocation44_spill] sm:$0xff]  ;;  %v6879_v25 = vld [vmem:[#allocation53_spill] sm:$0xff] }
 0x921   :  { %3124 = vmatpush.msra.mxu2 %v5752_v31  ;;  %3144 = vmatpush.msra.mxu3 %v5755_v0  ;;  %v6880_v31 = vld [vmem:[#allocation27_spill] sm:$0xff]  ;;  %v6881_v0 = vld [vmem:[#allocation69_spill] sm:$0xff] }
 0x922   :  { %3085 = vmatpush.msrb.mxu0 %v5758_v52  ;;  %3105 = vmatpush.msrb.mxu1 %v5761_v41  ;;  %v1790_v52 = vadd.f32 %v6881_v0, %v6880_v31  ;;  %v6882_v41 = vld [vmem:[#allocation21_spill] sm:$0xff] }
 0x923   :  { %3125 = vmatpush.msra.mxu2 %v5764_v29  ;;  %3145 = vmatpush.msra.mxu3 %v5767_v50  ;;  %v6883_v29 = vld [vmem:[#allocation68_spill] sm:$0xff] }
 0x924   :  { %3086 = vmatpush.msrb.mxu0 %v5770_v30  ;;  %3106 = vmatpush.msrb.mxu1 %v5773_v59  ;;  %v1831_v50 = vadd.f32 %v6883_v29, %v6882_v41 }
 0x925   :  { %3126 = vmatpush.msra.mxu2 %v5776_v28  ;;  %3146 = vmatpush.msra.mxu3 %v5779_v24 }
 0x926   :  { %3087 = vmatpush.msrb.mxu0 %v5782_v12  ;;  %3107 = vmatpush.msrb.mxu1 %v5785_v37 }
 0x927   :  { %3127 = vmatpush.msra.mxu2 %v6854_v13  ;;  %3147 = vmatpush.msra.mxu3 %v6855_v16 }
 0x928   :  { %3088 = vmatpush.msrb.mxu0 %v6856_v17  ;;  %3108 = vmatpush.msrb.mxu1 %v6857_v20 }
 0x929   :  { %3128 = vmatpush.msra.mxu2 %v6858_v7  ;;  %3148 = vmatpush.msra.mxu3 %v6859_v57 }
 0x92a   :  { %3089 = vmatpush.msrb.mxu0 %v6860_v39  ;;  %3109 = vmatpush.msrb.mxu1 %v6861_v40 }
 0x92b   :  { %3129 = vmatpush.msra.mxu2 %v6862_v6  ;;  %3149 = vmatpush.msra.mxu3 %v6863_v15 }
 0x92c   :  { %3090 = vmatpush.msrb.mxu0 %v6864_v42  ;;  %3110 = vmatpush.msrb.mxu1 %v6865_v53 }
 0x92d   :  { %3130 = vmatpush.msra.mxu2 %v6866_v8  ;;  %3150 = vmatpush.msra.mxu3 %v6867_v43 }
 0x92e   :  { %3091 = vmatpush.msrb.mxu0 %v6868_v33  ;;  %3111 = vmatpush.msrb.mxu1 %v6869_v9 }
 0x92f   :  { %3131 = vmatpush.msra.mxu2 %v6870_v21  ;;  %3151 = vmatpush.msra.mxu3 %v6871_v26 }
 0x930   :  { %3092 = vmatpush.msrb.mxu0 %v6872_v19  ;;  %3112 = vmatpush.msrb.mxu1 %v6873_v60 }
 0x931   :  { %3132 = vmatpush.msra.mxu2 %v6874_v48  ;;  %3152 = vmatpush.msra.mxu3 %v6875_v45 }
 0x932   :  { %3093 = vmatpush.msrb.mxu0 %v6876_v58  ;;  %3113 = vmatpush.msrb.mxu1 %v6877_v14 }
 0x933   :  { %3133 = vmatpush.msra.mxu2 %v6878_v49  ;;  %3153 = vmatpush.msra.mxu3 %v6879_v25 }
 0x98f   :  { %v2793_v30 = vpop.f32.mrf.mxu0  ;;  %v2813_v59 = vpop.f32.mrf.mxu1 }
 0x990   :  { %v2856_v28 = vadd.f32 %v2793_v30, %v1790_v52  ;;  %v2857_v24 = vadd.f32 %v2813_v59, %v1831_v50  ;;  %v6889_v50 = vld [vmem:[#allocation19_spill] sm:$0xff] }
 0x991   :  { %v1834_v30 = vadd.f32 %v6889_v50, %v6882_v41  ;;  %v3240_v50 = vld [vmem:[#allocation10 + $0x70] sm:$0xff] }
 0x992   :  { %v3405_v12 = vmul.f32 -1.442695, %v2856_v28  ;;  %v3406_v37 = vmul.f32 -1.442695, %v2857_v24 }
 0x994   :  { %3639 = vpow2.f32 %v3405_v12 }
 0x995   :  { %3641 = vpow2.f32 %v3406_v37 }
 0x996   :  { %v2853_v18 = vpop.f32.mrf.mxu3  ;;  %v2833_v22 = vpop.f32.mrf.mxu2 }
 0x997   :  { %v2859_v27 = vadd.f32 %v2853_v18, %v1913_v36  ;;  %v2858_v3 = vadd.f32 %v2833_v22, %v1872_v46  ;;  %v6890_v36 = vld [vmem:[#allocation47_spill] sm:$0xff]  ;;  %v6891_v46 = vld [vmem:[#allocation50_spill] sm:$0xff] }
 0x998   :  { %v1916_v18 = vadd.f32 %v6890_v36, %v6884_v2 }
 0x999   :  { %v3407_v56 = vmul.f32 -1.442695, %v2859_v27 }
 0x99a   :  { %v3640_v44 = vpop.eup %3639 }
 0x99b   :  { %v3642_v5 = vpop.eup %3641  ;;  %v2863_v61 = vadd.f32 1.0, %v3640_v44  ;;  %3643 = vpow2.f32 %v3407_v56 }
 0x99c   :  { %v2882_v32 = vadd.f32 1.0, %v3642_v5 }
 0x99d   :  { %3645 = vrcp.f32 %v2863_v61  ;;  %v2875_v51 = vand.u32 2147483648, %v2863_v61  ;;  %v2873_v16 = vand.u32 2147483647, %v2863_v61  ;;  %vm2869_vm15 = vweird.f32 %v2863_v61 }
 0x99e   :  { %3647 = vrcp.f32 %v2882_v32  ;;  %v2894_v11 = vand.u32 2147483648, %v2882_v32  ;;  %v2892_v20 = vand.u32 2147483647, %v2882_v32  ;;  %vm2888_vm0 = vweird.f32 %v2882_v32 }
 0x99f   :  { %v2876_v39 = vor.u32 1.1754944e-38, %v2875_v51  ;;  %vm2874_vm3 = vcmp.eq.f32.partialorder %v2873_v16, 8.507059e+37 }
 0x9a0   :  { %v2895_v15 = vor.u32 1.1754944e-38, %v2894_v11  ;;  %vm2893_vm4 = vcmp.eq.f32.partialorder %v2892_v20, 8.507059e+37 }
 0x9a1   :  { %v3644_v47 = vpop.eup %3643 }
 0x9a2   :  { %v2902_v63 = vadd.f32 1.0, %v3644_v47 }
 0x9a3   :  { %v3646_v62 = vpop.eup %3645 }
 0x9a4   :  { %v3648_v34 = vpop.eup %3647  ;;  %v2865_v35 = vmul.f32 %v3646_v62, %v2863_v61  ;;  %3649 = vrcp.f32 %v2902_v63  ;;  %vm2870_vm13 = vweird.f32 %v3646_v62  ;;  %v2914_v45 = vand.u32 2147483648, %v2902_v63 }
 0x9a5   :  { %v2884_v55 = vmul.f32 %v3648_v34, %v2882_v32  ;;  %3651 = vtanh.f32 %v2858_v3  ;;  %vm2889_vm14 = vweird.f32 %v3648_v34  ;;  %vm2871_vm1 = vmor %vm2869_vm15, %vm2870_vm13  ;;  %vm2908_vm6 = vweird.f32 %v2902_v63 }
 0x9a6   :  { %v2866_v1 = vsub.f32 1.0, %v2865_v35  ;;  %vm2890_vm2 = vmor %vm2888_vm0, %vm2889_vm14  ;;  %v2912_v58 = vand.u32 2147483647, %v2902_v63  ;;  %v2915_v49 = vor.u32 1.1754944e-38, %v2914_v45 }
 0x9a7   :  { %v2885_v38 = vsub.f32 1.0, %v2884_v55 }
 0x9a8   :  { %v2867_v13 = vmul.f32 %v3646_v62, %v2866_v1  ;;  %vm2913_vm8 = vcmp.eq.f32.partialorder %v2912_v58, 8.507059e+37 }
 0x9a9   :  { %v2886_v17 = vmul.f32 %v3648_v34, %v2885_v38 }
 0x9aa   :  { %v3650_v7 = vpop.eup %3649  ;;  %v2868_v57 = vadd.f32 %v3646_v62, %v2867_v13 }
 0x9ab   :  { %v2887_v40 = vadd.f32 %v3648_v34, %v2886_v17  ;;  %v2904_v6 = vmul.f32 %v3650_v7, %v2902_v63  ;;  %v3652_v53 = vpop.eup %3651  ;;  %vm2909_vm5 = vweird.f32 %v3650_v7  ;;  %v1875_v63 = vadd.f32 %v6891_v46, %v6886_v4  ;;  %v3231_v46 = vld [vmem:[#allocation10 + $0x28] sm:$0xff] }
 0x9ac   :  { %v2872_v42 = vsel %vm2871_vm1, %v3646_v62, %v2868_v57  ;;  %vm2910_vm7 = vmor %vm2908_vm6, %vm2909_vm5 }
 0x9ad   :  { %v2877_v8 = vsel %vm2874_vm3, %v2876_v39, %v2872_v42  ;;  %v2891_v43 = vsel %vm2890_vm2, %v3648_v34, %v2887_v40  ;;  %v2905_v33 = vsub.f32 1.0, %v2904_v6 }
 0x9ae   :  { %v2896_v9 = vsel %vm2893_vm4, %v2895_v15, %v2891_v43  ;;  %v2919_v21 = vmul.f32 %v3652_v53, %v2877_v8 }
 0x9af   :  { %v2918_v26 = vmul.f32 %v2896_v9, %v6027_v23  ;;  %v2906_v19 = vmul.f32 %v3650_v7, %v2905_v33  ;;  %v6888_v23 = vld [vmem:[#allocation29_spill] sm:$0xff] }
 0x9b0   :  { %v1793_v29 = vadd.f32 %v6888_v23, %v6880_v31 }
 0x9b1   :  { %v6103_v60 = vadd.f32 %v2919_v21, %v2918_v26  ;;  %v2907_v48 = vadd.f32 %v3650_v7, %v2906_v19 }
 0x9b3   :  { %3653 = vtanh.f32 %v6103_v60  ;;  %v2911_v14 = vsel %vm2910_vm7, %v3650_v7, %v2907_v48 }
 0x9b4   :  { %v2916_v0 = vsel %vm2913_vm8, %v2915_v49, %v2911_v14 }
 0x9b9   :  { %v3654_v25 = vpop.eup %3653 }
 0x9ba   :  { %v2922_v52 = vmul.f32 %v3654_v25, %v2916_v0 }
 0x9bc   :  { %2943 = vmatmul.f32.vlgmr.msra.gmra.mxu0 %v2922_v52  ;;  %2963 = vmatmul.f32.vlgmr.msra.gmra.mxu1 %v2922_v52 }
 0x9bd   :  { %2983 = vmatmul.f32.vlgmr.msrb.gmra.mxu2 %v2922_v52  ;;  %3003 = vmatmul.f32.vlgmr.msrb.gmra.mxu3 %v2922_v52 }
 0xa39   :  { %v2944_v59 = vpop.f32.mrf.mxu0  ;;  %v2964_v28 = vpop.f32.mrf.mxu1 }
 0xa3a   :  { %v3007_v24 = vadd.f32 %v2944_v59, %v1793_v29  ;;  %v3008_v12 = vadd.f32 %v2964_v28, %v1834_v30  ;;  %v3239_v30 = vld [vmem:[#allocation10 + $0x68] sm:$0xff]  ;;  %v3238_v59 = vld [vmem:[#allocation10 + $0x60] sm:$0xff]  ;;  %v3237_v28 = vld [vmem:[#allocation10 + $0x58] sm:$0xff] }
 0xa3c   :  { %v3408_v37 = vmul.f32 -1.442695, %v3007_v24  ;;  %v3409_v10 = vmul.f32 -1.442695, %v3008_v12  ;;  %v3236_v24 = vld [vmem:[#allocation10 + $0x50] sm:$0xff]  ;;  %v3235_v12 = vld [vmem:[#allocation10 + $0x48] sm:$0xff] }
 0xa3e   :  { %3655 = vpow2.f32 %v3408_v37  ;;  %v3234_v37 = vld [vmem:[#allocation10 + $0x40] sm:$0xff] }
 0xa3f   :  { %3657 = vpow2.f32 %v3409_v10  ;;  %v6892_v10 = vld [vmem:[#allocation71_spill] sm:$0xff] }
 0xa40   :  { %v3004_v27 = vpop.f32.mrf.mxu3  ;;  %v2984_v47 = vpop.f32.mrf.mxu2  ;;  %v1796_v36 = vadd.f32 %v6892_v10, %v6880_v31  ;;  %v6894_v31 = vld [vmem:[#allocation20_spill] sm:$0xff] }
 0xa41   :  { %v3010_v56 = vadd.f32 %v3004_v27, %v1916_v18  ;;  %v3009_v34 = vadd.f32 %v2984_v47, %v1875_v63  ;;  %v6893_v18 = vld [vmem:[#allocation70_spill] sm:$0xff]  ;;  %v3230_v63 = vld [vmem:[#allocation10 + $0x20] sm:$0xff] }
 0xa42   :  { %v1837_v27 = vadd.f32 %v6893_v18, %v6882_v41  ;;  %v3229_v41 = vld [vmem:[#allocation10 + $0x18] sm:$0xff] }
 0xa43   :  { %v3410_v44 = vmul.f32 -1.442695, %v3010_v56 }
 0xa44   :  { %v3656_v5 = vpop.eup %3655 }
 0xa45   :  { %v3658_v61 = vpop.eup %3657  ;;  %v3014_v32 = vadd.f32 1.0, %v3656_v5  ;;  %3659 = vpow2.f32 %v3410_v44  ;;  %v3233_v5 = vld [vmem:[#allocation10 + $0x38] sm:$0xff] }
 0xa46   :  { %v3033_v22 = vadd.f32 1.0, %v3658_v61 }
 0xa47   :  { %3661 = vrcp.f32 %v3014_v32  ;;  %v3026_v11 = vand.u32 2147483648, %v3014_v32  ;;  %v3024_v17 = vand.u32 2147483647, %v3014_v32  ;;  %vm3020_vm11 = vweird.f32 %v3014_v32 }
 0xa48   :  { %3663 = vrcp.f32 %v3033_v22  ;;  %v3045_v13 = vand.u32 2147483648, %v3033_v22  ;;  %v3043_v7 = vand.u32 2147483647, %v3033_v22  ;;  %vm3039_vm12 = vweird.f32 %v3033_v22 }
 0xa49   :  { %v3027_v40 = vor.u32 1.1754944e-38, %v3026_v11  ;;  %vm3025_vm15 = vcmp.eq.f32.partialorder %v3024_v17, 8.507059e+37  ;;  %v3281_v17 = vld [vmem:[#allocation12 + $0x70] sm:$0xff] }
 0xa4a   :  { %v3046_v42 = vor.u32 1.1754944e-38, %v3045_v13  ;;  %vm3044_vm0 = vcmp.eq.f32.partialorder %v3043_v7, 8.507059e+37  ;;  %v3226_v13 = vld [vmem:[#allocation10] sm:$0xff]  ;;  %v3280_v7 = vld [vmem:[#allocation12 + $0x68] sm:$0xff] }
 0xa4b   :  { %v3660_v54 = vpop.eup %3659 }
 0xa4c   :  { %v3053_v62 = vadd.f32 1.0, %v3660_v54 }
 0xa4d   :  { %v3662_v3 = vpop.eup %3661 }
 0xa4e   :  { %v3664_v35 = vpop.eup %3663  ;;  %v3016_v55 = vmul.f32 %v3662_v3, %v3014_v32  ;;  %3665 = vrcp.f32 %v3053_v62  ;;  %vm3021_vm9 = vweird.f32 %v3662_v3  ;;  %v3065_v14 = vand.u32 2147483648, %v3053_v62 }
 0xa4f   :  { %v3035_v1 = vmul.f32 %v3664_v35, %v3033_v22  ;;  %3667 = vtanh.f32 %v3009_v34  ;;  %vm3040_vm10 = vweird.f32 %v3664_v35  ;;  %vm3022_vm13 = vmor %vm3020_vm11, %vm3021_vm9  ;;  %vm3059_vm2 = vweird.f32 %v3053_v62  ;;  %v3232_v22 = vld [vmem:[#allocation10 + $0x30] sm:$0xff] }
 0xa50   :  { %v3017_v38 = vsub.f32 1.0, %v3016_v55  ;;  %vm3041_vm14 = vmor %vm3039_vm12, %vm3040_vm10  ;;  %v3063_v49 = vand.u32 2147483647, %v3053_v62  ;;  %v3066_v0 = vor.u32 1.1754944e-38, %v3065_v14 }
 0xa51   :  { %v3036_v51 = vsub.f32 1.0, %v3035_v1  ;;  %v3227_v1 = vld [vmem:[#allocation10 + $0x8] sm:$0xff] }
 0xa52   :  { %v3018_v16 = vmul.f32 %v3662_v3, %v3017_v38  ;;  %vm3064_vm4 = vcmp.eq.f32.partialorder %v3063_v49, 8.507059e+37  ;;  %v3276_v49 = vld [vmem:[#allocation12 + $0x48] sm:$0xff] }
 0xa53   :  { %v3037_v20 = vmul.f32 %v3664_v35, %v3036_v51 }
 0xa54   :  { %v3666_v57 = vpop.eup %3665  ;;  %v3019_v39 = vadd.f32 %v3662_v3, %v3018_v16 }
 0xa55   :  { %v3038_v6 = vadd.f32 %v3664_v35, %v3037_v20  ;;  %v3055_v15 = vmul.f32 %v3666_v57, %v3053_v62  ;;  %v3668_v8 = vpop.eup %3667  ;;  %vm3060_vm1 = vweird.f32 %v3666_v57  ;;  %v1919_v62 = vadd.f32 %v6894_v31, %v6884_v2  ;;  %v3282_v2 = vld [vmem:[#allocation12 + $0x78] sm:$0xff] }
 0xa56   :  { %v3023_v53 = vsel %vm3022_vm13, %v3662_v3, %v3019_v39  ;;  %vm3061_vm3 = vmor %vm3059_vm2, %vm3060_vm1  ;;  %3287 = vmatpush.msra.mxu1 %v3282_v2  ;;  %v6895_v39 = vld [vmem:[#allocation61_spill] sm:$0xff] }
 0xa57   :  { %v3028_v43 = vsel %vm3025_vm15, %v3027_v40, %v3023_v53  ;;  %v3042_v33 = vsel %vm3041_vm14, %v3664_v35, %v3038_v6  ;;  %v3056_v9 = vsub.f32 1.0, %v3055_v15  ;;  %v3228_v35 = vld [vmem:[#allocation10 + $0x10] sm:$0xff]  ;;  %v1878_v40 = vadd.f32 %v6895_v39, %v6886_v4  ;;  %v3279_v15 = vld [vmem:[#allocation12 + $0x60] sm:$0xff] }
 0xa58   :  { %v3047_v21 = vsel %vm3044_vm0, %v3046_v42, %v3042_v33  ;;  %v3070_v26 = vmul.f32 %v3668_v8, %v3028_v43  ;;  %3288 = vmatpush.msra.mxu1 %v3281_v17  ;;  %v3278_v33 = vld [vmem:[#allocation12 + $0x58] sm:$0xff] }
 0xa59   :  { %v3069_v19 = vmul.f32 %v3047_v21, %v6103_v60  ;;  %v3057_v48 = vmul.f32 %v3666_v57, %v3056_v9  ;;  %v3241_v60 = vld [vmem:[#allocation10 + $0x78] sm:$0xff] }
 0xa5a   :  { %3246 = vmatpush.msra.mxu0 %v3241_v60  ;;  %3289 = vmatpush.msra.mxu1 %v3280_v7 }
 0xa5b   :  { %v6115_v45 = vadd.f32 %v3070_v26, %v3069_v19  ;;  %v3058_v58 = vadd.f32 %v3666_v57, %v3057_v48  ;;  %v3277_v26 = vld [vmem:[#allocation12 + $0x50] sm:$0xff] }
 0xa5c   :  { %3247 = vmatpush.msra.mxu0 %v3240_v50  ;;  %3290 = vmatpush.msra.mxu1 %v3279_v15 }
 0xa5d   :  { %3669 = vtanh.f32 %v6115_v45  ;;  %v3062_v25 = vsel %vm3061_vm3, %v3666_v57, %v3058_v58 }
 0xa5e   :  { %v3067_v23 = vsel %vm3064_vm4, %v3066_v0, %v3062_v25  ;;  %3248 = vmatpush.msra.mxu0 %v3239_v30  ;;  %3291 = vmatpush.msra.mxu1 %v3278_v33 }
 0xa60   :  { %3249 = vmatpush.msra.mxu0 %v3238_v59  ;;  %3292 = vmatpush.msra.mxu1 %v3277_v26 }
 0xa62   :  { %3250 = vmatpush.msra.mxu0 %v3237_v28  ;;  %3293 = vmatpush.msra.mxu1 %v3276_v49 }
 0xa63   :  { %v3670_v52 = vpop.eup %3669 }
 0xa64   :  { %v3073_v29 = vmul.f32 %v3670_v52, %v3067_v23  ;;  %3251 = vmatpush.msra.mxu0 %v3236_v24  ;;  %v3274_v24 = vld [vmem:[#allocation12 + $0x38] sm:$0xff] }
 0xa66   :  { %3094 = vmatmul.f32.vlgmr.msrb.gmra.mxu0 %v3073_v29  ;;  %3114 = vmatmul.f32.vlgmr.msrb.gmra.mxu1 %v3073_v29 }
 0xa67   :  { %3134 = vmatmul.f32.vlgmr.msra.gmra.mxu2 %v3073_v29  ;;  %3154 = vmatmul.f32.vlgmr.msra.gmra.mxu3 %v3073_v29  ;;  %v3275_v29 = vld [vmem:[#allocation12 + $0x40] sm:$0xff] }
 0xa68   :  { %3252 = vmatpush.msra.mxu0 %v3235_v12  ;;  %3294 = vmatpush.msra.mxu1 %v3275_v29 }
 0xa6a   :  { %3253 = vmatpush.msra.mxu0 %v3234_v37  ;;  %3295 = vmatpush.msra.mxu1 %v3274_v24 }
 0xa6c   :  { %3254 = vmatpush.msra.mxu0 %v3233_v5 }
 0xa6e   :  { %3255 = vmatpush.msra.mxu0 %v3232_v22 }
 0xa70   :  { %3256 = vmatpush.msra.mxu0 %v3231_v46 }
 0xa72   :  { %3257 = vmatpush.msra.mxu0 %v3230_v63  ;;  %v3270_v63 = vld [vmem:[#allocation12 + $0x18] sm:$0xff] }
 0xa74   :  { %3258 = vmatpush.msra.mxu0 %v3229_v41 }
 0xa76   :  { %3259 = vmatpush.msra.mxu0 %v3228_v35  ;;  %v3269_v35 = vld [vmem:[#allocation12 + $0x10] sm:$0xff] }
 0xa78   :  { %3260 = vmatpush.msra.mxu0 %v3227_v1  ;;  %v3267_v1 = vld [vmem:[#allocation12] sm:$0xff] }
 0xa7a   :  { %3261 = vmatpush.msra.mxu0 %v3226_v13 }
 0xae3   :  { %v3095_v56 = vpop.f32.mrf.mxu0  ;;  %v3115_v44 = vpop.f32.mrf.mxu1 }
 0xae4   :  { %v3158_v61 = vadd.f32 %v3095_v56, %v1796_v36  ;;  %v3159_v32 = vadd.f32 %v3115_v44, %v1837_v27  ;;  %v3273_v56 = vld [vmem:[#allocation12 + $0x30] sm:$0xff] }
 0xae5   :  { %3296 = vmatpush.msra.mxu1 %v3273_v56 }
 0xae6   :  { %v3411_v47 = vmul.f32 -1.442695, %v3158_v61  ;;  %v3412_v54 = vmul.f32 -1.442695, %v3159_v32  ;;  %v3272_v61 = vld [vmem:[#allocation12 + $0x28] sm:$0xff] }
 0xae7   :  { %3297 = vmatpush.msra.mxu1 %v3272_v61 }
 0xae8   :  { %3671 = vpow2.f32 %v3411_v47  ;;  %v3271_v47 = vld [vmem:[#allocation12 + $0x20] sm:$0xff] }
 0xae9   :  { %3673 = vpow2.f32 %v3412_v54  ;;  %3298 = vmatpush.msra.mxu1 %v3271_v47 }
 0xaea   :  { %v3155_v3 = vpop.f32.mrf.mxu3  ;;  %v3135_v20 = vpop.f32.mrf.mxu2 }
 0xaeb   :  { %v3161_v34 = vadd.f32 %v3155_v3, %v1919_v62  ;;  %v3160_v53 = vadd.f32 %v3135_v20, %v1878_v40  ;;  %3299 = vmatpush.msra.mxu1 %v3270_v63 }
 0xaed   :  { %v3413_v55 = vmul.f32 -1.442695, %v3161_v34  ;;  %3300 = vmatpush.msra.mxu1 %v3269_v35 }
 0xaee   :  { %v3672_v38 = vpop.eup %3671 }
 0xaef   :  { %v3674_v51 = vpop.eup %3673  ;;  %v3165_v11 = vadd.f32 1.0, %v3672_v38  ;;  %3675 = vpow2.f32 %v3413_v55  ;;  %v3268_v55 = vld [vmem:[#allocation12 + $0x8] sm:$0xff]  ;;  %v3429_v38 = vld [vmem:[%s6151_s8] ss:$0 sm:$0xff] }
 0xaf0   :  { %v3184_v16 = vadd.f32 1.0, %v3674_v51  ;;  %3301 = vmatpush.msra.mxu1 %v3268_v55 }
 0xaf1   :  { %3677 = vrcp.f32 %v3165_v11  ;;  %v3177_v48 = vand.u32 2147483648, %v3165_v11  ;;  %v3175_v14 = vand.u32 2147483647, %v3165_v11  ;;  %vm3171_vm7 = vweird.f32 %v3165_v11 }
 0xaf2   :  { %3679 = vrcp.f32 %v3184_v16  ;;  %v3196_v4 = vand.u32 2147483648, %v3184_v16  ;;  %v3194_v0 = vand.u32 2147483647, %v3184_v16  ;;  %vm3190_vm8 = vweird.f32 %v3184_v16  ;;  %3302 = vmatpush.msra.mxu1 %v3267_v1 }
 0xaf3   :  { %v3178_v60 = vor.u32 1.1754944e-38, %v3177_v48  ;;  %vm3176_vm11 = vcmp.eq.f32.partialorder %v3175_v14, 8.507059e+37 }
 0xaf4   :  { %v3197_v59 = vor.u32 1.1754944e-38, %v3196_v4  ;;  %vm3195_vm12 = vcmp.eq.f32.partialorder %v3194_v0, 8.507059e+37 }
 0xaf5   :  { %v3676_v57 = vpop.eup %3675 }
 0xaf6   :  { %v6126_v6 = vadd.f32 1.0, %v3676_v57 }
 0xaf7   :  { %v3678_v42 = vpop.eup %3677 }
 0xaf8   :  { %v3680_v8 = vpop.eup %3679  ;;  %v3167_v43 = vmul.f32 %v3678_v42, %v3165_v11  ;;  %3681 = vrcp.f32 %v6126_v6  ;;  %vm3172_vm5 = vweird.f32 %v3678_v42  ;;  %v3216_v54 = vand.u32 2147483648, %v6126_v6 }
 0xaf9   :  { %v3186_v9 = vmul.f32 %v3680_v8, %v3184_v16  ;;  %3683 = vtanh.f32 %v3160_v53  ;;  %vm3191_vm6 = vweird.f32 %v3680_v8  ;;  %vm3173_vm9 = vmor %vm3171_vm7, %vm3172_vm5  ;;  %vm3210_vm14 = vweird.f32 %v6126_v6  ;;  %v3430_v16 = vld [vmem:[%s6153_s10] ss:$0 sm:$0xff] }
 0xafa   :  { %v3168_v21 = vsub.f32 1.0, %v3167_v43  ;;  %vm3192_vm10 = vmor %vm3190_vm8, %vm3191_vm6  ;;  %v3214_v46 = vand.u32 2147483647, %v6126_v6  ;;  %v3217_v31 = vor.u32 1.1754944e-38, %v3216_v54 }
 0xafb   :  { %v3187_v19 = vsub.f32 1.0, %v3186_v9 }
 0xafc   :  { %v3169_v58 = vmul.f32 %v3678_v42, %v3168_v21  ;;  %vm3215_vm0 = vcmp.eq.f32.partialorder %v3214_v46, 8.507059e+37 }
 0xafd   :  { %v3188_v25 = vmul.f32 %v3680_v8, %v3187_v19 }
 0xafe   :  { %v3682_v52 = vpop.eup %3681  ;;  %v3170_v23 = vadd.f32 %v3678_v42, %v3169_v58 }
 0xaff   :  { %v3189_v50 = vadd.f32 %v3680_v8, %v3188_v25  ;;  %v3206_v30 = vmul.f32 %v3682_v52, %v6126_v6  ;;  %v3684_v12 = vpop.eup %3683  ;;  %vm3211_vm13 = vweird.f32 %v3682_v52 }
 0xb00   :  { %v3174_v28 = vsel %vm3173_vm9, %v3678_v42, %v3170_v23  ;;  %vm3212_vm15 = vmor %vm3210_vm14, %vm3211_vm13 }
 0xb01   :  { %v3179_v37 = vsel %vm3176_vm11, %v3178_v60, %v3174_v28  ;;  %v3193_v10 = vsel %vm3192_vm10, %v3680_v8, %v3189_v50  ;;  %v3207_v36 = vsub.f32 1.0, %v3206_v30 }
 0xb02   :  { %v3198_v18 = vsel %vm3195_vm12, %v3197_v59, %v3193_v10  ;;  %v3221_v27 = vmul.f32 %v3684_v12, %v3179_v37 }
 0xb03   :  { %v3220_v44 = vmul.f32 %v3198_v18, %v6115_v45  ;;  %v3208_v5 = vmul.f32 %v3682_v52, %v3207_v36 }
 0xb05   :  { %v3222_v32 = vadd.f32 %v3221_v27, %v3220_v44  ;;  %v3209_v22 = vadd.f32 %v3682_v52, %v3208_v5 }
 0xb07   :  { %3685 = vtanh.f32 %v3222_v32  ;;  %v3213_v45 = vsel %vm3212_vm15, %v3682_v52, %v3209_v22 }
 0xb08   :  { %v3218_v41 = vsel %vm3215_vm0, %v3217_v31, %v3213_v45 }
 0xb0d   :  { %v3686_v62 = vpop.eup %3685 }
 0xb0e   :  { %v3224_v3 = vmul.f32 %v3686_v62, %v3218_v41 }
 0xb10   :  { %v3225_v34 = vmax.f32 %v3224_v3, 0.0 }
 0xb12   :  { %3262 = vmatmul.f32.vlgmr.msra.gmra.mxu0 %v3225_v34 }
 0xb8f   :  { %v3263_v51 = vpop.f32.mrf.mxu0 }
 0xb90   :  { %v3264_v11 = vadd.f32 %v3429_v38, %v3263_v51 }
 0xb92   :  { %v3266_v13 = vmax.f32 %v3264_v11, 0.0 }
 0xb94   :  { %3303 = vmatmul.f32.vlgmr.msra.gmra.mxu1 %v3266_v13 }
 0xc11   :  { %v3304_v2 = vpop.f32.mrf.mxu1 }
 0xc12   :  { %v3305_v17 = vadd.f32 %v3430_v16, %v3304_v2 }
 0xc14   :  { %3307 = vst [vmem:[#allocation13] sm:$0xff] %v3305_v17 }
 0xc15   :  { %3318 = dma.vmem_to_hbm [thread:$0]  %s3314_s15, 128, %s3316_s17, [#allocation6]  }
 0xc16   :  { %3965 = dma.done.wait [#allocation6], 128  }
 0xc17   :  { %3966 = vsyncadd [#allocation6], 4294967168 }
 0xc18   :  { %3323 = vsyncpa [#allocation5], 1 }
 0xc19   :  { %3324 = vsyncpa [#allocation8], 1 }
 0xc1a   :  { %3325 = vsyncpa [#allocation11], 1 }
 0xc1b   :  { %3326 = vsyncpa [#allocation6], 1 }

</bundles_post_ra>
